<compile_context>
chip_gen: v6e
topology: v6e:2x2x1
jax: 0.10.0
libtpu: 0.0.40
codegen_flags: <defaults>
</compile_context>

<pallas_src>
import functools

import jax
import jax.numpy as jnp
from jax import lax
from jax.experimental import pallas as pl
from jax.experimental.pallas import tpu as pltpu


def _round_up(a, b):
    return (a + b - 1) // b * b


def _cdiv(a, b):
    return (a + b - 1) // b


# ------------------------------ fused kernel --------------------------------

def _make_kernel(kh, kw, s, cin, cout, th, ow, oh, rt, ohp, m_true, eps):
    """Build the fused conv + BN-stats + BN-affine + ReLU kernel.

    Grid = (2, N, RT): phase (0=stats, 1=apply+write), image, output-row slab.
    """
    inv_m = 1.0 / float(m_true)

    def kernel(x_ref, w_ref, g_ref, b_ref, o_ref,
               sum_sc, ssq_sc, scale_sc, bias_sc):
        p = pl.program_id(0)   # 0: BN-statistics pass, 1: BN+ReLU write pass
        b = pl.program_id(1)   # image index
        r = pl.program_id(2)   # output-row slab index within the image

        @pl.when((p == 0) & (b == 0) & (r == 0))
        def _init():
            sum_sc[...] = jnp.zeros_like(sum_sc)
            ssq_sc[...] = jnp.zeros_like(ssq_sc)

        row0 = r * th
        if th % 8 == 0:
            row0 = pl.multiple_of(row0, 8)

        # Fused im2col: per-tap MXU matmuls with f32 accumulation.  All slices
        # are contiguous (stride handled by the space-to-depth phase axis).
        acc = jnp.zeros((th * ow, cout), jnp.float32)
        for ikh in range(kh):
            for ikw in range(kw):
                tap = ikh * kw + ikw
                phase = (ikh % s) * s + (ikw % s)
                xs = x_ref[phase,
                           pl.ds(row0 + ikh // s, th),
                           (ikw // s):(ikw // s) + ow, :]          # (th, ow, cin)
                acc = acc + jnp.dot(xs.reshape(th * ow, cin), w_ref[tap],
                                    preferred_element_type=jnp.float32)
        a3 = acc.reshape(th, ow, cout)                              # (th, ow, cout)

        @pl.when(p == 0)
        def _stats():
            s_all = jnp.sum(a3, axis=(0, 1), keepdims=True)         # (1, 1, cout)
            q_all = jnp.sum(a3 * a3, axis=(0, 1), keepdims=True)
            if ohp > oh:
                # Last slab carries padded output rows that can see real input
                # rows -> exclude them from the batch statistics (exact).
                v = oh - (rt - 1) * th
                hd = a3[:v]
                s_hd = jnp.sum(hd, axis=(0, 1), keepdims=True)
                q_hd = jnp.sum(hd * hd, axis=(0, 1), keepdims=True)
                last = r == rt - 1
                s_all = jnp.where(last, s_hd, s_all)
                q_all = jnp.where(last, q_hd, q_all)
            sum_sc[...] += s_all
            ssq_sc[...] += q_all

        @pl.when((p == 1) & (b == 0) & (r == 0))
        def _fold():
            # TODO(synk): single-pass E[y^2]-mean^2 can cancel for |mean|>>std;
            # switch to a shifted accumulation if tolerances ever tighten.
            mean = sum_sc[...] * inv_m
            var = jnp.maximum(ssq_sc[...] * inv_m - mean * mean, 0.0)
            scale = g_ref[...] * lax.rsqrt(var + eps)
            scale_sc[...] = scale
            bias_sc[...] = b_ref[...] - mean * scale

        @pl.when(p == 1)
        def _apply():
            y = jnp.maximum(a3 * scale_sc[...] + bias_sc[...], 0.0)
            o_ref[...] = y.astype(o_ref.dtype)

    return kernel


# -------------------------------- wrapper ------------------------------------

@functools.partial(jax.jit,
                   static_argnames=("stride", "padding", "eps", "row_tile"))
def basic_conv2d(x_nchw, weight, gamma, beta, *, stride, padding,
                 eps=1e-3, row_tile=None):
    """Forward pass of BasicConv2d. x: (N, Cin, H, W) f32 -> (N, Cout, OH, OW) f32."""
    n, cin, h, w = x_nchw.shape
    cout, cin_w, kh, kw = weight.shape
    assert cin == cin_w
    s = int(stride)
    pad = int(padding)

    oh = (h + 2 * pad - kh) // s + 1
    ow = (w + 2 * pad - kw) // s + 1
    m_true = n * oh * ow
    n_taps = kh * kw

    # ---- per-generation VMEM budget -> row-slab size + vmem limit ----------
    try:
        cap = int(getattr(pltpu.get_tpu_info(), "vmem_capacity_bytes", 0)) or (64 << 20)
    except Exception:  # pragma: no cover - conservative fallback
        cap = 64 << 20                               # v7x-safe
    budget = max(12 << 20, min(cap // 3, 40 << 20))

    wp = _round_up(max(w + 2 * pad, (ow - 1) * s + kw), s)
    hp_est = _round_up(max(h + 2 * pad, (oh - 1) * s + kh), s)
    hs_est, ws = hp_est // s, wp // s

    lanes = _round_up(max(cout, 1), 128)
    fixed_est = (2 * s * s * hs_est * ws * cin * 2        # input slab (bf16) x2 bufs
                 + 2 * n_taps * cin * cout * 2            # weights (bf16) x2 bufs
                 + (256 << 10))                           # stats / scale / slack
    per_row = ow * (8 * cout + 8 * lanes + 4 * cin)       # out block x2 + acc/temps
    th = max(1, min(oh, (budget - fixed_est) // max(per_row, 1)))
    if row_tile is not None:
        th = max(1, min(th, int(row_tile), oh))
    if th >= 8:
        th = (th // 8) * 8
    rt = _cdiv(oh, th)
    ohp = rt * th

    hp = _round_up(max(h + 2 * pad, (ohp - 1) * s + kh), s)
    hs = hp // s

    fixed = (2 * s * s * hs * ws * cin * 2
             + 2 * n_taps * cin * cout * 2
             + (256 << 10))
    est = fixed + th * per_row
    vmem_limit = int(min(cap * 3 // 4, max(32 << 20, 2 * est)))

    # ---- XLA glue (layout plumbing only): NCHW->NHWC, zero pad, phase split -
    x_nhwc = jnp.transpose(x_nchw, (0, 2, 3, 1)).astype(jnp.bfloat16)
    x_pad = jnp.pad(x_nhwc, ((0, 0), (pad, hp - h - pad), (pad, wp - w - pad), (0, 0)))
    x_ph = x_pad.reshape(n, hs, s, ws, s, cin)
    x_ph = jnp.transpose(x_ph, (0, 2, 4, 1, 3, 5)).reshape(n, s * s, hs, ws, cin)

    # weight (Cout, Cin, KH, KW) -> (KH*KW, Cin, Cout) bf16 (tap-major)
    w_taps = jnp.transpose(weight, (2, 3, 1, 0)).reshape(n_taps, cin, cout)
    w_taps = w_taps.astype(jnp.bfloat16)

    gamma3 = gamma.astype(jnp.float32).reshape(1, 1, cout)
    beta3 = beta.astype(jnp.float32).reshape(1, 1, cout)

    kernel = _make_kernel(kh, kw, s, cin, cout, th, ow, oh, rt, ohp,
                          m_true, float(eps))

    out_nhwc = pl.pallas_call(
        kernel,
        out_shape=jax.ShapeDtypeStruct((n, ohp, ow, cout), jnp.float32),
        grid=(2, n, rt),
        in_specs=[
            # whole (phase-split) padded image resident per grid column
            pl.BlockSpec((None, s * s, hs, ws, cin),
                         lambda p, b, r: (b, 0, 0, 0, 0)),
            # weights / gamma / beta: constant block -> DMA'd once, stays resident
            pl.BlockSpec((n_taps, cin, cout), lambda p, b, r: (0, 0, 0)),
            pl.BlockSpec((1, 1, cout), lambda p, b, r: (0, 0, 0)),
            pl.BlockSpec((1, 1, cout), lambda p, b, r: (0, 0, 0)),
        ],
        # Phase 0 pins block (0, 0) (never flushed before phase 1 rewrites it),
        # phase 1 walks the real blocks -> each output block hits HBM exactly once.
        out_specs=pl.BlockSpec((None, th, ow, cout),
                               lambda p, b, r: (b * p, r * p, 0, 0)),
        scratch_shapes=[
            pltpu.VMEM((1, 1, cout), jnp.float32),   # channel sum
            pltpu.VMEM((1, 1, cout), jnp.float32),   # channel sum of squares
            pltpu.VMEM((1, 1, cout), jnp.float32),   # folded BN scale
            pltpu.VMEM((1, 1, cout), jnp.float32),   # folded BN bias
        ],
        compiler_params=pltpu.CompilerParams(
            dimension_semantics=("arbitrary", "arbitrary", "arbitrary"),
            vmem_limit_bytes=vmem_limit),
    )(x_ph, w_taps, gamma3, beta3)

    # Epilogue touches only the true-sized output (no padded-lane over-read).
    out = out_nhwc[:, :oh]
    return jnp.transpose(out, (0, 3, 1, 2))


# ------------------------------- reference -----------------------------------

def basic_conv2d_ref(x_nchw, weight, gamma, beta, *, stride, padding, eps=1e-3):
    """Same precision contract as the kernel: bf16 conv operands, f32 accumulation,
    f32 train-mode (biased-variance) batch norm, ReLU."""
    y = lax.conv_general_dilated(
        x_nchw.astype(jnp.bfloat16), weight.astype(jnp.bfloat16),
        window_strides=(stride, stride),
        padding=[(padding, padding), (padding, padding)],
        dimension_numbers=("NCHW", "OIHW", "NCHW"),
        preferred_element_type=jnp.float32)
    mean = jnp.mean(y, axis=(0, 2, 3), keepdims=True)
    var = jnp.var(y, axis=(0, 2, 3), keepdims=True)
    yhat = (y - mean) * lax.rsqrt(var + eps)
    yhat = yhat * gamma.reshape(1, -1, 1, 1) + beta.reshape(1, -1, 1, 1)
    return jnp.maximum(yhat, 0.0)


# --------------------------------- main ---------------------------------------

if __name__ == "__main__":
    key = jax.random.PRNGKey(0)

    # (N, Cin, H, W, Cout, K, stride, padding, row_tile)
    configs = [
        (2, 4, 16, 16, 8, 3, 1, 1, None),   # the spec's BasicConv2d shapes
        (4, 8, 24, 24, 16, 3, 1, 1, None),  # more images / channels
        (2, 4, 17, 17, 8, 3, 2, 0, None),   # stride=2, odd spatial size
        (2, 4, 16, 16, 8, 3, 1, 1, 6),      # forces multi-slab rows + stats masking
    ]

    for (N, CIN, H, W, COUT, K, STRIDE, PADDING, RTILE) in configs:
        key, kx, kw_, kg, kb = jax.random.split(key, 5)
        x = jax.random.normal(kx, (N, CIN, H, W), dtype=jnp.float32)
        weight = jax.random.normal(kw_, (COUT, CIN, K, K), dtype=jnp.float32) * 0.1
        gamma = 1.0 + 0.1 * jax.random.normal(kg, (COUT,), dtype=jnp.float32)
        beta = 0.1 * jax.random.normal(kb, (COUT,), dtype=jnp.float32)

        out = basic_conv2d(x, weight, gamma, beta,
                           stride=STRIDE, padding=PADDING, row_tile=RTILE)
        out = jax.block_until_ready(out)

        ref = basic_conv2d_ref(x, weight, gamma, beta,
                               stride=STRIDE, padding=PADDING)
        assert out.shape == ref.shape, (out.shape, ref.shape)
        err = float(jnp.max(jnp.abs(out - ref)))
        assert err < 2e-3, err

    print("KERNEL_OK")
</pallas_src>

<mosaic_0001>
module attributes {stable_mosaic.version = 11 : i64} {
  func.func @kernel(%arg0: i32, %arg1: i32, %arg2: i32, %arg3: memref<1x1x18x18x4xbf16, #tpu.memory_space<vmem>>, %arg4: memref<9x4x8xbf16, #tpu.memory_space<vmem>>, %arg5: memref<1x1x8xf32, #tpu.memory_space<vmem>>, %arg6: memref<1x1x8xf32, #tpu.memory_space<vmem>>, %arg7: memref<1x16x16x8xf32, #tpu.memory_space<vmem>>, %arg8: memref<1x1x8xf32, #tpu.memory_space<vmem>>, %arg9: memref<1x1x8xf32, #tpu.memory_space<vmem>>, %arg10: memref<1x1x8xf32, #tpu.memory_space<vmem>>, %arg11: memref<1x1x8xf32, #tpu.memory_space<vmem>>) attributes {dimension_semantics = [#tpu.dimension_semantics<arbitrary>, #tpu.dimension_semantics<arbitrary>, #tpu.dimension_semantics<arbitrary>], iteration_bounds = array<i64: 2, 2, 1>, scalar_prefetch = 0 : i64, scratch_operands = 4 : i64, tpu.core_type = #tpu.core_type<tc>, window_params = [{transform_indices = @transform_0, window_bounds = array<i64: 1, 1, 18, 18, 4>}, {pipeline_mode = #tpu.pipeline_mode<synchronous>, transform_indices = @transform_1, window_bounds = array<i64: 9, 4, 8>}, {pipeline_mode = #tpu.pipeline_mode<synchronous>, transform_indices = @transform_2, window_bounds = array<i64: 1, 1, 8>}, {pipeline_mode = #tpu.pipeline_mode<synchronous>, transform_indices = @transform_3, window_bounds = array<i64: 1, 1, 8>}, {transform_indices = @transform_4, window_bounds = array<i64: 1, 16, 16, 8>}]} {
    %c0_i32 = arith.constant 0 : i32
    %0 = arith.cmpi eq, %arg0, %c0_i32 : i32
    %c0_i32_0 = arith.constant 0 : i32
    %1 = arith.cmpi eq, %arg1, %c0_i32_0 : i32
    %2 = arith.andi %0, %1 : i1
    %c0_i32_1 = arith.constant 0 : i32
    %3 = arith.cmpi eq, %arg2, %c0_i32_1 : i32
    %4 = arith.andi %2, %3 : i1
    %5 = arith.extui %4 : i1 to i32
    %c0_i32_2 = arith.constant 0 : i32
    %6 = arith.cmpi ne, %5, %c0_i32_2 : i32
    scf.if %6 {
      %cst_81 = arith.constant 0.000000e+00 : f32
      %105 = vector.broadcast %cst_81 : f32 to vector<1x1x8xf32>
      %c0_82 = arith.constant 0 : index
      %c0_83 = arith.constant 0 : index
      %c0_84 = arith.constant 0 : index
      %106 = vector.load %arg8[%c0_82, %c0_83, %c0_84] : memref<1x1x8xf32, #tpu.memory_space<vmem>>, vector<1x1x8xf32>
      tpu.vector_store %arg8[%c0_82, %c0_83, %c0_84], %105 {strides = array<i32>} : memref<1x1x8xf32, #tpu.memory_space<vmem>>, vector<1x1x8xf32>,
      %cst_85 = arith.constant 0.000000e+00 : f32
      %107 = vector.broadcast %cst_85 : f32 to vector<1x1x8xf32>
      %c0_86 = arith.constant 0 : index
      %c0_87 = arith.constant 0 : index
      %c0_88 = arith.constant 0 : index
      %108 = vector.load %arg9[%c0_86, %c0_87, %c0_88] : memref<1x1x8xf32, #tpu.memory_space<vmem>>, vector<1x1x8xf32>
      tpu.vector_store %arg9[%c0_86, %c0_87, %c0_88], %107 {strides = array<i32>} : memref<1x1x8xf32, #tpu.memory_space<vmem>>, vector<1x1x8xf32>,
    } else {
    }
    %c16_i32 = arith.constant 16 : i32
    %7 = arith.muli %arg2, %c16_i32 : i32
    %8 = tpu.assume_multiple %7, 8 : i32
    %cst = arith.constant 0.000000e+00 : f32
    %9 = vector.broadcast %cst : f32 to vector<256x8xf32>
    %c0_i32_3 = arith.constant 0 : i32
    %10 = arith.addi %8, %c0_i32_3 : i32
    %c0 = arith.constant 0 : index
    %c0_4 = arith.constant 0 : index
    %11 = arith.index_cast %10 : i32 to index
    %c0_5 = arith.constant 0 : index
    %c0_6 = arith.constant 0 : index
    %12 = vector.load %arg3[%c0, %c0_4, %11, %c0_5, %c0_6] : memref<1x1x18x18x4xbf16, #tpu.memory_space<vmem>>, vector<1x1x16x16x4xbf16>
    %13 = vector.shape_cast %12 : vector<1x1x16x16x4xbf16> to vector<16x16x4xbf16>
    %14 = vector.shape_cast %13 : vector<16x16x4xbf16> to vector<256x4xbf16>
    %c0_7 = arith.constant 0 : index
    %c0_8 = arith.constant 0 : index
    %c0_9 = arith.constant 0 : index
    %15 = vector.load %arg4[%c0_7, %c0_8, %c0_9] : memref<9x4x8xbf16, #tpu.memory_space<vmem>>, vector<1x4x8xbf16>
    %16 = vector.shape_cast %15 : vector<1x4x8xbf16> to vector<4x8xbf16>
    %cst_10 = arith.constant dense<0.000000e+00> : vector<256x8xf32>
    %17 = tpu.matmul %14, %16, %cst_10 {dimension_numbers = #tpu.dot_dimension_numbers<[1], [0], [0], [1], [0, 0, 1, 1], [], []>} : vector<256x4xbf16>, vector<4x8xbf16>, vector<256x8xf32> -> vector<256x8xf32>
    %18 = arith.addf %9, %17 : vector<256x8xf32>
    %c0_i32_11 = arith.constant 0 : i32
    %19 = arith.addi %8, %c0_i32_11 : i32
    %c0_12 = arith.constant 0 : index
    %c0_13 = arith.constant 0 : index
    %20 = arith.index_cast %19 : i32 to index
    %c1 = arith.constant 1 : index
    %c0_14 = arith.constant 0 : index
    %21 = vector.load %arg3[%c0_12, %c0_13, %20, %c1, %c0_14] : memref<1x1x18x18x4xbf16, #tpu.memory_space<vmem>>, vector<1x1x16x16x4xbf16>
    %22 = vector.shape_cast %21 : vector<1x1x16x16x4xbf16> to vector<16x16x4xbf16>
    %23 = vector.shape_cast %22 : vector<16x16x4xbf16> to vector<256x4xbf16>
    %c1_15 = arith.constant 1 : index
    %c0_16 = arith.constant 0 : index
    %c0_17 = arith.constant 0 : index
    %24 = vector.load %arg4[%c1_15, %c0_16, %c0_17] : memref<9x4x8xbf16, #tpu.memory_space<vmem>>, vector<1x4x8xbf16>
    %25 = vector.shape_cast %24 : vector<1x4x8xbf16> to vector<4x8xbf16>
    %cst_18 = arith.constant dense<0.000000e+00> : vector<256x8xf32>
    %26 = tpu.matmul %23, %25, %cst_18 {dimension_numbers = #tpu.dot_dimension_numbers<[1], [0], [0], [1], [0, 0, 1, 1], [], []>} : vector<256x4xbf16>, vector<4x8xbf16>, vector<256x8xf32> -> vector<256x8xf32>
    %27 = arith.addf %18, %26 : vector<256x8xf32>
    %c0_i32_19 = arith.constant 0 : i32
    %28 = arith.addi %8, %c0_i32_19 : i32
    %c0_20 = arith.constant 0 : index
    %c0_21 = arith.constant 0 : index
    %29 = arith.index_cast %28 : i32 to index
    %c2 = arith.constant 2 : index
    %c0_22 = arith.constant 0 : index
    %30 = vector.load %arg3[%c0_20, %c0_21, %29, %c2, %c0_22] : memref<1x1x18x18x4xbf16, #tpu.memory_space<vmem>>, vector<1x1x16x16x4xbf16>
    %31 = vector.shape_cast %30 : vector<1x1x16x16x4xbf16> to vector<16x16x4xbf16>
    %32 = vector.shape_cast %31 : vector<16x16x4xbf16> to vector<256x4xbf16>
    %c2_23 = arith.constant 2 : index
    %c0_24 = arith.constant 0 : index
    %c0_25 = arith.constant 0 : index
    %33 = vector.load %arg4[%c2_23, %c0_24, %c0_25] : memref<9x4x8xbf16, #tpu.memory_space<vmem>>, vector<1x4x8xbf16>
    %34 = vector.shape_cast %33 : vector<1x4x8xbf16> to vector<4x8xbf16>
    %cst_26 = arith.constant dense<0.000000e+00> : vector<256x8xf32>
    %35 = tpu.matmul %32, %34, %cst_26 {dimension_numbers = #tpu.dot_dimension_numbers<[1], [0], [0], [1], [0, 0, 1, 1], [], []>} : vector<256x4xbf16>, vector<4x8xbf16>, vector<256x8xf32> -> vector<256x8xf32>
    %36 = arith.addf %27, %35 : vector<256x8xf32>
    %c1_i32 = arith.constant 1 : i32
    %37 = arith.addi %8, %c1_i32 : i32
    %c0_27 = arith.constant 0 : index
    %c0_28 = arith.constant 0 : index
    %38 = arith.index_cast %37 : i32 to index
    %c0_29 = arith.constant 0 : index
    %c0_30 = arith.constant 0 : index
    %39 = vector.load %arg3[%c0_27, %c0_28, %38, %c0_29, %c0_30] : memref<1x1x18x18x4xbf16, #tpu.memory_space<vmem>>, vector<1x1x16x16x4xbf16>
    %40 = vector.shape_cast %39 : vector<1x1x16x16x4xbf16> to vector<16x16x4xbf16>
    %41 = vector.shape_cast %40 : vector<16x16x4xbf16> to vector<256x4xbf16>
    %c3 = arith.constant 3 : index
    %c0_31 = arith.constant 0 : index
    %c0_32 = arith.constant 0 : index
    %42 = vector.load %arg4[%c3, %c0_31, %c0_32] : memref<9x4x8xbf16, #tpu.memory_space<vmem>>, vector<1x4x8xbf16>
    %43 = vector.shape_cast %42 : vector<1x4x8xbf16> to vector<4x8xbf16>
    %cst_33 = arith.constant dense<0.000000e+00> : vector<256x8xf32>
    %44 = tpu.matmul %41, %43, %cst_33 {dimension_numbers = #tpu.dot_dimension_numbers<[1], [0], [0], [1], [0, 0, 1, 1], [], []>} : vector<256x4xbf16>, vector<4x8xbf16>, vector<256x8xf32> -> vector<256x8xf32>
    %45 = arith.addf %36, %44 : vector<256x8xf32>
    %c1_i32_34 = arith.constant 1 : i32
    %46 = arith.addi %8, %c1_i32_34 : i32
    %c0_35 = arith.constant 0 : index
    %c0_36 = arith.constant 0 : index
    %47 = arith.index_cast %46 : i32 to index
    %c1_37 = arith.constant 1 : index
    %c0_38 = arith.constant 0 : index
    %48 = vector.load %arg3[%c0_35, %c0_36, %47, %c1_37, %c0_38] : memref<1x1x18x18x4xbf16, #tpu.memory_space<vmem>>, vector<1x1x16x16x4xbf16>
    %49 = vector.shape_cast %48 : vector<1x1x16x16x4xbf16> to vector<16x16x4xbf16>
    %50 = vector.shape_cast %49 : vector<16x16x4xbf16> to vector<256x4xbf16>
    %c4 = arith.constant 4 : index
    %c0_39 = arith.constant 0 : index
    %c0_40 = arith.constant 0 : index
    %51 = vector.load %arg4[%c4, %c0_39, %c0_40] : memref<9x4x8xbf16, #tpu.memory_space<vmem>>, vector<1x4x8xbf16>
    %52 = vector.shape_cast %51 : vector<1x4x8xbf16> to vector<4x8xbf16>
    %cst_41 = arith.constant dense<0.000000e+00> : vector<256x8xf32>
    %53 = tpu.matmul %50, %52, %cst_41 {dimension_numbers = #tpu.dot_dimension_numbers<[1], [0], [0], [1], [0, 0, 1, 1], [], []>} : vector<256x4xbf16>, vector<4x8xbf16>, vector<256x8xf32> -> vector<256x8xf32>
    %54 = arith.addf %45, %53 : vector<256x8xf32>
    %c1_i32_42 = arith.constant 1 : i32
    %55 = arith.addi %8, %c1_i32_42 : i32
    %c0_43 = arith.constant 0 : index
    %c0_44 = arith.constant 0 : index
    %56 = arith.index_cast %55 : i32 to index
    %c2_45 = arith.constant 2 : index
    %c0_46 = arith.constant 0 : index
    %57 = vector.load %arg3[%c0_43, %c0_44, %56, %c2_45, %c0_46] : memref<1x1x18x18x4xbf16, #tpu.memory_space<vmem>>, vector<1x1x16x16x4xbf16>
    %58 = vector.shape_cast %57 : vector<1x1x16x16x4xbf16> to vector<16x16x4xbf16>
    %59 = vector.shape_cast %58 : vector<16x16x4xbf16> to vector<256x4xbf16>
    %c5 = arith.constant 5 : index
    %c0_47 = arith.constant 0 : index
    %c0_48 = arith.constant 0 : index
    %60 = vector.load %arg4[%c5, %c0_47, %c0_48] : memref<9x4x8xbf16, #tpu.memory_space<vmem>>, vector<1x4x8xbf16>
    %61 = vector.shape_cast %60 : vector<1x4x8xbf16> to vector<4x8xbf16>
    %cst_49 = arith.constant dense<0.000000e+00> : vector<256x8xf32>
    %62 = tpu.matmul %59, %61, %cst_49 {dimension_numbers = #tpu.dot_dimension_numbers<[1], [0], [0], [1], [0, 0, 1, 1], [], []>} : vector<256x4xbf16>, vector<4x8xbf16>, vector<256x8xf32> -> vector<256x8xf32>
    %63 = arith.addf %54, %62 : vector<256x8xf32>
    %c2_i32 = arith.constant 2 : i32
    %64 = arith.addi %8, %c2_i32 : i32
    %c0_50 = arith.constant 0 : index
    %c0_51 = arith.constant 0 : index
    %65 = arith.index_cast %64 : i32 to index
    %c0_52 = arith.constant 0 : index
    %c0_53 = arith.constant 0 : index
    %66 = vector.load %arg3[%c0_50, %c0_51, %65, %c0_52, %c0_53] : memref<1x1x18x18x4xbf16, #tpu.memory_space<vmem>>, vector<1x1x16x16x4xbf16>
    %67 = vector.shape_cast %66 : vector<1x1x16x16x4xbf16> to vector<16x16x4xbf16>
    %68 = vector.shape_cast %67 : vector<16x16x4xbf16> to vector<256x4xbf16>
    %c6 = arith.constant 6 : index
    %c0_54 = arith.constant 0 : index
    %c0_55 = arith.constant 0 : index
    %69 = vector.load %arg4[%c6, %c0_54, %c0_55] : memref<9x4x8xbf16, #tpu.memory_space<vmem>>, vector<1x4x8xbf16>
    %70 = vector.shape_cast %69 : vector<1x4x8xbf16> to vector<4x8xbf16>
    %cst_56 = arith.constant dense<0.000000e+00> : vector<256x8xf32>
    %71 = tpu.matmul %68, %70, %cst_56 {dimension_numbers = #tpu.dot_dimension_numbers<[1], [0], [0], [1], [0, 0, 1, 1], [], []>} : vector<256x4xbf16>, vector<4x8xbf16>, vector<256x8xf32> -> vector<256x8xf32>
    %72 = arith.addf %63, %71 : vector<256x8xf32>
    %c2_i32_57 = arith.constant 2 : i32
    %73 = arith.addi %8, %c2_i32_57 : i32
    %c0_58 = arith.constant 0 : index
    %c0_59 = arith.constant 0 : index
    %74 = arith.index_cast %73 : i32 to index
    %c1_60 = arith.constant 1 : index
    %c0_61 = arith.constant 0 : index
    %75 = vector.load %arg3[%c0_58, %c0_59, %74, %c1_60, %c0_61] : memref<1x1x18x18x4xbf16, #tpu.memory_space<vmem>>, vector<1x1x16x16x4xbf16>
    %76 = vector.shape_cast %75 : vector<1x1x16x16x4xbf16> to vector<16x16x4xbf16>
    %77 = vector.shape_cast %76 : vector<16x16x4xbf16> to vector<256x4xbf16>
    %c7 = arith.constant 7 : index
    %c0_62 = arith.constant 0 : index
    %c0_63 = arith.constant 0 : index
    %78 = vector.load %arg4[%c7, %c0_62, %c0_63] : memref<9x4x8xbf16, #tpu.memory_space<vmem>>, vector<1x4x8xbf16>
    %79 = vector.shape_cast %78 : vector<1x4x8xbf16> to vector<4x8xbf16>
    %cst_64 = arith.constant dense<0.000000e+00> : vector<256x8xf32>
    %80 = tpu.matmul %77, %79, %cst_64 {dimension_numbers = #tpu.dot_dimension_numbers<[1], [0], [0], [1], [0, 0, 1, 1], [], []>} : vector<256x4xbf16>, vector<4x8xbf16>, vector<256x8xf32> -> vector<256x8xf32>
    %81 = arith.addf %72, %80 : vector<256x8xf32>
    %c2_i32_65 = arith.constant 2 : i32
    %82 = arith.addi %8, %c2_i32_65 : i32
    %c0_66 = arith.constant 0 : index
    %c0_67 = arith.constant 0 : index
    %83 = arith.index_cast %82 : i32 to index
    %c2_68 = arith.constant 2 : index
    %c0_69 = arith.constant 0 : index
    %84 = vector.load %arg3[%c0_66, %c0_67, %83, %c2_68, %c0_69] : memref<1x1x18x18x4xbf16, #tpu.memory_space<vmem>>, vector<1x1x16x16x4xbf16>
    %85 = vector.shape_cast %84 : vector<1x1x16x16x4xbf16> to vector<16x16x4xbf16>
    %86 = vector.shape_cast %85 : vector<16x16x4xbf16> to vector<256x4xbf16>
    %c8 = arith.constant 8 : index
    %c0_70 = arith.constant 0 : index
    %c0_71 = arith.constant 0 : index
    %87 = vector.load %arg4[%c8, %c0_70, %c0_71] : memref<9x4x8xbf16, #tpu.memory_space<vmem>>, vector<1x4x8xbf16>
    %88 = vector.shape_cast %87 : vector<1x4x8xbf16> to vector<4x8xbf16>
    %cst_72 = arith.constant dense<0.000000e+00> : vector<256x8xf32>
    %89 = tpu.matmul %86, %88, %cst_72 {dimension_numbers = #tpu.dot_dimension_numbers<[1], [0], [0], [1], [0, 0, 1, 1], [], []>} : vector<256x4xbf16>, vector<4x8xbf16>, vector<256x8xf32> -> vector<256x8xf32>
    %90 = arith.addf %81, %89 : vector<256x8xf32>
    %91 = vector.shape_cast %90 : vector<256x8xf32> to vector<16x16x8xf32>
    %c0_i32_73 = arith.constant 0 : i32
    %92 = arith.cmpi eq, %arg0, %c0_i32_73 : i32
    %93 = arith.extui %92 : i1 to i32
    %c0_i32_74 = arith.constant 0 : i32
    %94 = arith.cmpi ne, %93, %c0_i32_74 : i32
    scf.if %94 {
      %cst_81 = arith.constant dense<0.000000e+00> : vector<8xf32>
      %105 = vector.multi_reduction <add>, %91, %cst_81 [0, 1] : vector<16x16x8xf32> to vector<8xf32>
      %106 = vector.shape_cast %105 : vector<8xf32> to vector<1x1x8xf32>
      %107 = arith.mulf %91, %91 : vector<16x16x8xf32>
      %cst_82 = arith.constant dense<0.000000e+00> : vector<8xf32>
      %108 = vector.multi_reduction <add>, %107, %cst_82 [0, 1] : vector<16x16x8xf32> to vector<8xf32>
      %109 = vector.shape_cast %108 : vector<8xf32> to vector<1x1x8xf32>
      %c0_83 = arith.constant 0 : index
      %c0_84 = arith.constant 0 : index
      %c0_85 = arith.constant 0 : index
      %110 = vector.load %arg8[%c0_83, %c0_84, %c0_85] : memref<1x1x8xf32, #tpu.memory_space<vmem>>, vector<1x1x8xf32>
      %111 = arith.addf %110, %106 : vector<1x1x8xf32>
      %c0_86 = arith.constant 0 : index
      %c0_87 = arith.constant 0 : index
      %c0_88 = arith.constant 0 : index
      %112 = vector.load %arg8[%c0_86, %c0_87, %c0_88] : memref<1x1x8xf32, #tpu.memory_space<vmem>>, vector<1x1x8xf32>
      tpu.vector_store %arg8[%c0_86, %c0_87, %c0_88], %111 {strides = array<i32>} : memref<1x1x8xf32, #tpu.memory_space<vmem>>, vector<1x1x8xf32>,
      %c0_89 = arith.constant 0 : index
      %c0_90 = arith.constant 0 : index
      %c0_91 = arith.constant 0 : index
      %113 = vector.load %arg9[%c0_89, %c0_90, %c0_91] : memref<1x1x8xf32, #tpu.memory_space<vmem>>, vector<1x1x8xf32>
      %114 = arith.addf %113, %109 : vector<1x1x8xf32>
      %c0_92 = arith.constant 0 : index
      %c0_93 = arith.constant 0 : index
      %c0_94 = arith.constant 0 : index
      %115 = vector.load %arg9[%c0_92, %c0_93, %c0_94] : memref<1x1x8xf32, #tpu.memory_space<vmem>>, vector<1x1x8xf32>
      tpu.vector_store %arg9[%c0_92, %c0_93, %c0_94], %114 {strides = array<i32>} : memref<1x1x8xf32, #tpu.memory_space<vmem>>, vector<1x1x8xf32>,
    } else {
    }
    %c1_i32_75 = arith.constant 1 : i32
    %95 = arith.cmpi eq, %arg0, %c1_i32_75 : i32
    %c0_i32_76 = arith.constant 0 : i32
    %96 = arith.cmpi eq, %arg1, %c0_i32_76 : i32
    %97 = arith.andi %95, %96 : i1
    %c0_i32_77 = arith.constant 0 : i32
    %98 = arith.cmpi eq, %arg2, %c0_i32_77 : i32
    %99 = arith.andi %97, %98 : i1
    %100 = arith.extui %99 : i1 to i32
    %c0_i32_78 = arith.constant 0 : i32
    %101 = arith.cmpi ne, %100, %c0_i32_78 : i32
    scf.if %101 {
      %c0_81 = arith.constant 0 : index
      %c0_82 = arith.constant 0 : index
      %c0_83 = arith.constant 0 : index
      %105 = vector.load %arg8[%c0_81, %c0_82, %c0_83] : memref<1x1x8xf32, #tpu.memory_space<vmem>>, vector<1x1x8xf32>
      %cst_84 = arith.constant 0.001953125 : f32
      %106 = vector.broadcast %cst_84 : f32 to vector<1x1x8xf32>
      %107 = arith.mulf %105, %106 : vector<1x1x8xf32>
      %c0_85 = arith.constant 0 : index
      %c0_86 = arith.constant 0 : index
      %c0_87 = arith.constant 0 : index
      %108 = vector.load %arg9[%c0_85, %c0_86, %c0_87] : memref<1x1x8xf32, #tpu.memory_space<vmem>>, vector<1x1x8xf32>
      %cst_88 = arith.constant 0.001953125 : f32
      %109 = vector.broadcast %cst_88 : f32 to vector<1x1x8xf32>
      %110 = arith.mulf %108, %109 : vector<1x1x8xf32>
      %111 = arith.mulf %107, %107 : vector<1x1x8xf32>
      %112 = arith.subf %110, %111 : vector<1x1x8xf32>
      %cst_89 = arith.constant 0.000000e+00 : f32
      %113 = vector.broadcast %cst_89 : f32 to vector<1x1x8xf32>
      %114 = arith.maximumf %112, %113 : vector<1x1x8xf32>
      %c0_90 = arith.constant 0 : index
      %c0_91 = arith.constant 0 : index
      %c0_92 = arith.constant 0 : index
      %115 = vector.load %arg5[%c0_90, %c0_91, %c0_92] : memref<1x1x8xf32, #tpu.memory_space<vmem>>, vector<1x1x8xf32>
      %cst_93 = arith.constant 1.000000e-03 : f32
      %116 = vector.broadcast %cst_93 : f32 to vector<1x1x8xf32>
      %117 = arith.addf %114, %116 : vector<1x1x8xf32>
      %118 = math.rsqrt %117 : vector<1x1x8xf32>
      %119 = arith.mulf %115, %118 : vector<1x1x8xf32>
      %c0_94 = arith.constant 0 : index
      %c0_95 = arith.constant 0 : index
      %c0_96 = arith.constant 0 : index
      %120 = vector.load %arg10[%c0_94, %c0_95, %c0_96] : memref<1x1x8xf32, #tpu.memory_space<vmem>>, vector<1x1x8xf32>
      tpu.vector_store %arg10[%c0_94, %c0_95, %c0_96], %119 {strides = array<i32>} : memref<1x1x8xf32, #tpu.memory_space<vmem>>, vector<1x1x8xf32>,
      %c0_97 = arith.constant 0 : index
      %c0_98 = arith.constant 0 : index
      %c0_99 = arith.constant 0 : index
      %121 = vector.load %arg6[%c0_97, %c0_98, %c0_99] : memref<1x1x8xf32, #tpu.memory_space<vmem>>, vector<1x1x8xf32>
      %122 = arith.mulf %107, %119 : vector<1x1x8xf32>
      %123 = arith.subf %121, %122 : vector<1x1x8xf32>
      %c0_100 = arith.constant 0 : index
      %c0_101 = arith.constant 0 : index
      %c0_102 = arith.constant 0 : index
      %124 = vector.load %arg11[%c0_100, %c0_101, %c0_102] : memref<1x1x8xf32, #tpu.memory_space<vmem>>, vector<1x1x8xf32>
      tpu.vector_store %arg11[%c0_100, %c0_101, %c0_102], %123 {strides = array<i32>} : memref<1x1x8xf32, #tpu.memory_space<vmem>>, vector<1x1x8xf32>,
    } else {
    }
    %c1_i32_79 = arith.constant 1 : i32
    %102 = arith.cmpi eq, %arg0, %c1_i32_79 : i32
    %103 = arith.extui %102 : i1 to i32
    %c0_i32_80 = arith.constant 0 : i32
    %104 = arith.cmpi ne, %103, %c0_i32_80 : i32
    scf.if %104 {
      %c0_81 = arith.constant 0 : index
      %c0_82 = arith.constant 0 : index
      %c0_83 = arith.constant 0 : index
      %105 = vector.load %arg10[%c0_81, %c0_82, %c0_83] : memref<1x1x8xf32, #tpu.memory_space<vmem>>, vector<1x1x8xf32>
      %106 = vector.broadcast %105 : vector<1x1x8xf32> to vector<16x16x8xf32>
      %107 = arith.mulf %91, %106 : vector<16x16x8xf32>
      %c0_84 = arith.constant 0 : index
      %c0_85 = arith.constant 0 : index
      %c0_86 = arith.constant 0 : index
      %108 = vector.load %arg11[%c0_84, %c0_85, %c0_86] : memref<1x1x8xf32, #tpu.memory_space<vmem>>, vector<1x1x8xf32>
      %109 = vector.broadcast %108 : vector<1x1x8xf32> to vector<16x16x8xf32>
      %110 = arith.addf %107, %109 : vector<16x16x8xf32>
      %cst_87 = arith.constant 0.000000e+00 : f32
      %111 = vector.broadcast %cst_87 : f32 to vector<16x16x8xf32>
      %112 = arith.maximumf %110, %111 : vector<16x16x8xf32>
      %c0_88 = arith.constant 0 : index
      %c0_89 = arith.constant 0 : index
      %c0_90 = arith.constant 0 : index
      %c0_91 = arith.constant 0 : index
      %113 = vector.load %arg7[%c0_88, %c0_89, %c0_90, %c0_91] : memref<1x16x16x8xf32, #tpu.memory_space<vmem>>, vector<1x16x16x8xf32>
      %114 = vector.shape_cast %113 : vector<1x16x16x8xf32> to vector<16x16x8xf32>
      %115 = vector.shape_cast %112 : vector<16x16x8xf32> to vector<1x16x16x8xf32>
      tpu.vector_store %arg7[%c0_88, %c0_89, %c0_90, %c0_91], %115 {strides = array<i32>} : memref<1x16x16x8xf32, #tpu.memory_space<vmem>>, vector<1x16x16x8xf32>,
    } else {
    }
    return
  }
  func.func @transform_0(%arg0: i32, %arg1: i32, %arg2: i32) -> (i32, i32, i32, i32, i32) {
    %c0_i32 = arith.constant 0 : i32
    %c0_i32_0 = arith.constant 0 : i32
    %c0_i32_1 = arith.constant 0 : i32
    %c0_i32_2 = arith.constant 0 : i32
    %c0_i32_3 = arith.constant 0 : i32
    return %arg1, %c0_i32, %c0_i32_0, %c0_i32_1, %c0_i32_2 : i32, i32, i32, i32, i32
  }
  func.func @transform_1(%arg0: i32, %arg1: i32, %arg2: i32) -> (i32, i32, i32) {
    %c0_i32 = arith.constant 0 : i32
    %c0_i32_0 = arith.constant 0 : i32
    %c0_i32_1 = arith.constant 0 : i32
    %c0_i32_2 = arith.constant 0 : i32
    return %c0_i32, %c0_i32_0, %c0_i32_1 : i32, i32, i32
  }
  func.func @transform_2(%arg0: i32, %arg1: i32, %arg2: i32) -> (i32, i32, i32) {
    %c0_i32 = arith.constant 0 : i32
    %c0_i32_0 = arith.constant 0 : i32
    %c0_i32_1 = arith.constant 0 : i32
    %c0_i32_2 = arith.constant 0 : i32
    return %c0_i32, %c0_i32_0, %c0_i32_1 : i32, i32, i32
  }
  func.func @transform_3(%arg0: i32, %arg1: i32, %arg2: i32) -> (i32, i32, i32) {
    %c0_i32 = arith.constant 0 : i32
    %c0_i32_0 = arith.constant 0 : i32
    %c0_i32_1 = arith.constant 0 : i32
    %c0_i32_2 = arith.constant 0 : i32
    return %c0_i32, %c0_i32_0, %c0_i32_1 : i32, i32, i32
  }
  func.func @transform_4(%arg0: i32, %arg1: i32, %arg2: i32) -> (i32, i32, i32, i32) {
    %0 = arith.muli %arg1, %arg0 : i32
    %1 = arith.muli %arg2, %arg0 : i32
    %c0_i32 = arith.constant 0 : i32
    %c0_i32_0 = arith.constant 0 : i32
    %c0_i32_1 = arith.constant 0 : i32
    return %0, %1, %c0_i32, %c0_i32_0 : i32, i32, i32, i32
  }
}

</mosaic_0001>

<bundles_post_ra>
// kernel: basic_conv2d.1
= control target key start
LH: loop header
LB: loop body
LE: loop exit
PB: predicated region body
PF: predicated region fallthrough
CT: control target
= control target key end

     0   :  { %s6465_s15 = smov 0   ;;  %s6467_s16 = smov 0   ;;  %s9329_s0 = inlined_call_operand.vmem [shape: bf16[2,1,18,18,4], index: 0, kind: input, shape index: {}]   ;;  %s9330_s1 = inlined_call_operand.vmem [shape: bf16[9,4,8], index: 1, kind: input, shape index: {}]   ;;  %s9331_s2 = inlined_call_operand.vmem [shape: f32[1,1,8], index: 2, kind: input, shape index: {}]   ;;  %s9332_s3 = inlined_call_operand.vmem [shape: f32[1,1,8], index: 3, kind: input, shape index: {}]   ;;  %s9333_s4 = inlined_call_operand.vmem [shape: f32[2,16,16,8], index: 4, kind: output, shape index: {}]  }
   0x1   :  { %s6469_s17 = smov 0   ;;  %s6471_s18 = smov 0  }
   0x2   :  { %s6473_s19 = smov 0  }
   0x3 LB: > { %s29_s20 = sadd.s32 1, %s6429_s17  ;;  %s33_s21 = sadd.s32 1, %s6433_s18  ;;  %s6437_s19 = sphi %s6473_s19, %s14_s19   ;;  %s6433_s18 = sphi %s6471_s18, %s9487_s18   ;;  %s6429_s17 = sphi %s6469_s17, %s9486_s17   ;;  %s6425_s16 = sphi %s6467_s16, %s9485_s16   ;;  %s6421_s15 = sphi %s6465_s15, %s9484_s15  }
   0x4   : > { %p31_p0 = scmp.ge.s32.totalorder %s29_s20, 2  ;;  %p5286_p1 = scmp.ge.s32.totalorder %s6437_s19, 1 }
   0x5   : > { %p187_p2 = scmp.lt.s32.totalorder %s6437_s19, 5 }
   0x6   : > { %s9489_s20 = smov (%p31_p0, %s29_s20), 0  ;;  %s9491_s21 = smov (!%p31_p0, %s33_s21), %s6433_s18 }
   0x7   : > { %p188_p3 = pnand %p5286_p1, %p187_p2  ;;  %p35_p4 = scmp.ge.s32.totalorder %s9491_s21, 2 }
   0x9   : > { %s9493_s21 = smov (%p35_p4, %s9491_s21), 0  ;;  %191 = sbr.rel (%p188_p3) target bundleno = 728 (0x2d8), region = 36 }
   0xe   : > { %p220_p5 = scmp.lt.s32.totalorder %s6421_s15, 1  ;;  %s225_s22 = smul.u32 %s6421_s15, %s6425_s16 }
   0xf   : > { %p241_p6 = scmp.eq.s32.totalorder %s6425_s16, 0  ;;  %p242_p7 = scmp.eq.s32.totalorder %s6421_s15, 0 }
  0x10   : > { %s221_s23 = scalar_select %p220_p5, %s6421_s15, 1 }
  0x11   : > { %p228_p8 = scmp.lt.s32.totalorder %s225_s22, 1  ;;  %p243_p9 = pnand %p242_p7, %p241_p6 }
  0x12   : > { %s6306_s24 = smul.u32 216, %s221_s23 }
  0x13   : > { %s9495_s22 = smov (!%p228_p8, %s225_s22), 1  ;;  %249 = sbr.rel (%p243_p9) target bundleno = 26 (0x1a), region = 40 }
  0x14   : > { %s6510_s27 = scalar_lea.vmem %s9329_s0, %s6306_s24  ;;  %s5834_s28 = sshll.u32 %s9495_s22, 8 }
  0x15   : > { %s6515_s5 = scalar_lea.vmem %s9333_s4, %s5834_s28 }
  0x18   : > { %vm250_vm0 = vcmask 57344   ;;  %v6439_v0 = vmov 0.0  }
  0x19   : > { %251 = vst.msk [vmem:[#allocation2] sm:$0x1] %vm250_vm0, %v6439_v0  ;;  %252 = vst.msk [vmem:[#allocation3] sm:$0x1] %vm250_vm0, %v6439_v0 }
  0x1a PF: > { %v5291_v1 = vld [vmem:[%s9330_s1 + $0x2] sm:$0x3]  ;;  %vm792_vm1 = vcmask 1041408   ;;  %v6527_v4 = vld [vmem:[%s6510_s27 + $0x4] sm:$0xf]  ;;  %vm743_vm4 = vcmask 31744  }
  0x1b   : > { %v6521_v2 = vld [vmem:[%s6510_s27] sm:$0xf]  ;;  %6297 = vmatprep.subr.msk.bf16.mxu1 %vm792_vm1, %v5291_v1  ;;  %6296 = vmatprep.subr.msk.bf16.mxu0 %vm792_vm1, %v5291_v1  ;;  %v794_v3 = vsel %vm792_vm1, %v5291_v1, 0  ;;  %v6530_v5 = vld [vmem:[%s6510_s27 + $0x8] sm:$0x1]  ;;  %v319_v8 = vshll.u32 %v6527_v4, 16 }
  0x1c   : > { %v310_v6 = vshrl.u32 %v6521_v2, 16  ;;  %6295 = vmatpush3.bf16.msra.mxu1 %v794_v3  ;;  %5989 = vmatpush3.bf16.msra.mxu0 %v794_v3  ;;  %vm306_vm2 = vsmask.f32 3328  ;;  %vm307_vm3 = vsmask.f32 7440  ;;  %v313_v7 = vshll.u32 %v6521_v2, 16 }
  0x1d   : > { %v323_v10 = vshrl.u32 %v6527_v4, 16  ;;  %v329_v11 = vshll.u32 %v6530_v5, 16  ;;  %v6538_v12 = vld [vmem:[%s6510_s27 + $0x60] sm:$0xf]  ;;  %v321_v14 = vrot.slane %v319_v8, 5  ;;  %vm6561_vm5 = vmor %vm306_vm2, %vm307_vm3  ;;  %vm1297_vm6 = vcmask 1042432  }
  0x1e   : > { %v312_v9 = vrot.slane %v310_v6, 4  ;;  %v315_v13 = vrot.slane %v313_v7, 5  ;;  %v6541_v15 = vld [vmem:[%s6510_s27 + $0x64] sm:$0xf]  ;;  %v6544_v16 = vld [vmem:[%s6510_s27 + $0x68] sm:$0x1] }
  0x1f   : > { %v325_v17 = vrot.slane %v323_v10, 4  ;;  %v502_v19 = vshrl.u32 %v6538_v12, 16  ;;  %v505_v20 = vshll.u32 %v6538_v12, 16  ;;  %v289_v21 = vld [vmem:[%s9330_s1] sm:$0x3]  ;;  %v511_v23 = vshll.u32 %v6541_v15, 16 }
  0x20   : > { %v316_v22 = vor.u32 %v315_v13, %v312_v9  ;;  %v515_v24 = vshrl.u32 %v6541_v15, 16  ;;  %v521_v25 = vshll.u32 %v6544_v16, 16  ;;  %6298 = vmatprep.subr.msk.bf16.mxu1 %vm792_vm1, %v289_v21  ;;  %v6557_v26 = vld [vmem:[%s6510_s27 + $0xc] sm:$0xf]  ;;  %v331_v29 = vrot.slane %v329_v11, 5  ;;  %p5827_p10 = scmp.ne.s32.totalorder %s6425_s16, 0 }
  0x21   : > { %v326_v28 = vor.u32 %v325_v17, %v321_v14  ;;  %v504_v30 = vrot.slane %v502_v19, 4  ;;  %v507_v31 = vrot.slane %v505_v20, 5  ;;  %v6566_v32 = vld [vmem:[%s6510_s27 + $0x10] sm:$0xf]  ;;  %v513_v34 = vrot.slane %v511_v23, 5 }
  0x22   : > { %v317_v33 = vrot.slane %v316_v22, 4  ;;  %v517_v35 = vrot.slane %v515_v24, 4  ;;  %v523_v36 = vrot.slane %v521_v25, 5  ;;  %v334_v39 = vshrl.u32 %v6557_v26, 16  ;;  %v6573_v43 = vld [vmem:[%s6510_s27 + $0x14] sm:$0x1] }
  0x23   : > { %v327_v37 = vrot.slane %v326_v28, 4  ;;  %v508_v38 = vor.u32 %v507_v31, %v504_v30  ;;  %v337_v40 = vshll.u32 %v6557_v26, 16  ;;  %v343_v44 = vshll.u32 %v6566_v32, 16  ;;  %v6578_v46 = vld [vmem:[%s6510_s27 + $0x6c] sm:$0xf] }
  0x24   : > { %v322_v41 = vsel %vm6561_vm5, %v317_v33, %v321_v14  ;;  %v518_v42 = vor.u32 %v517_v35, %v513_v34  ;;  %v347_v45 = vshrl.u32 %v6566_v32, 16  ;;  %v336_v49 = vrot.slane %v334_v39, 4  ;;  %v5372_v51 = vld [vmem:[%s9330_s1 + $0x4] sm:$0x3]  ;;  %v6591_v60 = vld [vmem:[%s6510_s27 + $0x70] sm:$0xf] }
  0x25   : > { %v332_v47 = vsel %vm6561_vm5, %v327_v37, %v331_v29  ;;  %v509_v48 = vrot.slane %v508_v38, 4  ;;  %v339_v50 = vrot.slane %v337_v40, 5  ;;  %v345_v54 = vrot.slane %v343_v44, 5  ;;  %6299 = vmatprep.subr.msk.bf16.mxu0 %vm792_vm1, %v5372_v51  ;;  %v6598_v0 = vld [vmem:[%s6510_s27 + $0x74] sm:$0x1] }
  0x26   : > { %v5292_v52 = vcombine.low %v322_v41, %v332_v47  ;;  %v519_v53 = vrot.slane %v518_v42, 4  ;;  %v349_v55 = vrot.slane %v347_v45, 4  ;;  %v353_v58 = vshll.u32 %v6573_v43, 16  ;;  %v6603_v9 = vld [vmem:[%s6510_s27 + $0x18] sm:$0xf] }
  0x27   : > { %v514_v56 = vsel %vm6561_vm5, %v509_v48, %v513_v34  ;;  %v340_v57 = vor.u32 %v339_v50, %v336_v49  ;;  %v526_v1 = vshrl.u32 %v6578_v46, 16  ;;  %v529_v8 = vshll.u32 %v6578_v46, 16  ;;  %v6608_v17 = vld [vmem:[%s6510_s27 + $0x1c] sm:$0xf]  ;;  %v6616_v24 = vld [vmem:[%s6510_s27 + $0x20] sm:$0x1] }
  0x28   : > { %5990 = vmatprep.mubr.msk.bf16.mxu0 %vm743_vm4, %v5292_v52  ;;  %v524_v61 = vsel %vm6561_vm5, %v519_v53, %v523_v36  ;;  %v350_v62 = vor.u32 %v349_v55, %v345_v54  ;;  %v355_v7 = vrot.slane %v353_v58, 5  ;;  %v535_v13 = vshll.u32 %v6591_v60, 16  ;;  %v6622_v31 = vld [vmem:[%s6510_s27 + $0x78] sm:$0xf]  ;;  %v6631_v44 = vld [vmem:[%s6510_s27 + $0x7c] sm:$0xf] }
  0x29   : > { %v5300_v3 = vcombine.low %v514_v56, %v524_v61  ;;  %v341_v6 = vrot.slane %v340_v57, 4  ;;  %v528_v11 = vrot.slane %v526_v1, 4  ;;  %v539_v14 = vshrl.u32 %v6591_v60, 16  ;;  %v6641_v56 = vld [vmem:[%s6510_s27 + $0x24] sm:$0xf] }
  0x2a   : > { %v351_v10 = vrot.slane %v350_v62, 4  ;;  %v531_v20 = vrot.slane %v529_v8, 5  ;;  %v545_v22 = vshll.u32 %v6598_v0, 16  ;;  %v1086_v23 = vsel %vm792_vm1, %v289_v21, 0  ;;  %v6649_v8 = vld [vmem:[%s6510_s27 + $0x28] sm:$0xf] }
  0x2b   : > { %6006 = vmatprep.mubr.msk.bf16.mxu1 %vm743_vm4, %v5300_v3  ;;  %v346_v19 = vsel %vm6561_vm5, %v341_v6, %v345_v54  ;;  %v537_v28 = vrot.slane %v535_v13, 5  ;;  %v541_v29 = vrot.slane %v539_v14, 4  ;;  %v1511_v30 = vsel %vm792_vm1, %v5372_v51, 0  ;;  %v6635_v51 = vld [vmem:[%s6510_s27 + $0x80] sm:$0x1] }
  0x2c   : > { %v356_v25 = vsel %vm6561_vm5, %v351_v10, %v355_v7  ;;  %v532_v34 = vor.u32 %v531_v20, %v528_v11  ;;  %v547_v35 = vrot.slane %v545_v22, 5  ;;  %v358_v36 = vshrl.u32 %v6603_v9, 16  ;;  %9362 = vst [vmem:[#allocation6_spill] sm:$0xff] %v6635_v51  ;;  %v6652_v14 = vld [vmem:[%s6510_s27 + $0x2c] sm:$0x1] }
  0x2d   : > { %v5293_v33 = vcombine.low %v346_v19, %v356_v25  ;;  %v542_v37 = vor.u32 %v541_v29, %v537_v28  ;;  %v361_v21 = vshll.u32 %v6603_v9, 16  ;;  %v367_v38 = vshll.u32 %v6608_v17, 16  ;;  %v6658_v29 = vld [vmem:[%s6510_s27 + $0x84] sm:$0xf]  ;;  %v6790_v59 = vld [vmem:[%s6510_s27 + $0xa8] sm:$0xf] }
  0x2e   : > { %v371_v39 = vshrl.u32 %v6608_v17, 16  ;;  %v533_v40 = vrot.slane %v532_v34, 4  ;;  %v360_v41 = vrot.slane %v358_v36, 4  ;;  %v377_v42 = vshll.u32 %v6616_v24, 16  ;;  %9369 = vst [vmem:[#allocation13_spill] sm:$0xff] %v6790_v59 }
  0x2f   : > { %5991 = vmatmul.mubr.msk.bf16.vlgmr.msra.gmra.mxu0 %vm743_vm4, %v5293_v33  ;;  %v550_v45 = vshrl.u32 %v6622_v31, 16  ;;  %v543_v47 = vrot.slane %v542_v37, 4  ;;  %v363_v48 = vrot.slane %v361_v21, 5  ;;  %v369_v49 = vrot.slane %v367_v38, 5 }
  0x30   : > { %6057 = vmatpush3.bf16.msra.mxu0 %v1511_v30  ;;  %v373_v50 = vrot.slane %v371_v39, 4  ;;  %v538_v52 = vsel %vm6561_vm5, %v533_v40, %v537_v28  ;;  %v379_v53 = vrot.slane %v377_v42, 5  ;;  %v553_v55 = vshll.u32 %v6622_v31, 16  ;;  %v6666_v39 = vld [vmem:[%s6510_s27 + $0x88] sm:$0xf] }
  0x31   : > { %v552_v54 = vrot.slane %v550_v45, 4  ;;  %v548_v57 = vsel %vm6561_vm5, %v543_v47, %v547_v35  ;;  %v364_v58 = vor.u32 %v363_v48, %v360_v41  ;;  %v559_v62 = vshll.u32 %v6631_v44, 16 }
  0x32   : > { %v374_v61 = vor.u32 %v373_v50, %v369_v49  ;;  %v5301_v1 = vcombine.low %v538_v52, %v548_v57  ;;  %v555_v3 = vrot.slane %v553_v55, 5  ;;  %v563_v6 = vshrl.u32 %v6631_v44, 16  ;;  %v6680_v57 = vld [vmem:[%s6510_s27 + $0x30] sm:$0xf] }
  0x33   : > { %v569_v7 = vshll.u32 %v6635_v51, 16  ;;  %v365_v10 = vrot.slane %v364_v58, 4  ;;  %v561_v13 = vrot.slane %v559_v62, 5  ;;  %v382_v19 = vshrl.u32 %v6641_v56, 16 }
  0x34   : > { %v375_v11 = vrot.slane %v374_v61, 4  ;;  %6007 = vmatmul.mubr.msk.bf16.vlgmr.msra.gmra.mxu1 %vm743_vm4, %v5301_v1  ;;  %v556_v20 = vor.u32 %v555_v3, %v552_v54  ;;  %v565_v22 = vrot.slane %v563_v6, 4  ;;  %v385_v28 = vshll.u32 %v6641_v56, 16  ;;  %v6686_v3 = vld [vmem:[%s6510_s27 + $0x34] sm:$0xf] }
  0x35   : > { %v571_v25 = vrot.slane %v569_v7, 5  ;;  %6023 = vmatpush3.bf16.msra.mxu1 %v1086_v23  ;;  %v370_v30 = vsel %vm6561_vm5, %v365_v10, %v369_v49  ;;  %v384_v34 = vrot.slane %v382_v19, 4  ;;  %v391_v35 = vshll.u32 %v6649_v8, 16  ;;  %v6675_v49 = vld [vmem:[%s6510_s27 + $0x8c] sm:$0x1] }
  0x36   : > { %v380_v33 = vsel %vm6561_vm5, %v375_v11, %v379_v53  ;;  %v557_v37 = vrot.slane %v556_v20, 4  ;;  %v566_v21 = vor.u32 %v565_v22, %v561_v13  ;;  %v387_v38 = vrot.slane %v385_v28, 5  ;;  %v6692_v22 = vld [vmem:[%s6510_s27 + $0x38] sm:$0x1] }
  0x37   : > { %v5294_v36 = vcombine.low %v370_v30, %v380_v33  ;;  %v393_v40 = vrot.slane %v391_v35, 5  ;;  %v395_v23 = vshrl.u32 %v6649_v8, 16  ;;  %v401_v41 = vshll.u32 %v6652_v14, 16 }
  0x38   : > { %v574_v42 = vshrl.u32 %v6658_v29, 16  ;;  %v562_v45 = vsel %vm6561_vm5, %v557_v37, %v561_v13  ;;  %v567_v47 = vrot.slane %v566_v21, 4  ;;  %v388_v48 = vor.u32 %v387_v38, %v384_v34  ;;  %v6700_v38 = vld [vmem:[%s6510_s27 + $0x90] sm:$0xf] }
  0x39   : > { %5994 = vmatprep.mubr.msk.bf16.mxu0 %vm743_vm4, %v5294_v36  ;;  %v577_v50 = vshll.u32 %v6658_v29, 16  ;;  %v397_v52 = vrot.slane %v395_v23, 4  ;;  %v403_v53 = vrot.slane %v401_v41, 5  ;;  %v583_v55 = vshll.u32 %v6666_v39, 16  ;;  %9363 = vst [vmem:[#allocation7_spill] sm:$0xff] %v6700_v38 }
  0x3a   : > { %v576_v54 = vrot.slane %v574_v42, 4  ;;  %v572_v58 = vsel %vm6561_vm5, %v567_v47, %v571_v25  ;;  %v389_v61 = vrot.slane %v388_v48, 4  ;;  %v587_v1 = vshrl.u32 %v6666_v39, 16 }
  0x3b   : > { %v579_v62 = vrot.slane %v577_v50, 5  ;;  %v5302_v6 = vcombine.low %v562_v45, %v572_v58  ;;  %v398_v7 = vor.u32 %v397_v52, %v393_v40  ;;  %v585_v10 = vrot.slane %v583_v55, 5  ;;  %v6706_v45 = vld [vmem:[%s6510_s27 + $0x94] sm:$0xf]  ;;  %v6716_v58 = vld [vmem:[%s6510_s27 + $0x98] sm:$0x1] }
  0x3c   : > { %v593_v11 = vshll.u32 %v6675_v49, 16  ;;  %v394_v13 = vsel %vm6561_vm5, %v389_v61, %v393_v40  ;;  %v589_v20 = vrot.slane %v587_v1, 4  ;;  %v406_v25 = vshrl.u32 %v6680_v57, 16  ;;  %9364 = vst [vmem:[#allocation8_spill] sm:$0xff] %v6706_v45  ;;  %9365 = vst [vmem:[#allocation9_spill] sm:$0xff] %v6716_v58 }
  0x3d   : > { %v580_v19 = vor.u32 %v579_v62, %v576_v54  ;;  %6010 = vmatprep.mubr.msk.bf16.mxu1 %vm743_vm4, %v5302_v6  ;;  %v399_v28 = vrot.slane %v398_v7, 4  ;;  %v409_v33 = vshll.u32 %v6680_v57, 16  ;;  %v415_v34 = vshll.u32 %v6686_v3, 16  ;;  %v6713_v54 = vld [vmem:[%s9330_s1 + $0x6] sm:$0x3] }
  0x3e   : > { %v595_v30 = vrot.slane %v593_v11, 5  ;;  %v590_v36 = vor.u32 %v589_v20, %v585_v10  ;;  %v408_v37 = vrot.slane %v406_v25, 4  ;;  %v419_v21 = vshrl.u32 %v6686_v3, 16  ;;  %6300 = vmatprep.subr.msk.bf16.mxu1 %vm792_vm1, %v6713_v54  ;;  %v6728_v11 = vld [vmem:[%s6510_s27 + $0x3c] sm:$0xf] }
  0x3f   : > { %v581_v35 = vrot.slane %v580_v19, 4  ;;  %v404_v40 = vsel %vm6561_vm5, %v399_v28, %v403_v53  ;;  %v411_v23 = vrot.slane %v409_v33, 5  ;;  %v417_v41 = vrot.slane %v415_v34, 5  ;;  %v6736_v33 = vld [vmem:[%s6510_s27 + $0x40] sm:$0xf] }
  0x40   : > { %v425_v42 = vshll.u32 %v6692_v22, 16  ;;  %v5295_v47 = vcombine.low %v394_v13, %v404_v40  ;;  %v591_v50 = vrot.slane %v590_v36, 4  ;;  %v421_v52 = vrot.slane %v419_v21, 4  ;;  %v6733_v13 = vld [vmem:[%s9330_s1 + $0x8] sm:$0x3] }
  0x41   : > { %v586_v48 = vsel %vm6561_vm5, %v581_v35, %v585_v10  ;;  %v412_v55 = vor.u32 %v411_v23, %v408_v37  ;;  %v598_v61 = vshrl.u32 %v6700_v38, 16  ;;  %v601_v62 = vshll.u32 %v6700_v38, 16  ;;  %6301 = vmatprep.subr.msk.bf16.mxu0 %vm792_vm1, %v6733_v13  ;;  %v6745_v40 = vld [vmem:[%s6510_s27 + $0x44] sm:$0x1] }
  0x42   : > { %v427_v53 = vrot.slane %v425_v42, 5  ;;  %5995 = vmatmul.mubr.msk.bf16.gmra.mxu0 %vm743_vm4, %v5295_v47  ;;  %v596_v1 = vsel %vm6561_vm5, %v591_v50, %v595_v30  ;;  %v422_v6 = vor.u32 %v421_v52, %v417_v41  ;;  %v607_v7 = vshll.u32 %v6706_v45, 16 }
  0x43   : > { %v611_v10 = vshrl.u32 %v6706_v45, 16  ;;  %v5303_v19 = vcombine.low %v586_v48, %v596_v1  ;;  %v413_v20 = vrot.slane %v412_v55, 4  ;;  %v600_v25 = vrot.slane %v598_v61, 4  ;;  %v6753_v55 = vld [vmem:[%s6510_s27 + $0x9c] sm:$0xf] }
  0x44   : > { %v603_v28 = vrot.slane %v601_v62, 5  ;;  %v423_v30 = vrot.slane %v422_v6, 4  ;;  %v609_v34 = vrot.slane %v607_v7, 5  ;;  %v617_v36 = vshll.u32 %v6716_v58, 16  ;;  %9366 = vst [vmem:[#allocation10_spill] sm:$0xff] %v6753_v55 }
  0x45   : > { %v613_v35 = vrot.slane %v611_v10, 4  ;;  %6011 = vmatmul.mubr.msk.bf16.gmra.mxu1 %vm743_vm4, %v5303_v19  ;;  %v418_v37 = vsel %vm6561_vm5, %v413_v20, %v417_v41  ;;  %v430_v23 = vshrl.u32 %v6728_v11, 16  ;;  %v433_v42 = vshll.u32 %v6728_v11, 16  ;;  %v6756_v6 = vld [vmem:[%s6510_s27 + $0xa0] sm:$0xf] }
  0x46   : > { %v604_v21 = vor.u32 %v603_v28, %v600_v25  ;;  %v428_v47 = vsel %vm6561_vm5, %v423_v30, %v427_v53  ;;  %v619_v50 = vrot.slane %v617_v36, 5  ;;  %v439_v52 = vshll.u32 %v6736_v33, 16  ;;  %9367 = vst [vmem:[#allocation11_spill] sm:$0xff] %v6756_v6  ;;  %v6764_v28 = vld [vmem:[%s6510_s27 + $0xa4] sm:$0x1] }
  0x47   : > { %v614_v48 = vor.u32 %v613_v35, %v609_v34  ;;  %v5296_v61 = vcombine.low %v418_v37, %v428_v47  ;;  %v432_v41 = vrot.slane %v430_v23, 4  ;;  %v435_v1 = vrot.slane %v433_v42, 5  ;;  %9368 = vst [vmem:[#allocation12_spill] sm:$0xff] %v6764_v28  ;;  %v6772_v42 = vld [vmem:[%s6510_s27 + $0x48] sm:$0xf] }
  0x48   : > { %v605_v62 = vrot.slane %v604_v21, 4  ;;  %v441_v10 = vrot.slane %v439_v52, 5  ;;  %v443_v19 = vshrl.u32 %v6736_v33, 16  ;;  %v449_v53 = vshll.u32 %v6745_v40, 16 }
  0x49   : > { %v615_v7 = vrot.slane %v614_v48, 4  ;;  %5998 = vmatprep.mubr.msk.bf16.mxu0 %vm743_vm4, %v5296_v61  ;;  %v436_v25 = vor.u32 %v435_v1, %v432_v41  ;;  %v622_v30 = vshrl.u32 %v6753_v55, 16  ;;  %v625_v35 = vshll.u32 %v6753_v55, 16  ;;  %v6775_v61 = vld [vmem:[%s6510_s27 + $0x4c] sm:$0xf] }
  0x4a   : > { %v610_v20 = vsel %vm6561_vm5, %v605_v62, %v609_v34  ;;  %v445_v37 = vrot.slane %v443_v19, 4  ;;  %v451_v21 = vrot.slane %v449_v53, 5  ;;  %v631_v23 = vshll.u32 %v6756_v6, 16 }
  0x4b   : > { %v620_v36 = vsel %vm6561_vm5, %v615_v7, %v619_v50  ;;  %v437_v48 = vrot.slane %v436_v25, 4  ;;  %v624_v34 = vrot.slane %v622_v30, 4  ;;  %v627_v52 = vrot.slane %v625_v35, 5  ;;  %v6780_v50 = vld [vmem:[%s6510_s27 + $0x50] sm:$0x1] }
  0x4c   : > { %v5304_v47 = vcombine.low %v610_v20, %v620_v36  ;;  %v446_v62 = vor.u32 %v445_v37, %v441_v10  ;;  %v633_v41 = vrot.slane %v631_v23, 5  ;;  %v635_v1 = vshrl.u32 %v6756_v6, 16 }
  0x4d   : > { %v641_v18 = vshll.u32 %v6764_v28, 16  ;;  %v442_v7 = vsel %vm6561_vm5, %v437_v48, %v441_v10  ;;  %v628_v19 = vor.u32 %v627_v52, %v624_v34  ;;  %v454_v53 = vshrl.u32 %v6772_v42, 16 }
  0x4e   : > { %6014 = vmatprep.mubr.msk.bf16.mxu1 %vm743_vm4, %v5304_v47  ;;  %v457_v20 = vshll.u32 %v6772_v42, 16  ;;  %v447_v25 = vrot.slane %v446_v62, 4  ;;  %v637_v30 = vrot.slane %v635_v1, 4  ;;  %v463_v36 = vshll.u32 %v6775_v61, 16  ;;  %v6796_v62 = vld [vmem:[%s6510_s27 + $0xac] sm:$0xf] }
  0x4f   : > { %v643_v35 = vrot.slane %v641_v18, 5  ;;  %v629_v37 = vrot.slane %v628_v19, 4  ;;  %v456_v23 = vrot.slane %v454_v53, 4  ;;  %v467_v47 = vshrl.u32 %v6775_v61, 16  ;;  %9370 = vst [vmem:[#allocation14_spill] sm:$0xff] %v6796_v62 }
  0x50   : > { %v459_v63 = vrot.slane %v457_v20, 5  ;;  %v452_v10 = vsel %vm6561_vm5, %v447_v25, %v451_v21  ;;  %v638_v48 = vor.u32 %v637_v30, %v633_v41  ;;  %v465_v34 = vrot.slane %v463_v36, 5  ;;  %v6799_v18 = vld [vmem:[%s6510_s27 + $0xb0] sm:$0x1] }
  0x51   : > { %v473_v52 = vshll.u32 %v6780_v50, 16  ;;  %9371 = vst [vmem:[#allocation15_spill] sm:$0xff] %v6799_v18  ;;  %v5297_v1 = vcombine.low %v442_v7, %v452_v10  ;;  %v634_v19 = vsel %vm6561_vm5, %v629_v37, %v633_v41  ;;  %v469_v20 = vrot.slane %v467_v47, 4  ;;  %v6809_v10 = vld [vmem:[%s6510_s27 + $0x54] sm:$0xf] }
  0x52   : > { %v460_v53 = vor.u32 %v459_v63, %v456_v23  ;;  %v639_v51 = vrot.slane %v638_v48, 4  ;;  %v646_v21 = vshrl.u32 %v6790_v59, 16  ;;  %v649_v25 = vshll.u32 %v6790_v59, 16  ;;  %v6815_v47 = vld [vmem:[%s6510_s27 + $0x58] sm:$0xf] }
  0x53   : > { %v475_v28 = vrot.slane %v473_v52, 5  ;;  %5999 = vmatmul.mubr.msk.bf16.gmra.mxu0 %vm743_vm4, %v5297_v1  ;;  %v470_v36 = vor.u32 %v469_v20, %v465_v34  ;;  %v655_v55 = vshll.u32 %v6796_v62, 16  ;;  %v659_v7 = vshrl.u32 %v6796_v62, 16  ;;  %v6820_v20 = vld [vmem:[%s6510_s27 + $0x5c] sm:$0x1] }
  0x54   : > { %v461_v30 = vrot.slane %v460_v53, 4  ;;  %v644_v63 = vsel %vm6561_vm5, %v639_v51, %v643_v35  ;;  %v648_v41 = vrot.slane %v646_v21, 4  ;;  %v651_v37 = vrot.slane %v649_v25, 5 }
  0x55   : > { %v665_v23 = vshll.u32 %v6799_v18, 16  ;;  %v5305_v48 = vcombine.low %v634_v19, %v644_v63  ;;  %v471_v1 = vrot.slane %v470_v36, 4  ;;  %v657_v53 = vrot.slane %v655_v55, 5  ;;  %v6830_v55 = vld [vmem:[%s6510_s27 + $0xb4] sm:$0xf] }
  0x56   : > { %v466_v52 = vsel %vm6561_vm5, %v461_v30, %v465_v34  ;;  %v652_v59 = vor.u32 %v651_v37, %v648_v41  ;;  %v661_v62 = vrot.slane %v659_v7, 4  ;;  %v478_v51 = vshrl.u32 %v6809_v10, 16  ;;  %v6833_v63 = vld [vmem:[%s6510_s27 + $0xb8] sm:$0xf]  ;;  %v6842_v18 = vld [vmem:[%s6510_s27 + $0xbc] sm:$0x1] }
  0x57   : > { %v667_v6 = vrot.slane %v665_v23, 5  ;;  %6015 = vmatmul.mubr.msk.bf16.gmra.mxu1 %vm743_vm4, %v5305_v48  ;;  %v476_v35 = vsel %vm6561_vm5, %v471_v1, %v475_v28  ;;  %v481_v19 = vshll.u32 %v6809_v10, 16  ;;  %v487_v21 = vshll.u32 %v6815_v47, 16 }
  0x58   : > { %v491_v34 = vshrl.u32 %v6815_v47, 16  ;;  %v5298_v25 = vcombine.low %v466_v52, %v476_v35  ;;  %v653_v30 = vrot.slane %v652_v59, 4  ;;  %v662_v36 = vor.u32 %v661_v62, %v657_v53 }
  0x59   : > { %v480_v7 = vrot.slane %v478_v51, 4  ;;  %v483_v41 = vrot.slane %v481_v19, 5  ;;  %v489_v37 = vrot.slane %v487_v21, 5  ;;  %v497_v28 = vshll.u32 %v6820_v20, 16  ;;  %v1249_v21 = vld [vmem:[%s6510_s27] sm:$0xe] }
  0x5a   : > { %v493_v23 = vrot.slane %v491_v34, 4  ;;  %6002 = vmatprep.mubr.msk.bf16.mxu0 %vm743_vm4, %v5298_v25  ;;  %v658_v48 = vsel %vm6561_vm5, %v653_v30, %v657_v53  ;;  %v663_v1 = vrot.slane %v662_v36, 4  ;;  %v670_v59 = vshrl.u32 %v6830_v55, 16  ;;  %v1250_v30 = vld [vmem:[%s6510_s27 + $0xc] sm:$0xe] }
  0x5b   : > { %v673_v62 = vshll.u32 %v6830_v55, 16  ;;  %v484_v52 = vor.u32 %v483_v41, %v480_v7  ;;  %v499_v35 = vrot.slane %v497_v28, 5  ;;  %v679_v19 = vshll.u32 %v6833_v63, 16 }
  0x5c   : > { %v494_v51 = vor.u32 %v493_v23, %v489_v37  ;;  %v668_v34 = vsel %vm6561_vm5, %v663_v1, %v667_v6  ;;  %v672_v25 = vrot.slane %v670_v59, 4  ;;  %v683_v53 = vshrl.u32 %v6833_v63, 16 }
  0x5d   : > { %v675_v58 = vrot.slane %v673_v62, 5  ;;  %v5306_v36 = vcombine.low %v658_v48, %v668_v34  ;;  %v485_v38 = vrot.slane %v484_v52, 4  ;;  %v681_v7 = vrot.slane %v679_v19, 5  ;;  %v1251_v19 = vld [vmem:[%s6510_s27 + $0x18] sm:$0xe] }
  0x5e   : > { %v495_v45 = vrot.slane %v494_v51, 4  ;;  %v685_v23 = vrot.slane %v683_v53, 4  ;;  %v689_v28 = vshll.u32 %v6842_v18, 16  ;;  %vm1298_vm7 = vcmask 1046532  }
  0x5f   : > { %v676_v41 = vor.u32 %v675_v58, %v672_v25  ;;  %6018 = vmatprep.mubr.msk.bf16.mxu1 %vm743_vm4, %v5306_v36  ;;  %v490_v6 = vsel %vm6561_vm5, %v485_v38, %v489_v37  ;;  %v5356_v59 = vrot.slane %v1249_v21, 9  ;;  %vm6856_vm8 = vmor %vm1297_vm6, %vm1298_vm7  ;;  %v1302_v34 = vrot.slane %v6527_v4, 5 }
  0x60   : > { %v500_v1 = vsel %vm6561_vm5, %v495_v45, %v499_v35  ;;  %v686_v52 = vor.u32 %v685_v23, %v681_v7  ;;  %v691_v51 = vrot.slane %v689_v28, 5  ;;  %v5325_v38 = vcombine.low %v6557_v26, %v6566_v32  ;;  %v1252_v28 = vld [vmem:[%s6510_s27 + $0x24] sm:$0xe] }
  0x61   : > { %v5299_v48 = vcombine.low %v490_v6, %v500_v1  ;;  %v677_v62 = vrot.slane %v676_v41, 4  ;;  %v5357_v37 = vrot.slane %v1250_v30, 9  ;;  %v9374_v45 = vrot.slane %v6566_v32, 5 }
  0x62   : > { %v687_v25 = vrot.slane %v686_v52, 4  ;;  %v1303_v53 = vsel %vm6856_vm8, %v5356_v59, %v1302_v34  ;;  %v1304_v36 = vrot.slane %v1302_v34, 4  ;;  %v9376_v30 = vrot.slane %v6573_v43, 5  ;;  %v1253_v34 = vld [vmem:[%s6510_s27 + $0x30] sm:$0xe] }
  0x63   : > { %v1311_v35 = vrot.slane %v9374_v45, 4  ;;  %6003 = vmatmul.mubr.msk.bf16.gmra.mxu0 %vm743_vm4, %v5299_v48  ;;  %v682_v21 = vsel %vm6561_vm5, %v677_v62, %v681_v7  ;;  %v9375_v41 = vmov %v9374_v45  ;;  %v5324_v7 = vcombine.low %v6521_v2, %v6527_v4 }
  0x64   : > { %v1310_v26 = vsel %vm6856_vm8, %v5357_v37, %v9375_v41  ;;  %v692_v6 = vsel %vm6561_vm5, %v687_v25, %v691_v51  ;;  %v5326_v1 = vcombine.low %v6603_v9, %v6608_v17  ;;  %v5358_v59 = vrot.slane %v1251_v19, 9  ;;  %v1255_v41 = vld [vmem:[%s6510_s27 + $0x48] sm:$0xe] }
  0x65   : > { %v1313_v23 = vsel %vm6856_vm8, %v1311_v35, %v9376_v30  ;;  %v5307_v32 = vcombine.low %v682_v21, %v692_v6  ;;  %v9377_v48 = vrot.slane %v6530_v5, 5  ;;  %v1316_v62 = vrot.slane %v6608_v17, 5  ;;  %v1254_v21 = vld [vmem:[%s6510_s27 + $0x3c] sm:$0xe] }
  0x66   : > { %v1319_v52 = vrot.slane %v6616_v24, 5  ;;  %v5374_v37 = vcombine.low %v1310_v26, %v1313_v23  ;;  %v1323_v2 = vrot.slane %v6649_v8, 5  ;;  %v5359_v5 = vrot.slane %v1252_v28, 9 }
  0x67   : > { %v1306_v43 = vsel %vm6856_vm8, %v1304_v36, %v9377_v48  ;;  %6019 = vmatmul.mubr.msk.bf16.gmra.mxu1 %vm743_vm4, %v5307_v32  ;;  %v1317_v4 = vsel %vm6856_vm8, %v5358_v59, %v1316_v62  ;;  %v1318_v9 = vrot.slane %v1316_v62, 4  ;;  %v1326_v19 = vrot.slane %v6652_v14, 5  ;;  %v6910_v14 = vld [vmem:[%s9330_s1 + $0xc] sm:$0x3]  ;;  %v1256_v59 = vld [vmem:[%s6510_s27 + $0x54] sm:$0xe] }
  0x68   : > { %v5373_v51 = vcombine.low %v1303_v53, %v1306_v43  ;;  %6024 = vmatprep.mubr.msk.bf16.mxu1 %vm743_vm4, %v5324_v7  ;;  %v2599_v17 = vsel %vm792_vm1, %v6733_v13, 0  ;;  %v1325_v24 = vrot.slane %v1323_v2, 4  ;;  %v5360_v45 = vrot.slane %v1253_v34, 9 }
  0x69   : > { %v1330_v35 = vrot.slane %v6686_v3, 5  ;;  %v1320_v25 = vsel %vm6856_vm8, %v1318_v9, %v1319_v52  ;;  %v1333_v53 = vrot.slane %v6692_v22, 5  ;;  %v1873_v26 = vsel %vm792_vm1, %v6713_v54, 0  ;;  %v1257_v9 = vld [vmem:[%s6510_s27 + $0x60] sm:$0xe] }
  0x6a   : > { %6058 = vmatprep.mubr.msk.bf16.mxu0 %vm743_vm4, %v5373_v51  ;;  %v5375_v36 = vcombine.low %v1317_v4, %v1320_v25  ;;  %v1324_v30 = vsel %vm6856_vm8, %v5359_v5, %v1323_v2  ;;  %v1327_v22 = vsel %vm6856_vm8, %v1325_v24, %v1326_v19  ;;  %v1337_v23 = vrot.slane %v6736_v33, 5 }
  0x6b   : > { %6059 = vmatmul.mubr.msk.bf16.vlgmr.msra.gmra.mxu0 %vm743_vm4, %v5374_v37  ;;  %v1332_v13 = vrot.slane %v1330_v35, 4  ;;  %v1331_v28 = vsel %vm6856_vm8, %v5360_v45, %v1330_v35  ;;  %v5361_v7 = vrot.slane %v1254_v21, 9  ;;  %v1344_v54 = vrot.slane %v6775_v61, 5  ;;  %v6936_v37 = vld [vmem:[%s9330_s1 + $0xa] sm:$0x3] }
  0x6c   : > { %6125 = vmatpush3.bf16.msra.mxu0 %v2599_v17  ;;  %6062 = vmatprep.mubr.msk.bf16.mxu0 %vm743_vm4, %v5375_v36  ;;  %v1339_v32 = vrot.slane %v1337_v23, 4  ;;  %v1340_v48 = vrot.slane %v6745_v40, 5  ;;  %v5362_v43 = vrot.slane %v1255_v41, 9  ;;  %v1347_v62 = vrot.slane %v6780_v50, 5  ;;  %v1260_v45 = vld [vmem:[%s6510_s27 + $0x84] sm:$0xe] }
  0x6d   : > { %v1334_v6 = vsel %vm6856_vm8, %v1332_v13, %v1333_v53  ;;  %6303 = vmatprep.subr.msk.bf16.mxu0 %vm792_vm1, %v6910_v14  ;;  %v5376_v52 = vcombine.low %v1324_v30, %v1327_v22  ;;  %v1346_v34 = vrot.slane %v1344_v54, 4  ;;  %v1351_v51 = vrot.slane %v6815_v47, 5  ;;  %v1261_v30 = vld [vmem:[%s6510_s27 + $0x90] sm:$0xe] }
  0x6e   : > { %v5377_v2 = vcombine.low %v1331_v28, %v1334_v6  ;;  %v5363_v4 = vrot.slane %v1256_v59, 9  ;;  %v1354_v40 = vrot.slane %v6820_v20, 5  ;;  %v1361_v50 = vrot.slane %v6544_v16, 5 }
  0x6f   : > { %6025 = vmatmul.mubr.msk.bf16.vlgmr.msra.gmra.mxu1 %vm743_vm4, %v5325_v38  ;;  %v5327_v5 = vcombine.low %v6641_v56, %v6649_v8  ;;  %v5328_v19 = vcombine.low %v6680_v57, %v6686_v3  ;;  %v1353_v17 = vrot.slane %v1351_v51, 4  ;;  %v1338_v38 = vsel %vm6856_vm8, %v5361_v7, %v1337_v23  ;;  %v1264_v23 = vld [vmem:[%s6510_s27 + $0xb4] sm:$0xe] }
  0x70   : > { %6091 = vmatpush3.bf16.msra.mxu1 %v1873_v26  ;;  %6028 = vmatprep.mubr.msk.bf16.mxu1 %vm743_vm4, %v5326_v1  ;;  %v1341_v24 = vsel %vm6856_vm8, %v1339_v32, %v1340_v48  ;;  %v1345_v20 = vsel %vm6856_vm8, %v5362_v43, %v1344_v54  ;;  %v1348_v16 = vsel %vm6856_vm8, %v1346_v34, %v1347_v62  ;;  %v1258_v1 = vld [vmem:[%s6510_s27 + $0x6c] sm:$0xe]  ;;  %v5364_v3 = vrot.slane %v1257_v9, 9  ;;  %v1262_v48 = vld [vmem:[%s6510_s27 + $0x9c] sm:$0xe] }
  0x71   : > { %6302 = vmatprep.subr.msk.bf16.mxu1 %vm792_vm1, %v6936_v37  ;;  %v5329_v56 = vcombine.low %v6728_v11, %v6736_v33  ;;  %v5330_v8 = vcombine.low %v6772_v42, %v6775_v61  ;;  %v5331_v57 = vcombine.low %v6809_v10, %v6815_v47  ;;  %v6969_v35 = vsel %vm6856_vm8, %v5363_v4, %v1351_v51  ;;  %v9379_v4 = vld [vmem:[#allocation7_spill] sm:$0xff] }
  0x72   : > { %v6973_v21 = vsel %vm6856_vm8, %v1353_v17, %v1354_v40  ;;  %v5332_v25 = vcombine.low %v6538_v12, %v6541_v15  ;;  %v1358_v53 = vrot.slane %v6541_v15, 5  ;;  %v5378_v36 = vcombine.low %v1338_v38, %v1341_v24  ;;  %v1259_v17 = vld [vmem:[%s6510_s27 + $0x78] sm:$0xe]  ;;  %v9380_v24 = vld [vmem:[#allocation9_spill] sm:$0xff]  ;;  %v7130_v10 = vld [vmem:[%s6510_s27 + $0x2c] sm:$0x1] }
  0x73   : > { %6063 = vmatmul.mubr.msk.bf16.gmra.mxu0 %vm743_vm4, %v5376_v52  ;;  %v5379_v13 = vcombine.low %v1345_v20, %v1348_v16  ;;  %v5365_v41 = vrot.slane %v1258_v1, 9  ;;  %v1365_v26 = vrot.slane %v6591_v60, 5  ;;  %v5367_v28 = vrot.slane %v1260_v45, 9  ;;  %v9382_v16 = vld [vmem:[#allocation10_spill] sm:$0xff]  ;;  %v5479_v15 = vld [vmem:[%s6510_s27 + $0x30] sm:$0xf] }
  0x74   : > { %6066 = vmatprep.mubr.msk.bf16.mxu0 %vm743_vm4, %v5377_v2  ;;  %v1379_v6 = vrot.slane %v6666_v39, 5  ;;  %v5380_v7 = vcombine.low %v6969_v35, %v6973_v21  ;;  %v6989_v54 = vsel %vm6856_vm8, %v5364_v3, %v1358_v53  ;;  %v1368_v59 = vrot.slane %v6598_v0, 5  ;;  %v9378_v2 = vld [vmem:[#allocation8_spill] sm:$0xff]  ;;  %v7098_v1 = vld [vmem:[%s6510_s27 + $0x28] sm:$0xf] }
  0x75   : > { %v1360_v43 = vrot.slane %v1358_v53, 4  ;;  %v1382_v34 = vrot.slane %v6675_v49, 5  ;;  %v1367_v51 = vrot.slane %v1365_v26, 4  ;;  %v5368_v40 = vrot.slane %v1261_v30, 9  ;;  %v9381_v49 = vld [vmem:[#allocation11_spill] sm:$0xff] }
  0x76   : > { %v6998_v62 = vsel %vm6856_vm8, %v5367_v28, %v1379_v6  ;;  %v1381_v52 = vrot.slane %v1379_v6, 4  ;;  %v1386_v9 = vrot.slane %v9378_v2, 5  ;;  %v1389_v20 = vrot.slane %v9380_v24, 5  ;;  %v9383_v6 = vld [vmem:[#allocation12_spill] sm:$0xff] }
  0x77   : > { %6029 = vmatmul.mubr.msk.bf16.gmra.mxu1 %vm743_vm4, %v5327_v5  ;;  %v1372_v5 = vrot.slane %v6631_v44, 5  ;;  %v5369_v53 = vrot.slane %v1262_v48, 9  ;;  %v1362_v30 = vsel %vm6856_vm8, %v1360_v43, %v1361_v50  ;;  %v1393_v28 = vrot.slane %v9381_v49, 5  ;;  %v5470_v48 = vld [vmem:[%s6510_s27 + $0xc] sm:$0xf]  ;;  %v9386_v50 = vld [vmem:[#allocation6_spill] sm:$0xff] }
  0x78   : > { %6032 = vmatprep.mubr.msk.bf16.mxu1 %vm743_vm4, %v5328_v19  ;;  %v7009_v38 = vsel %vm6856_vm8, %v1381_v52, %v1382_v34  ;;  %v7019_v45 = vsel %vm6856_vm8, %v5368_v40, %v1386_v9  ;;  %v1388_v3 = vrot.slane %v1386_v9, 4  ;;  %v1396_v52 = vrot.slane %v9383_v6, 5  ;;  %v9385_v34 = vld [vmem:[#allocation13_spill] sm:$0xff]  ;;  %v1263_v19 = vld [vmem:[%s6510_s27 + $0xa8] sm:$0xe] }
  0x79   : > { %v7031_v40 = vsel %vm6856_vm8, %v5365_v41, %v1365_v26  ;;  %v5366_v9 = vrot.slane %v1259_v17, 9  ;;  %v7041_v43 = vld [vmem:[%s6510_s27 + $0x10] sm:$0xf]  ;;  %v7045_v6 = vsel %vm6856_vm8, %v1367_v51, %v1368_v59  ;;  %v7051_v26 = vsel %vm6856_vm8, %v5369_v53, %v1393_v28 }
  0x7a   : > { %v1395_v17 = vrot.slane %v1393_v28, 4  ;;  %v1375_v24 = vrot.slane %v9386_v50, 5  ;;  %v2117_v51 = vshrl.u32 %v5470_v48, 16  ;;  %v2120_v53 = vshll.u32 %v5470_v48, 16  ;;  %v7081_v50 = vld [vmem:[%s6510_s27 + $0x1c] sm:$0xf] }
  0x7b   : > { %6067 = vmatmul.mubr.msk.bf16.gmra.mxu0 %vm743_vm4, %v5378_v36  ;;  %v9384_v36 = vld [vmem:[#allocation14_spill] sm:$0xff]  ;;  %v5382_v11 = vcombine.low %v7031_v40, %v7045_v6  ;;  %v1373_v33 = vsel %vm6856_vm8, %v5366_v9, %v1372_v5  ;;  %v5370_v28 = vrot.slane %v1263_v19, 9  ;;  %v9387_v48 = vld [vmem:[#allocation15_spill] sm:$0xff]  ;;  %v1407_v61 = vrot.slane %v6833_v63, 5  ;;  %v5475_v9 = vld [vmem:[%s6510_s27 + $0x20] sm:$0x1] }
  0x7c   : > { %6070 = vmatprep.mubr.msk.bf16.mxu0 %vm743_vm4, %v5379_v13  ;;  %v7035_v13 = vsel %vm6856_vm8, %v1388_v3, %v1389_v20  ;;  %v5381_v20 = vcombine.low %v6989_v54, %v1362_v30  ;;  %v1374_v3 = vrot.slane %v1372_v5, 4  ;;  %v1400_v0 = vrot.slane %v9384_v36, 5  ;;  %v5473_v30 = vld [vmem:[%s6510_s27 + $0x18] sm:$0xf] }
  0x7d   : > { %v7063_v59 = vsel %vm6856_vm8, %v1395_v17, %v1396_v52  ;;  %v2126_v54 = vshll.u32 %v7041_v43, 16  ;;  %v7078_v52 = vld [vmem:[%s6510_s27 + $0x14] sm:$0x1]  ;;  %v1403_v42 = vrot.slane %v9387_v48, 5  ;;  %v2122_v17 = vrot.slane %v2120_v53, 5 }
  0x7e   : > { %v1402_v5 = vrot.slane %v1400_v0, 4  ;;  %v5371_v40 = vrot.slane %v1264_v23, 9  ;;  %v2130_v19 = vshrl.u32 %v7041_v43, 16  ;;  %v2141_v6 = vshrl.u32 %v5473_v30, 16  ;;  %v5476_v53 = vld [vmem:[%s6510_s27 + $0x24] sm:$0xf] }
  0x7f   : > { %6033 = vmatmul.mubr.msk.bf16.gmra.mxu1 %vm743_vm4, %v5329_v56  ;;  %v1376_v48 = vsel %vm6856_vm8, %v1374_v3, %v1375_v24  ;;  %v7094_v41 = vrot.slane %v2126_v54, 5  ;;  %v1410_v35 = vrot.slane %v6842_v18, 5  ;;  %v2150_v23 = vshll.u32 %v7081_v50, 16 }
  0x80   : > { %6036 = vmatprep.mubr.msk.bf16.mxu1 %vm743_vm4, %v5330_v8  ;;  %v2119_v8 = vrot.slane %v2117_v51, 4  ;;  %v2144_v51 = vshll.u32 %v5473_v30, 16  ;;  %v2132_v21 = vrot.slane %v2130_v19, 4  ;;  %v1409_v32 = vrot.slane %v1407_v61, 4 }
  0x81   : > { %v2143_v22 = vrot.slane %v2141_v6, 4  ;;  %v5383_v3 = vcombine.low %v1373_v33, %v1376_v48  ;;  %v7106_v54 = vsel %vm6856_vm8, %v5370_v28, %v1400_v0  ;;  %v7110_v30 = vsel %vm6856_vm8, %v1402_v5, %v1403_v42  ;;  %v5482_v48 = vld [vmem:[%s6510_s27 + $0x3c] sm:$0xf] }
  0x82   : > { %v2123_v56 = vor.u32 %v2122_v17, %v2119_v8  ;;  %v2146_v24 = vrot.slane %v2144_v51, 5  ;;  %v7114_v18 = vsel %vm6856_vm8, %v5371_v40, %v1407_v61  ;;  %v2133_v0 = vor.u32 %v2132_v21, %v7094_v41 }
  0x83   : > { %6071 = vmatmul.mubr.msk.bf16.gmra.mxu0 %vm743_vm4, %v5380_v7  ;;  %v2154_v7 = vshrl.u32 %v7081_v50, 16  ;;  %v2160_v28 = vshll.u32 %v5475_v9, 16  ;;  %v2165_v8 = vshrl.u32 %v5476_v53, 16  ;;  %v7127_v42 = vrot.slane %v2150_v23, 5 }
  0x84   : > { %6074 = vmatprep.mubr.msk.bf16.mxu0 %vm743_vm4, %v5381_v20  ;;  %v2136_v20 = vshll.u32 %v7078_v52, 16  ;;  %v7120_v33 = vrot.slane %v2123_v56, 4  ;;  %v2168_v47 = vshll.u32 %v5476_v53, 16  ;;  %v7135_v56 = vsel %vm6856_vm8, %v1409_v32, %v1410_v35  ;;  %v7152_v32 = vld [vmem:[%s6510_s27 + $0x38] sm:$0x1] }
  0x85   : > { %v2156_v61 = vrot.slane %v2154_v7, 4  ;;  %v2147_v5 = vor.u32 %v2146_v24, %v2143_v22  ;;  %v2178_v12 = vshrl.u32 %v7098_v1, 16  ;;  %v7147_v40 = vsel %vm792_vm1, %v6936_v37, 0 }
  0x86   : > { %v7137_v17 = vrot.slane %v2136_v20, 5  ;;  %v2167_v19 = vrot.slane %v2165_v8, 4  ;;  %v2170_v9 = vrot.slane %v2168_v47, 5  ;;  %v2134_v22 = vrot.slane %v2133_v0, 4 }
  0x87   : > { %6037 = vmatmul.mubr.msk.bf16.gmra.mxu1 %vm743_vm4, %v5331_v57  ;;  %v2174_v57 = vshll.u32 %v7098_v1, 16  ;;  %v7156_v51 = vrot.slane %v2160_v28, 5  ;;  %v2180_v53 = vrot.slane %v2178_v12, 4  ;;  %v2129_v37 = vsel %vm6561_vm5, %v7120_v33, %v7094_v41  ;;  %v7174_v41 = vld [vmem:[%s6510_s27 + $0x40] sm:$0xf] }
  0x88   : > { %6040 = vmatprep.mubr.msk.bf16.mxu1 %vm743_vm4, %v5332_v25  ;;  %v7142_v25 = vld [vmem:[%s6510_s27 + $0x34] sm:$0xf]  ;;  %v2157_v35 = vor.u32 %v2156_v61, %v7127_v42  ;;  %v2189_v21 = vshrl.u32 %v5479_v15, 16  ;;  %v2192_v23 = vshll.u32 %v5479_v15, 16  ;;  %v7167_v7 = vrot.slane %v2147_v5, 4 }
  0x89   : > { %v7149_v6 = vrot.slane %v2174_v57, 5  ;;  %v2184_v20 = vshll.u32 %v7130_v10, 16  ;;  %v2198_v24 = vshll.u32 %v7142_v25, 16  ;;  %v9388_v33 = vcombine.low %v6578_v46, %v6591_v60  ;;  %v5485_v12 = vld [vmem:[%s6510_s27 + $0x48] sm:$0xf] }
  0x8a   : > { %v2191_v28 = vrot.slane %v2189_v21, 4  ;;  %v2194_v8 = vrot.slane %v2192_v23, 5  ;;  %v2208_v57 = vshll.u32 %v7152_v32, 16  ;;  %v2213_v5 = vshrl.u32 %v5482_v48, 16 }
  0x8b   : > { %6075 = vmatmul.mubr.msk.bf16.gmra.mxu0 %vm743_vm4, %v5382_v11  ;;  %v7160_v11 = vsel %vm792_vm1, %v6910_v14, 0  ;;  %v2202_v14 = vshrl.u32 %v7142_v25, 16  ;;  %v2181_v0 = vor.u32 %v2180_v53, %v7149_v6  ;;  %v7180_v61 = vrot.slane %v2198_v24, 5 }
  0x8c   : > { %6078 = vmatprep.mubr.msk.bf16.mxu0 %vm743_vm4, %v5383_v3  ;;  %v2171_v3 = vor.u32 %v2170_v9, %v2167_v19  ;;  %v9389_v15 = vcombine.low %v6622_v31, %v6631_v44  ;;  %v2139_v19 = vsel %vm6561_vm5, %v2134_v22, %v7137_v17  ;;  %v2158_v46 = vrot.slane %v2157_v35, 4  ;;  %v7192_v9 = vld [vmem:[%s6510_s27 + $0x44] sm:$0x1] }
  0x8d   : > { %v2204_v47 = vrot.slane %v2202_v14, 4  ;;  %v2195_v60 = vor.u32 %v2194_v8, %v2191_v28  ;;  %v2216_v53 = vshll.u32 %v5482_v48, 16  ;;  %v2186_v21 = vrot.slane %v2184_v20, 5 }
  0x8e   : > { %v2215_v24 = vrot.slane %v2213_v5, 4  ;;  %v2222_v14 = vshll.u32 %v7174_v41, 16  ;;  %v9390_v31 = vcombine.low %v6998_v62, %v7009_v38  ;;  %v2172_v44 = vrot.slane %v2171_v3, 4  ;;  %v5488_v5 = vld [vmem:[%s6510_s27 + $0x54] sm:$0xf] }
  0x8f   : > { %6041 = vmatmul.mubr.msk.bf16.gmra.mxu1 %vm743_vm4, %v9388_v33  ;;  %v2205_v23 = vor.u32 %v2204_v47, %v7180_v61  ;;  %v7197_v33 = vld [vmem:[%s6510_s27 + $0x4c] sm:$0xf]  ;;  %v2182_v17 = vrot.slane %v2181_v0, 4  ;;  %v2218_v22 = vrot.slane %v2216_v53, 5  ;;  %v2226_v48 = vshrl.u32 %v7174_v41, 16 }
  0x90   : > { %6044 = vmatprep.mubr.msk.bf16.mxu1 %vm743_vm4, %v9389_v15  ;;  %v9391_v35 = vcombine.low %v7019_v45, %v7035_v13  ;;  %v2196_v20 = vrot.slane %v2195_v60, 4  ;;  %v2210_v28 = vrot.slane %v2208_v57, 5  ;;  %v7208_v8 = vrot.slane %v2222_v14, 5  ;;  %v7217_v60 = vld [vmem:[%s6510_s27 + $0x50] sm:$0x1] }
  0x91   : > { %v2237_v47 = vshrl.u32 %v5485_v12, 16  ;;  %v5387_v62 = vcombine.low %v7106_v54, %v7110_v30  ;;  %v5388_v38 = vcombine.low %v7114_v18, %v7135_v56  ;;  %v2228_v3 = vrot.slane %v2226_v48, 4  ;;  %v6364_v56 = vld [vmem:[%s6510_s27 + $0xc] sm:$0xff]  }
  0x92   : > { %v2240_v0 = vshll.u32 %v5485_v12, 16  ;;  %v2206_v15 = vrot.slane %v2205_v23, 4  ;;  %v2219_v45 = vor.u32 %v2218_v22, %v2215_v24  ;;  %v2232_v13 = vshll.u32 %v7192_v9, 16  ;;  %v7236_v23 = vld [vmem:[%s6510_s27 + $0x58] sm:$0xf] }
  0x93   : > { %6079 = vmatmul.mubr.msk.bf16.gmra.mxu0 %vm743_vm4, %v9390_v31  ;;  %v2239_v57 = vrot.slane %v2237_v47, 4  ;;  %v7219_v53 = vcombine.low %v2129_v37, %v2139_v19  ;;  %v2229_v14 = vor.u32 %v2228_v3, %v7208_v8  ;;  %v2246_v54 = vshll.u32 %v7197_v33, 16  ;;  %v5491_v22 = vld [vmem:[%s6510_s27 + $0x60] sm:$0xf]  ;;  %v7252_v3 = vld [vmem:[%s6510_s27 + $0x5c] sm:$0x1] }
  0x94   : > { %6082 = vmatprep.mubr.msk.bf16.mxu0 %vm743_vm4, %v9391_v35  ;;  %v2242_v31 = vrot.slane %v2240_v0, 5  ;;  %v9392_v30 = vcombine.low %v6658_v29, %v6666_v39  ;;  %v2153_v12 = vsel %vm6561_vm5, %v7167_v7, %v7127_v42  ;;  %v2163_v37 = vsel %vm6561_vm5, %v2158_v46, %v7156_v51 }
  0x95   : > { %v2250_v19 = vshrl.u32 %v7197_v33, 16  ;;  %v2261_v24 = vshrl.u32 %v5488_v5, 16  ;;  %v9393_v29 = vcombine.low %v9379_v4, %v9378_v2  ;;  %v2177_v39 = vsel %vm6561_vm5, %v2172_v44, %v7149_v6  ;;  %v7255_v2 = vld [vmem:[%s6510_s27 + $0x64] sm:$0xf] }
  0x96   : > { %v2187_v42 = vsel %vm6561_vm5, %v2182_v17, %v2186_v21  ;;  %v2243_v7 = vor.u32 %v2242_v31, %v2239_v57  ;;  %v2264_v51 = vshll.u32 %v5488_v5, 16  ;;  %v2201_v46 = vsel %vm6561_vm5, %v2196_v20, %v7180_v61 }
  0x97   : > { %6045 = vmatmul.mubr.msk.bf16.gmra.mxu1 %vm743_vm4, %v9392_v30  ;;  %v2220_v48 = vrot.slane %v2219_v45, 4  ;;  %v2230_v35 = vrot.slane %v2229_v14, 4  ;;  %v2234_v47 = vrot.slane %v2232_v13, 5  ;;  %v9394_v4 = vcombine.low %v7051_v26, %v7063_v59 }
  0x98   : > { %6048 = vmatprep.mubr.msk.bf16.mxu1 %vm743_vm4, %v9393_v29  ;;  %v2211_v6 = vsel %vm6561_vm5, %v2206_v15, %v2210_v28  ;;  %v7263_v21 = vrot.slane %v2246_v54, 5  ;;  %v2252_v44 = vrot.slane %v2250_v19, 4  ;;  %v2256_v61 = vshll.u32 %v7217_v60, 16 }
  0x99   : > { %v2263_v17 = vrot.slane %v2261_v24, 4  ;;  %v2266_v20 = vrot.slane %v2264_v51, 5  ;;  %v2270_v5 = vshll.u32 %v7236_v23, 16  ;;  %v2274_v26 = vshrl.u32 %v7236_v23, 16 }
  0x9a   : > { %v7269_v59 = vcombine.low %v2153_v12, %v2163_v37  ;;  %v7271_v0 = vcombine.low %v2177_v39, %v2187_v42  ;;  %v7273_v28 = vrot.slane %v2243_v7, 4  ;;  %v2285_v15 = vshrl.u32 %v5491_v22, 16  ;;  %v5494_v12 = vld [vmem:[%s6510_s27 + $0x6c] sm:$0xf]  ;;  %v7288_v37 = vld [vmem:[%s6510_s27 + $0x70] sm:$0xf] }
  0x9b   : > { %6083 = vmatmul.mubr.msk.bf16.gmra.mxu0 %vm743_vm4, %v9394_v4  ;;  %v2235_v45 = vsel %vm6561_vm5, %v2230_v35, %v2234_v47  ;;  %v2288_v13 = vshll.u32 %v5491_v22, 16  ;;  %v2294_v57 = vshll.u32 %v7255_v2, 16  ;;  %v7281_v14 = vcombine.low %v2201_v46, %v2211_v6  ;;  %v7299_v39 = vld [vmem:[%s6510_s27 + $0x68] sm:$0x1]  ;;  %v7312_v46 = vld [vmem:[%s6510_s27 + $0x74] sm:$0x1] }
  0x9c   : > { %6086 = vmatprep.mubr.msk.bf16.mxu0 %vm743_vm4, %v5387_v62  ;;  %v2225_v62 = vsel %vm6561_vm5, %v2220_v48, %v7208_v8  ;;  %v2253_v31 = vor.u32 %v2252_v44, %v7263_v21  ;;  %v2280_v54 = vshll.u32 %v7252_v3, 16  ;;  %v2298_v30 = vshrl.u32 %v7255_v2, 16  ;;  %v5497_v48 = vld [vmem:[%s6510_s27 + $0x78] sm:$0xf] }
  0x9d   : > { %v9395_v8 = vcombine.low %v9382_v16, %v9381_v49  ;;  %v7294_v19 = vrot.slane %v2256_v61, 5  ;;  %v2267_v24 = vor.u32 %v2266_v20, %v2263_v17  ;;  %v7296_v22 = vrot.slane %v2270_v5, 5 }
  0x9e   : > { %v2276_v29 = vrot.slane %v2274_v26, 4  ;;  %v9396_v42 = vcombine.low %v9385_v34, %v9384_v36  ;;  %v7305_v7 = vcombine.low %v2225_v62, %v2235_v45  ;;  %v2249_v49 = vsel %vm6561_vm5, %v7273_v28, %v7263_v21  ;;  %v7318_v34 = vld [vmem:[%s6510_s27 + $0x7c] sm:$0xf] }
  0x9f   : > { %6049 = vmatmul.mubr.msk.bf16.gmra.mxu1 %vm743_vm4, %v9395_v8  ;;  %v2287_v16 = vrot.slane %v2285_v15, 4  ;;  %v2290_v51 = vrot.slane %v2288_v13, 5  ;;  %v7315_v35 = vrot.slane %v2294_v57, 5  ;;  %v2300_v47 = vrot.slane %v2298_v30, 4 }
  0xa0   : > { %6052 = vmatprep.mubr.msk.bf16.mxu1 %vm743_vm4, %v9396_v42  ;;  %v2309_v4 = vshrl.u32 %v5494_v12, 16  ;;  %v2312_v36 = vshll.u32 %v5494_v12, 16  ;;  %v7324_v6 = vrot.slane %v2253_v31, 4  ;;  %v7326_v44 = vrot.slane %v2280_v54, 5  ;;  %v7387_v42 = vld [vmem:[%s6510_s27 + $0x94] sm:$0xf] }
  0xa1   : > { %v2318_v61 = vshll.u32 %v7288_v37, 16  ;;  %v2322_v17 = vshrl.u32 %v7288_v37, 16  ;;  %v7332_v20 = vrot.slane %v2267_v24, 4  ;;  %v2277_v5 = vor.u32 %v2276_v29, %v7296_v22  ;;  %v5500_v24 = vld [vmem:[%s6510_s27 + $0x84] sm:$0xf]  ;;  %9399 = vst [vmem:[#allocation7_spill] sm:$0xff] %v7387_v42 }
  0xa2   : > { %v2311_v26 = vrot.slane %v2309_v4, 4  ;;  %v2314_v18 = vrot.slane %v2312_v36, 5  ;;  %v2304_v15 = vshll.u32 %v7299_v39, 16  ;;  %v2301_v13 = vor.u32 %v2300_v47, %v7315_v35  ;;  %v7359_v47 = vld [vmem:[%s6510_s27 + $0x88] sm:$0xf] }
  0xa3   : > { %6087 = vmatmul.mubr.msk.bf16.gmra.mxu0 %vm743_vm4, %v5388_v38  ;;  %v2291_v38 = vor.u32 %v2290_v51, %v2287_v16  ;;  %v7337_v62 = vrot.slane %v2318_v61, 5  ;;  %v2324_v45 = vrot.slane %v2322_v17, 4  ;;  %v2328_v57 = vshll.u32 %v7312_v46, 16 }
  0xa4   : > { %6126 = vmatprep.mubr.msk.bf16.mxu0 %vm743_vm4, %v7219_v53  ;;  %v2333_v53 = vshrl.u32 %v5497_v48, 16  ;;  %v2336_v31 = vshll.u32 %v5497_v48, 16  ;;  %v2259_v54 = vsel %vm6561_vm5, %v7324_v6, %v7294_v19  ;;  %v2315_v30 = vor.u32 %v2314_v18, %v2311_v26 }
  0xa5   : > { %v2325_v12 = vor.u32 %v2324_v45, %v7337_v62  ;;  %v2342_v8 = vshll.u32 %v7318_v34, 16  ;;  %v9397_v29 = vcombine.low %v6830_v55, %v6833_v63  ;;  %v7356_v16 = vrot.slane %v2277_v5, 4  ;;  %v7367_v63 = vld [vmem:[%s6510_s27 + $0x80] sm:$0x1] }
  0xa6   : > { %v2335_v51 = vrot.slane %v2333_v53, 4  ;;  %v2338_v48 = vrot.slane %v2336_v31, 5  ;;  %v7362_v4 = vrot.slane %v2291_v38, 4  ;;  %v7364_v55 = vrot.slane %v2304_v15, 5 }
  0xa7   : > { %6053 = vmatmul.mubr.msk.bf16.gmra.mxu1 %vm743_vm4, %v9397_v29  ;;  %v7369_v36 = vrot.slane %v2342_v8, 5  ;;  %v2346_v61 = vshrl.u32 %v7318_v34, 16  ;;  %v2302_v17 = vrot.slane %v2301_v13, 4  ;;  %v2330_v5 = vrot.slane %v2328_v57, 5  ;;  %v5503_v13 = vld [vmem:[%s6510_s27 + $0x90] sm:$0xf] }
  0xa8   : > { %6092 = vmatprep.mubr.msk.bf16.mxu1 %vm743_vm4, %v6364_v56  ;;  %v2357_v26 = vshrl.u32 %v5500_v24, 16  ;;  %v2360_v18 = vshll.u32 %v5500_v24, 16  ;;  %v7375_v56 = vld [vmem:[%s9330_s1 + $0x10] sm:$0x3]  ;;  %v2316_v38 = vrot.slane %v2315_v30, 4  ;;  %v2326_v15 = vrot.slane %v2325_v12, 4 }
  0xa9   : > { %9398 = vst [vmem:[#allocation8_spill] sm:$0xff] %v7375_v56  ;;  %v2348_v45 = vrot.slane %v2346_v61, 4  ;;  %v2366_v53 = vshll.u32 %v7359_v47, 16  ;;  %v6365_v57 = vld [vmem:[%s6510_s27 + $0x18] sm:$0xff]   ;;  %v2339_v31 = vor.u32 %v2338_v48, %v2335_v51  ;;  %v2352_v8 = vshll.u32 %v7367_v63, 16 }
  0xaa   : > { %v2359_v24 = vrot.slane %v2357_v26, 4  ;;  %v2362_v29 = vrot.slane %v2360_v18, 5  ;;  %v2283_v30 = vsel %vm6561_vm5, %v7356_v16, %v7326_v44  ;;  %v2370_v12 = vshrl.u32 %v7359_v47, 16  ;;  %v7403_v51 = vld [vmem:[%s6510_s27 + $0x8c] sm:$0x1] }
  0xab   : > { %6127 = vmatmul.mubr.msk.bf16.vlgmr.msra.gmra.mxu0 %vm743_vm4, %v7269_v59  ;;  %v6366_v59 = vld [vmem:[%s6510_s27 + $0x24] sm:$0xff]   ;;  %9400 = vst [vmem:[#allocation9_spill] sm:$0xff] %v7403_v51  ;;  %v7405_v61 = vrot.slane %v2366_v53, 5  ;;  %v2381_v26 = vshrl.u32 %v5503_v13, 16  ;;  %v2384_v44 = vshll.u32 %v5503_v13, 16  ;;  %v2307_v16 = vsel %vm6561_vm5, %v2302_v17, %v7364_v55 }
  0xac   : > { %6193 = vmatpush3.bf16.msra.mxu0 %v7160_v11  ;;  %6130 = vmatprep.mubr.msk.bf16.mxu0 %vm743_vm4, %v7271_v0  ;;  %v2297_v11 = vsel %vm6561_vm5, %v7362_v4, %v7315_v35  ;;  %v2349_v0 = vor.u32 %v2348_v45, %v7369_v36  ;;  %v2363_v48 = vor.u32 %v2362_v29, %v2359_v24  ;;  %v2372_v4 = vrot.slane %v2370_v12, 4  ;;  %v7417_v45 = vld [vmem:[%s9330_s1 + $0xe] sm:$0x3]  ;;  %v7434_v12 = vld [vmem:[%s6510_s27 + $0xa0] sm:$0xf] }
  0xad   : > { %6305 = vmatprep.subr.msk.bf16.mxu0 %vm792_vm1, %v7375_v56  ;;  %v2321_v35 = vsel %vm6561_vm5, %v2316_v38, %v7337_v62  ;;  %v2390_v18 = vshll.u32 %v7387_v42, 16  ;;  %9401 = vst [vmem:[#allocation11_spill] sm:$0xff] %v7417_v45  ;;  %v2331_v53 = vsel %vm6561_vm5, %v2326_v15, %v2330_v5  ;;  %v7422_v55 = vrot.slane %v2339_v31, 4  ;;  %v5506_v38 = vld [vmem:[%s6510_s27 + $0x9c] sm:$0xf]  ;;  %9402 = vst [vmem:[#allocation10_spill] sm:$0xff] %v7434_v12 }
  0xae   : > { %v7424_v17 = vrot.slane %v2352_v8, 5  ;;  %v2394_v62 = vshrl.u32 %v7387_v42, 16  ;;  %v7430_v13 = vrot.slane %v2349_v0, 4  ;;  %v2376_v24 = vshll.u32 %v7403_v51, 16  ;;  %v7440_v31 = vld [vmem:[%s6510_s27 + $0x98] sm:$0x1] }
  0xaf   : > { %6093 = vmatmul.mubr.msk.bf16.vlgmr.msra.gmra.mxu1 %vm743_vm4, %v6365_v57  ;;  %v2383_v57 = vrot.slane %v2381_v26, 4  ;;  %v2386_v29 = vrot.slane %v2384_v44, 5  ;;  %v7436_v5 = vrot.slane %v2363_v48, 4  ;;  %v2373_v15 = vor.u32 %v2372_v4, %v7405_v61  ;;  %9403 = vst [vmem:[#allocation12_spill] sm:$0xff] %v7440_v31  ;;  %v6367_v44 = vld [vmem:[%s6510_s27 + $0x30] sm:$0xff]  }
  0xb0   : > { %6159 = vmatpush3.bf16.msra.mxu1 %v7147_v40  ;;  %6096 = vmatprep.mubr.msk.bf16.mxu1 %vm743_vm4, %v6366_v59  ;;  %v7442_v40 = vrot.slane %v2390_v18, 5  ;;  %v2396_v8 = vrot.slane %v2394_v62, 4  ;;  %v5524_v59 = vcombine.low %v2249_v49, %v2259_v54  ;;  %v9404_v0 = vsel %vm6561_vm5, %v7332_v20, %v7296_v22  ;;  %v5509_v49 = vld [vmem:[%s6510_s27 + $0xa8] sm:$0xf]  ;;  %v6368_v22 = vld [vmem:[%s6510_s27 + $0x3c] sm:$0xff]  }
  0xb1   : > { %6304 = vmatprep.subr.msk.bf16.mxu1 %vm792_vm1, %v7417_v45  ;;  %v5525_v48 = vcombine.low %v9404_v0, %v2283_v30  ;;  %v2405_v26 = vshrl.u32 %v5506_v38, 16  ;;  %v7466_v19 = vcombine.low %v2297_v11, %v2307_v16  ;;  %v7468_v6 = vcombine.low %v2321_v35, %v2331_v53  ;;  %v7482_v11 = vld [vmem:[%s6510_s27 + $0xac] sm:$0xf]  ;;  %v7496_v53 = vld [vmem:[%s6510_s27 + $0xa4] sm:$0x1] }
  0xb2   : > { %v2414_v21 = vshll.u32 %v7434_v12, 16  ;;  %v2418_v28 = vshrl.u32 %v7434_v12, 16  ;;  %v7478_v54 = vrot.slane %v2376_v24, 5  ;;  %v2400_v30 = vshll.u32 %v7440_v31, 16  ;;  %9405 = vst [vmem:[#allocation14_spill] sm:$0xff] %v7482_v11  ;;  %9406 = vst [vmem:[#allocation13_spill] sm:$0xff] %v7496_v53 }
  0xb3   : > { %6131 = vmatmul.mubr.msk.bf16.gmra.mxu0 %vm743_vm4, %v7281_v14  ;;  %v2408_v14 = vshll.u32 %v5506_v38, 16  ;;  %v7492_v4 = vrot.slane %v2373_v15, 4  ;;  %v2397_v18 = vor.u32 %v2396_v8, %v7442_v40  ;;  %v2407_v62 = vrot.slane %v2405_v26, 4  ;;  %v5512_v8 = vld [vmem:[%s6510_s27 + $0xb4] sm:$0xf] }
  0xb4   : > { %6134 = vmatprep.mubr.msk.bf16.mxu0 %vm743_vm4, %v7305_v7  ;;  %v2387_v7 = vor.u32 %v2386_v29, %v2383_v57  ;;  %v7498_v24 = vrot.slane %v2414_v21, 5  ;;  %v7501_v57 = vld [vmem:[%s6510_s27 + $0xb0] sm:$0x1]  ;;  %v2429_v29 = vshrl.u32 %v5509_v49, 16  ;;  %v2420_v0 = vrot.slane %v2418_v28, 4  ;;  %v6370_v12 = vld [vmem:[%s6510_s27 + $0x54] sm:$0xff]  }
  0xb5   : > { %v2410_v38 = vrot.slane %v2408_v14, 5  ;;  %9407 = vst [vmem:[#allocation6_spill] sm:$0xff] %v7501_v57  ;;  %v2432_v20 = vshll.u32 %v5509_v49, 16  ;;  %v2438_v15 = vshll.u32 %v7482_v11, 16  ;;  %v2442_v35 = vshrl.u32 %v7482_v11, 16  ;;  %v6369_v11 = vld [vmem:[%s6510_s27 + $0x48] sm:$0xff]  }
  0xb6   : > { %v7508_v26 = vrot.slane %v2387_v7, 4  ;;  %v7510_v14 = vrot.slane %v2400_v30, 5  ;;  %v2424_v21 = vshll.u32 %v7496_v53, 16  ;;  %v2431_v16 = vrot.slane %v2429_v29, 4  ;;  %v7514_v45 = vld [vmem:[%s6510_s27 + $0xb8] sm:$0xf] }
  0xb7   : > { %6097 = vmatmul.mubr.msk.bf16.gmra.mxu1 %vm743_vm4, %v6367_v44  ;;  %9408 = vst [vmem:[#allocation15_spill] sm:$0xff] %v7514_v45  ;;  %v7516_v44 = vrot.slane %v2397_v18, 4  ;;  %v2434_v28 = vrot.slane %v2432_v20, 5  ;;  %v7518_v49 = vrot.slane %v2438_v15, 5  ;;  %v2444_v56 = vrot.slane %v2442_v35, 4 }
  0xb8   : > { %6100 = vmatprep.mubr.msk.bf16.mxu1 %vm743_vm4, %v6368_v22  ;;  %v2379_v22 = vsel %vm6561_vm5, %v7492_v4, %v7478_v54  ;;  %v2411_v7 = vor.u32 %v2410_v38, %v2407_v62  ;;  %v2453_v30 = vshrl.u32 %v5512_v8, 16  ;;  %v2456_v29 = vshll.u32 %v5512_v8, 16  ;;  %v7530_v35 = vld [vmem:[%s6510_s27 + $0xbc] sm:$0x1]  ;;  %v5515_v53 = vld [vmem:[%s6510_s27 + $0xc0] sm:$0xf] }
  0xb9   : > { %v2421_v20 = vor.u32 %v2420_v0, %v7498_v24  ;;  %v2435_v18 = vor.u32 %v2434_v28, %v2431_v16  ;;  %v2448_v15 = vshll.u32 %v7501_v57, 16  ;;  %v2445_v31 = vor.u32 %v2444_v56, %v7518_v49  ;;  %v7538_v38 = vld [vmem:[%s6510_s27 + $0xc4] sm:$0xf]  ;;  %v7551_v42 = vld [vmem:[%s6510_s27 + $0xc8] sm:$0x1] }
  0xba   : > { %v2455_v54 = vrot.slane %v2453_v30, 4  ;;  %v2458_v4 = vrot.slane %v2456_v29, 5  ;;  %v2466_v62 = vshrl.u32 %v7514_v45, 16  ;;  %v2403_v16 = vsel %vm6561_vm5, %v7516_v44, %v7510_v14 }
  0xbb   : > { %6135 = vmatmul.mubr.msk.bf16.gmra.mxu0 %vm743_vm4, %v5524_v59  ;;  %v2462_v59 = vshll.u32 %v7514_v45, 16  ;;  %v2426_v0 = vrot.slane %v2424_v21, 5  ;;  %v2472_v30 = vshll.u32 %v7530_v35, 16  ;;  %v2477_v29 = vshrl.u32 %v5515_v53, 16 }
  0xbc   : > { %6138 = vmatprep.mubr.msk.bf16.mxu0 %vm743_vm4, %v5525_v48  ;;  %v2393_v48 = vsel %vm6561_vm5, %v7508_v26, %v7442_v40  ;;  %v2459_v56 = vor.u32 %v2458_v4, %v2455_v54  ;;  %v2468_v28 = vrot.slane %v2466_v62, 4  ;;  %v2412_v45 = vrot.slane %v2411_v7, 4 }
  0xbd   : > { %v2464_v8 = vrot.slane %v2462_v59, 5  ;;  %v2422_v57 = vrot.slane %v2421_v20, 4  ;;  %v2480_v51 = vshll.u32 %v5515_v53, 16  ;;  %v2486_v40 = vshll.u32 %v7538_v38, 16 }
  0xbe   : > { %v2436_v26 = vrot.slane %v2435_v18, 4  ;;  %v2446_v14 = vrot.slane %v2445_v31, 4  ;;  %v2450_v21 = vrot.slane %v2448_v15, 5  ;;  %v2479_v59 = vrot.slane %v2477_v29, 4  ;;  %v6372_v15 = vld [vmem:[%s6510_s27 + $0x6c] sm:$0xff]  }
  0xbf   : > { %6101 = vmatmul.mubr.msk.bf16.gmra.mxu1 %vm743_vm4, %v6369_v11  ;;  %v2469_v44 = vor.u32 %v2468_v28, %v2464_v8  ;;  %v2482_v54 = vrot.slane %v2480_v51, 5  ;;  %v2488_v4 = vrot.slane %v2486_v40, 5  ;;  %v2490_v11 = vshrl.u32 %v7538_v38, 16  ;;  %v5553_v29 = vld [vmem:[%s6510_s27 + $0x24] sm:$0xe] }
  0xc0   : > { %6104 = vmatprep.mubr.msk.bf16.mxu1 %vm743_vm4, %v6370_v12  ;;  %v2460_v53 = vrot.slane %v2459_v56, 4  ;;  %v2474_v20 = vrot.slane %v2472_v30, 5  ;;  %v2496_v62 = vshll.u32 %v7551_v42, 16  ;;  %v6371_v12 = vld [vmem:[%s6510_s27 + $0x60] sm:$0xff]   ;;  %v2417_v51 = vsel %vm6561_vm5, %v2412_v45, %v7498_v24 }
  0xc1   : > { %v2470_v7 = vrot.slane %v2469_v44, 4  ;;  %v2427_v31 = vsel %vm6561_vm5, %v2422_v57, %v2426_v0  ;;  %v2483_v18 = vor.u32 %v2482_v54, %v2479_v59  ;;  %v9409_v56 = vsel %vm6561_vm5, %v7430_v13, %v7424_v17  ;;  %v7589_v17 = vld [vmem:[%s6510_s27 + $0xc] sm:$0xe]  ;;  %v5555_v54 = vld [vmem:[%s6510_s27 + $0x3c] sm:$0xe] }
  0xc2   : > { %v9411_v45 = vsel %vm6561_vm5, %v7436_v5, %v7405_v61  ;;  %v2441_v57 = vsel %vm6561_vm5, %v2436_v26, %v7518_v49  ;;  %v2451_v0 = vsel %vm6561_vm5, %v2446_v14, %v2450_v21  ;;  %v7593_v40 = vcombine.low %v2393_v48, %v2403_v16  ;;  %v5554_v16 = vld [vmem:[%s6510_s27 + $0x30] sm:$0xe] }
  0xc3   : > { %6139 = vmatmul.mubr.msk.bf16.gmra.mxu0 %vm743_vm4, %v7466_v19  ;;  %v2492_v19 = vrot.slane %v2490_v11, 4  ;;  %v5529_v24 = vcombine.low %v9411_v45, %v2379_v22  ;;  %v2484_v13 = vrot.slane %v2483_v18, 4  ;;  %v7595_v61 = vcombine.low %v2417_v51, %v2427_v31  ;;  %v6373_v31 = vld [vmem:[%s6510_s27 + $0x78] sm:$0xff]  }
  0xc4   : > { %6142 = vmatprep.mubr.msk.bf16.mxu0 %vm743_vm4, %v7468_v6  ;;  %v9410_v6 = vsel %vm6561_vm5, %v7422_v55, %v7369_v36  ;;  %v2498_v36 = vrot.slane %v2496_v62, 5  ;;  %v2860_v55 = vrot.slane %v7041_v43, 5  ;;  %v2465_v5 = vsel %vm6561_vm5, %v2460_v53, %v2464_v8 }
  0xc5   : > { %v5528_v28 = vcombine.low %v9410_v6, %v9409_v56  ;;  %v2493_v30 = vor.u32 %v2492_v19, %v2488_v4  ;;  %v2475_v49 = vsel %vm6561_vm5, %v2470_v7, %v2474_v20  ;;  %v7602_v22 = vcombine.low %v2441_v57, %v2451_v0  ;;  %v5556_v20 = vld [vmem:[%s6510_s27 + $0x48] sm:$0xe]  ;;  %v5557_v0 = vld [vmem:[%s6510_s27 + $0x54] sm:$0xe] }
  0xc6   : > { %v2489_v26 = vsel %vm6561_vm5, %v2484_v13, %v2488_v4  ;;  %v5567_v48 = vrot.slane %v7589_v17, 9  ;;  %v2863_v8 = vrot.slane %v7078_v52, 5  ;;  %v2867_v21 = vrot.slane %v7081_v50, 5  ;;  %v6374_v56 = vld [vmem:[%s6510_s27 + $0x84] sm:$0xff]   ;;  %v5558_v13 = vld [vmem:[%s6510_s27 + $0x60] sm:$0xe] }
  0xc7   : > { %6105 = vmatmul.mubr.msk.bf16.gmra.mxu1 %vm743_vm4, %v6371_v12  ;;  %v2494_v14 = vrot.slane %v2493_v30, 4  ;;  %v5569_v44 = vrot.slane %v5553_v29, 9  ;;  %v2874_v59 = vrot.slane %v7098_v1, 5  ;;  %v7613_v11 = vcombine.low %v2465_v5, %v2475_v49 }
  0xc8   : > { %6108 = vmatprep.mubr.msk.bf16.mxu1 %vm743_vm4, %v6372_v15  ;;  %v7619_v53 = vrot.slane %v2860_v55, 4  ;;  %v2877_v7 = vrot.slane %v7130_v10, 5  ;;  %v5570_v51 = vrot.slane %v5554_v16, 9  ;;  %v2881_v18 = vrot.slane %v7142_v25, 5 }
  0xc9   : > { %v2499_v4 = vsel %vm6561_vm5, %v2494_v14, %v2498_v36  ;;  %v7628_v1 = vsel %vm6856_vm8, %v5569_v44, %v2874_v59  ;;  %v2876_v12 = vrot.slane %v2874_v59, 4  ;;  %v2884_v10 = vrot.slane %v7152_v32, 5  ;;  %v5559_v14 = vld [vmem:[%s6510_s27 + $0x6c] sm:$0xe] }
  0xca   : > { %v7624_v62 = vcombine.low %v2489_v26, %v2499_v4  ;;  %v5571_v19 = vrot.slane %v5555_v54, 9  ;;  %v2888_v15 = vrot.slane %v7174_v41, 5  ;;  %v5572_v45 = vrot.slane %v5556_v20, 9  ;;  %v5560_v54 = vld [vmem:[%s6510_s27 + $0x78] sm:$0xe] }
  0xcb   : > { %6143 = vmatmul.mubr.msk.bf16.gmra.mxu0 %vm743_vm4, %v5528_v28  ;;  %v7638_v6 = vsel %vm6856_vm8, %v2876_v12, %v2877_v7  ;;  %v2891_v28 = vrot.slane %v7192_v9, 5  ;;  %v2895_v57 = vrot.slane %v7197_v33, 5  ;;  %v7647_v32 = vsel %vm6856_vm8, %v5570_v51, %v2881_v18 }
  0xcc   : > { %6146 = vmatprep.mubr.msk.bf16.mxu0 %vm743_vm4, %v5529_v24  ;;  %v5586_v25 = vcombine.low %v7628_v1, %v7638_v6  ;;  %v2883_v41 = vrot.slane %v2881_v18, 4  ;;  %v7651_v24 = vsel %vm6856_vm8, %v5571_v19, %v2888_v15  ;;  %v2890_v9 = vrot.slane %v2888_v15, 4  ;;  %v6375_v18 = vld [vmem:[%s6510_s27 + $0x90] sm:$0xff]  }
  0xcd   : > { %v7656_v33 = vsel %vm6856_vm8, %v5572_v45, %v2895_v57  ;;  %v2897_v30 = vrot.slane %v2895_v57, 4  ;;  %v2898_v36 = vrot.slane %v7217_v60, 5  ;;  %v5573_v5 = vrot.slane %v5557_v0, 9 }
  0xce   : > { %v7662_v29 = vsel %vm6856_vm8, %v2883_v41, %v2884_v10  ;;  %v2902_v49 = vrot.slane %v7236_v23, 5  ;;  %v2905_v26 = vrot.slane %v7252_v3, 5  ;;  %v7672_v60 = vsel %vm6856_vm8, %v2890_v9, %v2891_v28 }
  0xcf   : > { %6109 = vmatmul.mubr.msk.bf16.gmra.mxu1 %vm743_vm4, %v6373_v31  ;;  %v5587_v16 = vcombine.low %v7647_v32, %v7662_v29  ;;  %v7676_v44 = vsel %vm6856_vm8, %v2897_v30, %v2898_v36  ;;  %v5574_v59 = vrot.slane %v5558_v13, 9  ;;  %v5588_v23 = vcombine.low %v7651_v24, %v7672_v60  ;;  %v9412_v30 = vld [vmem:[#allocation9_spill] sm:$0xff]  ;;  %v5763_v29 = vld [vmem:[%s6510_s27 + $0x24] sm:$0xe] }
  0xd0   : > { %6112 = vmatprep.mubr.msk.bf16.mxu1 %vm743_vm4, %v6374_v56  ;;  %v5589_v3 = vcombine.low %v7656_v33, %v7676_v44  ;;  %v7685_v4 = vsel %vm6856_vm8, %v5573_v5, %v2902_v49  ;;  %v2904_v7 = vrot.slane %v2902_v49, 4  ;;  %v2909_v20 = vrot.slane %v7255_v2, 5  ;;  %v5561_v2 = vld [vmem:[%s6510_s27 + $0x84] sm:$0xe]  ;;  %v6376_v56 = vld [vmem:[%s6510_s27 + $0x9c] sm:$0xff]  }
  0xd1   : > { %v2912_v12 = vrot.slane %v7299_v39, 5  ;;  %v5575_v51 = vrot.slane %v5559_v14, 9  ;;  %v2916_v31 = vrot.slane %v7288_v37, 5  ;;  %v2919_v19 = vrot.slane %v7312_v46, 5  ;;  %v5562_v46 = vld [vmem:[%s6510_s27 + $0x90] sm:$0xe] }
  0xd2   : > { %v7697_v10 = vsel %vm6856_vm8, %v2904_v7, %v2905_v26  ;;  %v5576_v15 = vrot.slane %v5560_v54, 9  ;;  %v7707_v37 = vsel %vm6856_vm8, %v5574_v59, %v2909_v20  ;;  %v2926_v0 = vrot.slane %v7367_v63, 5  ;;  %v5563_v5 = vld [vmem:[%s6510_s27 + $0x9c] sm:$0xe]  ;;  %v5564_v59 = vld [vmem:[%s6510_s27 + $0xa8] sm:$0xe] }
  0xd3   : > { %6147 = vmatmul.mubr.msk.bf16.gmra.mxu0 %vm743_vm4, %v7593_v40  ;;  %v2923_v40 = vrot.slane %v7318_v34, 5  ;;  %v5590_v39 = vcombine.low %v7685_v4, %v7697_v10  ;;  %v7711_v28 = vsel %vm6856_vm8, %v5575_v51, %v2916_v31  ;;  %v2918_v45 = vrot.slane %v2916_v31, 4  ;;  %v9414_v31 = vld [vmem:[#allocation12_spill] sm:$0xff] }
  0xd4   : > { %6150 = vmatprep.mubr.msk.bf16.mxu0 %vm743_vm4, %v7595_v61  ;;  %v2911_v61 = vrot.slane %v2909_v20, 4  ;;  %v5577_v13 = vrot.slane %v5561_v2, 9  ;;  %v2930_v9 = vrot.slane %v7359_v47, 5  ;;  %v2933_v36 = vrot.slane %v9412_v30, 5 }
  0xd5   : > { %v7716_v34 = vsel %vm6856_vm8, %v5576_v15, %v2923_v40  ;;  %v2925_v57 = vrot.slane %v2923_v40, 4  ;;  %v7731_v26 = vsel %vm6856_vm8, %v2918_v45, %v2919_v19  ;;  %v5578_v14 = vrot.slane %v5562_v46, 9  ;;  %v9415_v15 = vld [vmem:[#allocation10_spill] sm:$0xff] }
  0xd6   : > { %v7721_v41 = vsel %vm6856_vm8, %v2911_v61, %v2912_v12  ;;  %v7745_v7 = vsel %vm6856_vm8, %v5577_v13, %v2930_v9  ;;  %v2932_v20 = vrot.slane %v2930_v9, 4  ;;  %v9413_v12 = vld [vmem:[#allocation7_spill] sm:$0xff]  ;;  %v5579_v19 = vrot.slane %v5563_v5, 9  ;;  %v9417_v45 = vld [vmem:[#allocation14_spill] sm:$0xff]  ;;  %v5566_v5 = vld [vmem:[%s6510_s27 + $0xc0] sm:$0xe] }
  0xd7   : > { %6113 = vmatmul.mubr.msk.bf16.gmra.mxu1 %vm743_vm4, %v6375_v18  ;;  %v7735_v63 = vsel %vm6856_vm8, %v2925_v57, %v2926_v0  ;;  %v2937_v51 = vrot.slane %v9413_v12, 5  ;;  %v2940_v18 = vrot.slane %v9414_v31, 5  ;;  %v2944_v40 = vrot.slane %v9415_v15, 5  ;;  %v5565_v0 = vld [vmem:[%s6510_s27 + $0xb4] sm:$0xe]  ;;  %v6377_v13 = vld [vmem:[%s6510_s27 + $0xa8] sm:$0xff]  }
  0xd8   : > { %6116 = vmatprep.mubr.msk.bf16.mxu1 %vm743_vm4, %v6376_v56  ;;  %v7754_v2 = vsel %vm6856_vm8, %v2932_v20, %v2933_v36  ;;  %v9416_v56 = vld [vmem:[#allocation13_spill] sm:$0xff]  ;;  %v5580_v46 = vrot.slane %v5564_v59, 9  ;;  %v2951_v57 = vrot.slane %v9417_v45, 5  ;;  %v6378_v59 = vld [vmem:[%s6510_s27 + $0xb4] sm:$0xff]   ;;  %v9418_v31 = vld [vmem:[#allocation6_spill] sm:$0xff]  ;;  %v2961_v45 = vrot.slane %v7530_v35, 5 }
  0xd9   : > { %v2947_v61 = vrot.slane %v9416_v56, 5  ;;  %v2939_v30 = vrot.slane %v2937_v51, 4  ;;  %v7770_v36 = vsel %vm6856_vm8, %v5579_v19, %v2944_v40  ;;  %v2946_v20 = vrot.slane %v2944_v40, 4  ;;  %v9419_v56 = vld [vmem:[#allocation15_spill] sm:$0xff] }
  0xda   : > { %v7776_v12 = vsel %vm6856_vm8, %v5580_v46, %v2951_v57  ;;  %v2954_v15 = vrot.slane %v9418_v31, 5  ;;  %v2958_v19 = vrot.slane %v9419_v56, 5  ;;  %v5582_v31 = vrot.slane %v5566_v5, 9  ;;  %v6381_v56 = vld [vmem:[%s6510_s27 + $0x24] sm:$0xff]  }
  0xdb   : > { %6151 = vmatmul.mubr.msk.bf16.gmra.mxu0 %vm743_vm4, %v7602_v22  ;;  %v7766_v22 = vsel %vm6856_vm8, %v5578_v14, %v2937_v51  ;;  %v7781_v14 = vsel %vm6856_vm8, %v2939_v30, %v2940_v18  ;;  %v5581_v51 = vrot.slane %v5565_v0, 9  ;;  %v7789_v46 = vsel %vm6856_vm8, %v2946_v20, %v2947_v61  ;;  %v6380_v18 = vld [vmem:[%s6510_s27 + $0x18] sm:$0xff]  }
  0xdc   : > { %6154 = vmatprep.mubr.msk.bf16.mxu0 %vm743_vm4, %v7613_v11  ;;  %v2953_v11 = vrot.slane %v2951_v57, 4  ;;  %v2960_v61 = vrot.slane %v2958_v19, 4  ;;  %v5552_v20 = vld [vmem:[%s6510_s27 + $0x18] sm:$0xe]  ;;  %v2965_v5 = vrot.slane %v7538_v38, 5  ;;  %v6379_v38 = vld [vmem:[%s6510_s27 + $0xc0] sm:$0xff]  }
  0xdd   : > { %v7803_v30 = vsel %vm6856_vm8, %v5581_v51, %v2958_v19  ;;  %v5568_v17 = vrot.slane %v5552_v20, 9  ;;  %v5681_v20 = vld [vmem:[%s6510_s27 + $0x18] sm:$0xf] }
  0xde   : > { %v7793_v57 = vsel %vm6856_vm8, %v2953_v11, %v2954_v15  ;;  %v2861_v11 = vsel %vm6856_vm8, %v5567_v48, %v2860_v55  ;;  %v2864_v15 = vsel %vm6856_vm8, %v7619_v53, %v2863_v8  ;;  %v2967_v52 = vrot.slane %v2965_v5, 4  ;;  %v6396_v48 = vld [vmem:[%s6510_s27 + $0x20] sm:$0x1] }
  0xdf   : > { %6117 = vmatmul.mubr.msk.bf16.gmra.mxu1 %vm743_vm4, %v6377_v13  ;;  %v2968_v13 = vrot.slane %v7551_v42, 5  ;;  %v7830_v42 = vsel %vm6856_vm8, %v5582_v31, %v2965_v5  ;;  %v2869_v55 = vrot.slane %v2867_v21, 4  ;;  %v2870_v8 = vrot.slane %v6396_v48, 5  ;;  %v6382_v31 = vld [vmem:[%s6510_s27 + $0x30] sm:$0xff]   ;;  %v7857_v5 = vld [vmem:[%s6510_s27 + $0x1c] sm:$0xf] }
  0xe0   : > { %6120 = vmatprep.mubr.msk.bf16.mxu1 %vm743_vm4, %v6378_v59  ;;  %v7822_v59 = vsel %vm6856_vm8, %v2960_v61, %v2961_v45  ;;  %v5584_v53 = vcombine.low %v2861_v11, %v2864_v15  ;;  %v2868_v19 = vsel %vm6856_vm8, %v5568_v17, %v2867_v21  ;;  %v3675_v21 = vshrl.u32 %v5681_v20, 16  ;;  %v5684_v17 = vld [vmem:[%s6510_s27 + $0x24] sm:$0xf]  ;;  %v6383_v48 = vld [vmem:[%s6510_s27 + $0x3c] sm:$0xff]  }
  0xe1   : > { %v2871_v45 = vsel %vm6856_vm8, %v2869_v55, %v2870_v8  ;;  %v3684_v11 = vshll.u32 %v7857_v5, 16  ;;  %v3688_v15 = vshrl.u32 %v7857_v5, 16  ;;  %v7867_v55 = vld [vmem:[%s6510_s27 + $0x28] sm:$0xf] }
  0xe2   : > { %v5585_v50 = vcombine.low %v2868_v19, %v2871_v45  ;;  %v6384_v8 = vld [vmem:[%s6510_s27 + $0x48] sm:$0xff]  }
  0xe3   : > { %6155 = vmatmul.mubr.msk.bf16.gmra.mxu0 %vm743_vm4, %v7624_v62  ;;  %v7839_v62 = vsel %vm6856_vm8, %v2967_v52, %v2968_v13  ;;  %v3678_v13 = vshll.u32 %v5681_v20, 16  ;;  %v9421_v52 = vld [vmem:[#allocation11_spill] sm:$0xff]  ;;  %v7872_v19 = vrot.slane %v3684_v11, 5  ;;  %v3690_v45 = vrot.slane %v3688_v15, 4 }
  0xe4   : > { %6194 = vmatprep.mubr.msk.bf16.mxu0 %vm743_vm4, %v6380_v18  ;;  %v9420_v18 = vld [vmem:[#allocation8_spill] sm:$0xff]  ;;  %v3708_v20 = vshll.u32 %v7867_v55, 16  ;;  %v5687_v11 = vld [vmem:[%s6510_s27 + $0x30] sm:$0xf] }
  0xe5   : > { %v4627_v61 = vsel %vm792_vm1, %v9420_v18, 0  ;;  %v3699_v18 = vshrl.u32 %v5684_v17, 16  ;;  %v3723_v35 = vshrl.u32 %v5687_v11, 16  ;;  %v3726_v0 = vshll.u32 %v5687_v11, 16 }
  0xe6   : > { %v7895_v51 = vrot.slane %v3708_v20, 5 }
  0xe7   : > { %6121 = vmatmul.mubr.msk.bf16.gmra.mxu1 %vm743_vm4, %v6379_v38  ;;  %v4157_v38 = vsel %vm792_vm1, %v9421_v52, 0  ;;  %v7890_v52 = vld [vmem:[%s6510_s27 + $0x34] sm:$0xf]  ;;  %v3725_v54 = vrot.slane %v3723_v35, 4  ;;  %v3728_v47 = vrot.slane %v3726_v0, 5 }
  0xe8   : > { %6160 = vmatprep.mubr.msk.bf16.mxu1 %vm743_vm4, %v5584_v53  ;;  %v3677_v53 = vrot.slane %v3675_v21, 4  ;;  %v5762_v21 = vld [vmem:[%s6510_s27 + $0x18] sm:$0xe] }
  0xe9   : > { %v5778_v43 = vrot.slane %v5762_v21, 9 }
  0xeb   : > { %6195 = vmatmul.mubr.msk.bf16.vlgmr.msra.gmra.mxu0 %vm743_vm4, %v6381_v56  ;;  %v3680_v56 = vrot.slane %v3678_v13, 5  ;;  %v4418_v13 = vrot.slane %v7857_v5, 5 }
  0xec   : > { %6261 = vmatpush3.bf16.msra.mxu0 %v4627_v61  ;;  %6198 = vmatprep.mubr.msk.bf16.mxu0 %vm743_vm4, %v6382_v31  ;;  %v5683_v31 = vld [vmem:[%s6510_s27 + $0x20] sm:$0x1]  ;;  %v3702_v61 = vshll.u32 %v5684_v17, 16  ;;  %v3701_v17 = vrot.slane %v3699_v18, 4 }
  0xed   : > { %v3681_v6 = vor.u32 %v3680_v56, %v3677_v53  ;;  %v3694_v15 = vshll.u32 %v5683_v31, 16  ;;  %v4420_v40 = vrot.slane %v4418_v13, 4  ;;  %v4421_v53 = vrot.slane %v5683_v31, 5  ;;  %v6386_v18 = vld [vmem:[%s6510_s27 + $0x60] sm:$0xff]  }
  0xee   : > { %v3732_v56 = vshll.u32 %v7890_v52, 16 }
  0xef   : > { %6161 = vmatmul.mubr.msk.bf16.vlgmr.msra.gmra.mxu1 %vm743_vm4, %v5585_v50  ;;  %v3712_v50 = vshrl.u32 %v7867_v55, 16  ;;  %v7886_v1 = vpop.f32.mrf.mxu0  ;;  %v3696_v11 = vrot.slane %v3694_v15, 5  ;;  %v7924_v24 = vsel %vm6856_vm8, %v4420_v40, %v4421_v53  ;;  %v5690_v15 = vld [vmem:[%s6510_s27 + $0x3c] sm:$0xf]  ;;  %v7942_v53 = vld [vmem:[%s6510_s27 + $0x40] sm:$0xf] }
  0xf0   : > { %6227 = vmatpush3.bf16.msra.mxu1 %v4157_v38  ;;  %6164 = vmatprep.mubr.msk.bf16.mxu1 %vm743_vm4, %v5586_v25  ;;  %v3691_v25 = vor.u32 %v3690_v45, %v7872_v19  ;;  %v7893_v38 = vld [vmem:[%s6510_s27 + $0x2c] sm:$0x1]  ;;  %v3736_v45 = vshrl.u32 %v7890_v52, 16  ;;  %v7926_v60 = vrot.slane %v3732_v56, 5  ;;  %v3729_v56 = vor.u32 %v3728_v47, %v3725_v54 }
  0xf1   : > { %v3714_v5 = vrot.slane %v3712_v50, 4  ;;  %v7907_v20 = vpop.f32.mrf.mxu0  ;;  %v3682_v50 = vrot.slane %v3681_v6, 4  ;;  %v3718_v9 = vshll.u32 %v7893_v38, 16  ;;  %v7920_v6 = vsel %vm6856_vm8, %v5778_v43, %v4418_v13 }
  0xf2   : > { %v3692_v21 = vrot.slane %v3691_v25, 4  ;;  %v5779_v13 = vrot.slane %v5763_v29, 9  ;;  %v5689_v25 = vld [vmem:[%s6510_s27 + $0x38] sm:$0x1]  ;;  %v3760_v29 = vshrl.u32 %v7942_v53, 16 }
  0xf3   : > { %6199 = vmatmul.mubr.msk.bf16.gmra.mxu0 %vm743_vm4, %v6383_v48  ;;  %v3704_v48 = vrot.slane %v3702_v61, 5  ;;  %v3715_v32 = vor.u32 %v3714_v5, %v7895_v51  ;;  %v7931_v0 = vpop.f32.mrf.mxu0  ;;  %v3687_v35 = vsel %vm6561_vm5, %v3682_v50, %v7872_v19  ;;  %v3720_v43 = vrot.slane %v3718_v9, 5  ;;  %v6387_v19 = vld [vmem:[%s6510_s27 + $0x6c] sm:$0xff]  }
  0xf4   : > { %6202 = vmatprep.mubr.msk.bf16.mxu0 %vm743_vm4, %v6384_v8  ;;  %v6385_v8 = vld [vmem:[%s6510_s27 + $0x54] sm:$0xff]   ;;  %v7905_v61 = vpop.f32.mrf.mxu1  ;;  %9424 = vst [vmem:[#allocation12_spill] sm:$0xff] %v7931_v0  ;;  %v3697_v40 = vsel %vm6561_vm5, %v3692_v21, %v3696_v11  ;;  %v3742_v50 = vshll.u32 %v5689_v25, 16  ;;  %v5764_v21 = vld [vmem:[%s6510_s27 + $0x30] sm:$0xe]  ;;  %v3747_v9 = vshrl.u32 %v5690_v15, 16 }
  0xf5   : > { %9422 = vst [vmem:[#allocation9_spill] sm:$0xff] %v7905_v61  ;;  %v3705_v31 = vor.u32 %v3704_v48, %v3701_v17  ;;  %v3716_v48 = vrot.slane %v3715_v32, 4  ;;  %v3750_v11 = vshll.u32 %v5690_v15, 16  ;;  %v7955_v47 = vpop.f32.mrf.mxu0  ;;  %v7957_v54 = vcombine.low %v3687_v35, %v3697_v40  ;;  %v5693_v35 = vld [vmem:[%s6510_s27 + $0x48] sm:$0xf] }
  0xf6   : > { %9426 = vst [vmem:[#allocation13_spill] sm:$0xff] %v7955_v47  ;;  %v3756_v32 = vshll.u32 %v7942_v53, 16  ;;  %v3730_v40 = vrot.slane %v3729_v56, 4  ;;  %v5780_v4 = vrot.slane %v5764_v21, 9  ;;  %v7982_v15 = vld [vmem:[%s6510_s27 + $0x4c] sm:$0xf] }
  0xf7   : > { %6165 = vmatmul.mubr.msk.bf16.gmra.mxu1 %vm743_vm4, %v5587_v16  ;;  %v4425_v16 = vrot.slane %v7867_v55, 5  ;;  %v7929_v55 = vpop.f32.mrf.mxu1  ;;  %v3706_v17 = vrot.slane %v3705_v31, 4  ;;  %v6388_v31 = vld [vmem:[%s6510_s27 + $0x78] sm:$0xff]   ;;  %v3721_v44 = vsel %vm6561_vm5, %v3716_v48, %v3720_v43  ;;  %v3744_v43 = vrot.slane %v3742_v50, 5  ;;  %v5696_v50 = vld [vmem:[%s6510_s27 + $0x54] sm:$0xf] }
  0xf8   : > { %6168 = vmatprep.mubr.msk.bf16.mxu1 %vm743_vm4, %v5588_v23  ;;  %v3738_v23 = vrot.slane %v3736_v45, 4  ;;  %9423 = vst [vmem:[#allocation7_spill] sm:$0xff] %v7929_v55  ;;  %v4432_v45 = vrot.slane %v7890_v52, 5  ;;  %v7997_v56 = vrot.slane %v3756_v32, 5  ;;  %v3771_v21 = vshrl.u32 %v5693_v35, 16 }
  0xf9   : > { %v4427_v5 = vrot.slane %v4425_v16, 4  ;;  %v3711_v33 = vsel %vm6561_vm5, %v3706_v17, %v7895_v51  ;;  %v7986_v17 = vld [vmem:[%s6510_s27 + $0x44] sm:$0x1]  ;;  %v8004_v52 = vld [vmem:[%s6510_s27 + $0x58] sm:$0xf] }
  0xfa   : > { %v4434_v10 = vrot.slane %v4432_v45, 4  ;;  %v8011_v32 = vsel %vm6856_vm8, %v5780_v4, %v4432_v45  ;;  %v6390_v45 = vld [vmem:[%s6510_s27 + $0x90] sm:$0xff]   ;;  %v3804_v55 = vshll.u32 %v8004_v52, 16 }
  0xfb   : > { %6203 = vmatmul.mubr.msk.bf16.gmra.mxu0 %vm743_vm4, %v6385_v8  ;;  %v4428_v8 = vrot.slane %v7893_v38, 5  ;;  %v7953_v38 = vpop.f32.mrf.mxu1 }
  0xfc   : > { %6206 = vmatprep.mubr.msk.bf16.mxu0 %vm743_vm4, %v6386_v18  ;;  %v3739_v18 = vor.u32 %v3738_v23, %v7926_v60  ;;  %9425 = vst [vmem:[#allocation10_spill] sm:$0xff] %v7953_v38  ;;  %v3798_v38 = vshll.u32 %v5696_v50, 16 }
  0xfd   : > { %v7978_v23 = vsel %vm6856_vm8, %v4427_v5, %v4428_v8  ;;  %v7989_v48 = vpop.f32.mrf.mxu1 }
  0xfe   : > { %v3740_v51 = vrot.slane %v3739_v18, 4  ;;  %9427 = vst [vmem:[#allocation14_spill] sm:$0xff] %v7989_v48  ;;  %v5765_v18 = vld [vmem:[%s6510_s27 + $0x3c] sm:$0xe]  ;;  %v3795_v48 = vshrl.u32 %v5696_v50, 16 }
  0xff   : > { %6169 = vmatmul.mubr.msk.bf16.gmra.mxu1 %vm743_vm4, %v5589_v3  ;;  %v7974_v3 = vsel %vm6856_vm8, %v5779_v13, %v4425_v16  ;;  %v3749_v16 = vrot.slane %v3747_v9, 4  ;;  %v3752_v13 = vrot.slane %v3750_v11, 5  ;;  %v3774_v9 = vshll.u32 %v5693_v35, 16  ;;  %v6389_v35 = vld [vmem:[%s6510_s27 + $0x84] sm:$0xff]  }
 0x100   : > { %6172 = vmatprep.mubr.msk.bf16.mxu1 %vm743_vm4, %v5590_v39  ;;  %v4435_v39 = vrot.slane %v5689_v25, 5  ;;  %v7993_v25 = vcombine.low %v3711_v33, %v3721_v44  ;;  %v3780_v11 = vshll.u32 %v7982_v15, 16  ;;  %v3735_v33 = vsel %vm6561_vm5, %v3730_v40, %v7926_v60 }
 0x101   : > { %v3766_v44 = vshll.u32 %v7986_v17, 16  ;;  %v3745_v8 = vsel %vm6561_vm5, %v3740_v51, %v3744_v43  ;;  %v3753_v49 = vor.u32 %v3752_v13, %v3749_v16  ;;  %v9429_v60 = vcombine.low %v7707_v37, %v7721_v41  ;;  %v8038_v37 = vld [vmem:[%s6510_s27 + $0x50] sm:$0x1] }
 0x102   : > { %v7991_v5 = vpop.f32.mrf.mxu0  ;;  %v3808_v51 = vshrl.u32 %v8004_v52, 16  ;;  %v9432_v43 = vcombine.low %v7711_v28, %v7731_v26  ;;  %v3773_v41 = vrot.slane %v3771_v21, 4  ;;  %v3776_v16 = vrot.slane %v3774_v9, 5  ;;  %v5699_v28 = vld [vmem:[%s6510_s27 + $0x60] sm:$0xf] }
 0x103   : > { %6207 = vmatmul.mubr.msk.bf16.gmra.mxu0 %vm743_vm4, %v6387_v19  ;;  %9428 = vst [vmem:[#allocation6_spill] sm:$0xff] %v7991_v5  ;;  %v3762_v19 = vrot.slane %v3760_v29, 4  ;;  %v8015_v29 = vsel %vm6856_vm8, %v4434_v10, %v4435_v39  ;;  %v5781_v39 = vrot.slane %v5765_v18, 9  ;;  %v8040_v13 = vrot.slane %v3780_v11, 5 }
 0x104   : > { %6210 = vmatprep.mubr.msk.bf16.mxu0 %vm743_vm4, %v6388_v31  ;;  %v3784_v31 = vshrl.u32 %v7982_v15, 16  ;;  %v8028_v4 = vpop.f32.mrf.mxu0  ;;  %v8046_v18 = vrot.slane %v3766_v44, 5  ;;  %v8051_v26 = vrot.slane %v3753_v49, 4  ;;  %v4442_v21 = vrot.slane %v7986_v17, 5 }
 0x105   : > { %v8026_v40 = vpop.f32.mrf.mxu1  ;;  %9431 = vst [vmem:[#allocation8_spill] sm:$0xff] %v8028_v4  ;;  %v3763_v10 = vor.u32 %v3762_v19, %v7997_v56  ;;  %v3797_v9 = vrot.slane %v3795_v48, 4  ;;  %v3800_v11 = vrot.slane %v3798_v38, 5  ;;  %v3790_v44 = vshll.u32 %v8038_v37, 16  ;;  %v5698_v19 = vld [vmem:[%s6510_s27 + $0x5c] sm:$0x1] }
 0x106   : > { %9430 = vst [vmem:[#allocation15_spill] sm:$0xff] %v8026_v40  ;;  %v3786_v50 = vrot.slane %v3784_v31, 4  ;;  %v4439_v40 = vrot.slane %v7942_v53, 5  ;;  %v8065_v49 = vrot.slane %v3804_v55, 5  ;;  %v3777_v38 = vor.u32 %v3776_v16, %v3773_v41  ;;  %v6392_v4 = vld [vmem:[%s6510_s27 + $0xa8] sm:$0xff]  }
 0x107   : > { %6173 = vmatmul.mubr.msk.bf16.gmra.mxu1 %vm743_vm4, %v9429_v60  ;;  %v8042_v60 = vcombine.low %v3735_v33, %v3745_v8  ;;  %v8055_v8 = vld [vmem:[%s6510_s27 + $0x64] sm:$0xf]  ;;  %v8058_v31 = vpop.f32.mrf.mxu1  ;;  %v8060_v33 = vpop.f32.mrf.mxu0  ;;  %v8062_v53 = vrot.slane %v3763_v10, 4  ;;  %v3822_v10 = vshll.u32 %v5699_v28, 16  ;;  %v3801_v16 = vor.u32 %v3800_v11, %v3797_v9 }
 0x108   : > { %6176 = vmatprep.mubr.msk.bf16.mxu1 %vm743_vm4, %v9432_v43  ;;  %9433 = vst [vmem:[#allocation11_spill] sm:$0xff] %v8058_v31  ;;  %9434 = vst [vmem:[#allocation16_spill] sm:$0xff] %v8060_v33  ;;  %v8069_v17 = vsel %vm6856_vm8, %v5781_v39, %v4439_v40  ;;  %v3787_v48 = vor.u32 %v3786_v50, %v8040_v13  ;;  %v4446_v43 = vrot.slane %v7982_v15, 5  ;;  %v3819_v31 = vshrl.u32 %v5699_v28, 16 }
 0x109   : > { %v3828_v61 = vshll.u32 %v8055_v8, 16  ;;  %v3832_v55 = vshrl.u32 %v8055_v8, 16  ;;  %v3759_v39 = vsel %vm6561_vm5, %v8051_v26, %v7997_v56  ;;  %v4441_v41 = vrot.slane %v4439_v40, 4  ;;  %v8087_v28 = vpop.f32.mrf.mxu1  ;;  %v8089_v33 = vpop.f32.mrf.mxu0  ;;  %v5767_v26 = vld [vmem:[%s6510_s27 + $0x54] sm:$0xe] }
 0x10a   : > { %v4453_v50 = vrot.slane %v8004_v52, 5  ;;  %v9435_v15 = vcombine.low %v7716_v34, %v7735_v63  ;;  %9436 = vst [vmem:[#allocation17_spill] sm:$0xff] %v8087_v28  ;;  %9437 = vst [vmem:[#allocation18_spill] sm:$0xff] %v8089_v33  ;;  %v8092_v5 = vrot.slane %v3790_v44, 5  ;;  %v3814_v40 = vshll.u32 %v5698_v19, 16 }
 0x10b   : > { %6211 = vmatmul.mubr.msk.bf16.gmra.mxu0 %vm743_vm4, %v6389_v35  ;;  %v3810_v35 = vrot.slane %v3808_v51, 4  ;;  %v6391_v51 = vld [vmem:[%s6510_s27 + $0x9c] sm:$0xff]   ;;  %v9438_v52 = vcombine.low %v7745_v7, %v7754_v2  ;;  %v3778_v34 = vrot.slane %v3777_v38, 4  ;;  %v3788_v63 = vrot.slane %v3787_v48, 4  ;;  %v5702_v38 = vld [vmem:[%s6510_s27 + $0x6c] sm:$0xf]  ;;  %v8108_v48 = vpop.f32.mrf.mxu1 }
 0x10c   : > { %6214 = vmatprep.mubr.msk.bf16.mxu0 %vm743_vm4, %v6390_v45  ;;  %v5766_v45 = vld [vmem:[%s6510_s27 + $0x48] sm:$0xe]  ;;  %v4448_v9 = vrot.slane %v4446_v43, 4  ;;  %v4449_v11 = vrot.slane %v8038_v37, 5  ;;  %v3821_v44 = vrot.slane %v3819_v31, 4  ;;  %v3824_v28 = vrot.slane %v3822_v10, 5 }
 0x10d   : > { %v5782_v47 = vrot.slane %v5766_v45, 9  ;;  %v3811_v56 = vor.u32 %v3810_v35, %v8065_v49  ;;  %v8104_v45 = vrot.slane %v3828_v61, 5  ;;  %v3834_v35 = vrot.slane %v3832_v55, 4  ;;  %9439 = vst [vmem:[#allocation19_spill] sm:$0xff] %v8108_v48 }
 0x10e   : > { %v3802_v33 = vrot.slane %v3801_v16, 4  ;;  %v5783_v7 = vrot.slane %v5767_v26, 9  ;;  %v4455_v2 = vrot.slane %v4453_v50, 4  ;;  %v4456_v0 = vrot.slane %v5698_v19, 5  ;;  %v5768_v16 = vld [vmem:[%s6510_s27 + $0x60] sm:$0xe] }
 0x10f   : > { %6177 = vmatmul.mubr.msk.bf16.gmra.mxu1 %vm743_vm4, %v9435_v15  ;;  %v8102_v15 = vld [vmem:[%s6510_s27 + $0x68] sm:$0x1]  ;;  %v3769_v61 = vsel %vm6561_vm5, %v8062_v53, %v8046_v18  ;;  %v8119_v31 = vsel %vm6856_vm8, %v4441_v41, %v4442_v21  ;;  %v3812_v10 = vrot.slane %v3811_v56, 4  ;;  %v3816_v19 = vrot.slane %v3814_v40, 5  ;;  %v8133_v53 = vld [vmem:[%s6510_s27 + $0x70] sm:$0xf] }
 0x110   : > { %6180 = vmatprep.mubr.msk.bf16.mxu1 %vm743_vm4, %v9438_v52  ;;  %v3783_v55 = vsel %vm6561_vm5, %v3778_v34, %v8040_v13  ;;  %v3838_v18 = vshll.u32 %v8102_v15, 16  ;;  %v3825_v21 = vor.u32 %v3824_v28, %v3821_v44  ;;  %v3835_v41 = vor.u32 %v3834_v35, %v8104_v45  ;;  %v6393_v13 = vld [vmem:[%s6510_s27 + $0xb4] sm:$0xff]  }
 0x111   : > { %v3843_v56 = vshrl.u32 %v5702_v38, 16  ;;  %v3846_v40 = vshll.u32 %v5702_v38, 16  ;;  %v8153_v28 = vsel %vm6856_vm8, %v4455_v2, %v4456_v0  ;;  %v9440_v52 = vcombine.low %v7766_v22, %v7781_v14  ;;  %v5705_v35 = vld [vmem:[%s6510_s27 + $0x78] sm:$0xf] }
 0x112   : > { %v9442_v0 = vcombine.low %v7770_v36, %v7789_v46  ;;  %v8171_v22 = vcombine.low %v3759_v39, %v3769_v61  ;;  %v5784_v44 = vrot.slane %v5768_v16, 9 }
 0x113   : > { %6215 = vmatmul.mubr.msk.bf16.gmra.mxu0 %vm743_vm4, %v6391_v51  ;;  %v8111_v37 = vpop.f32.mrf.mxu0  ;;  %v8129_v51 = vsel %vm6856_vm8, %v5782_v47, %v4446_v43  ;;  %v3807_v47 = vsel %vm6561_vm5, %v3802_v33, %v8065_v49  ;;  %v8149_v43 = vsel %vm6856_vm8, %v5783_v7, %v4453_v50  ;;  %v3817_v33 = vsel %vm6561_vm5, %v3812_v10, %v3816_v19  ;;  %v8177_v10 = vld [vmem:[%s6510_s27 + $0x7c] sm:$0xf] }
 0x114   : > { %6218 = vmatprep.mubr.msk.bf16.mxu0 %vm743_vm4, %v6392_v4  ;;  %v3793_v4 = vsel %vm6561_vm5, %v3788_v63, %v8092_v5  ;;  %v8142_v5 = vsel %vm6856_vm8, %v4448_v9, %v4449_v11  ;;  %v6394_v63 = vld [vmem:[%s6510_s27 + $0xc0] sm:$0xff]   ;;  %v4460_v49 = vrot.slane %v8055_v8, 5  ;;  %v3852_v50 = vshll.u32 %v8133_v53, 16 }
 0x115   : > { %v8138_v26 = vpop.f32.mrf.mxu0  ;;  %v3856_v9 = vshrl.u32 %v8133_v53, 16  ;;  %v3840_v11 = vrot.slane %v3838_v18, 5  ;;  %v3826_v8 = vrot.slane %v3825_v21, 4  ;;  %v3836_v7 = vrot.slane %v3835_v41, 4  ;;  %v8191_v18 = vld [vmem:[%s6510_s27 + $0x74] sm:$0x1] }
 0x116   : > { %v3845_v2 = vrot.slane %v3843_v56, 4  ;;  %v3848_v38 = vrot.slane %v3846_v40, 5  ;;  %v8182_v46 = vcombine.low %v3783_v55, %v3793_v4  ;;  %v8186_v61 = vcombine.low %v3807_v47, %v3817_v33  ;;  %v5708_v21 = vld [vmem:[%s6510_s27 + $0x84] sm:$0xf]  ;;  %v8201_v40 = vld [vmem:[%s6510_s27 + $0x88] sm:$0xf] }
 0x117   : > { %6181 = vmatmul.mubr.msk.bf16.gmra.mxu1 %vm743_vm4, %v9440_v52  ;;  %v8159_v34 = vpop.f32.mrf.mxu1  ;;  %v8180_v36 = vpop.f32.mrf.mxu0  ;;  %v4462_v16 = vrot.slane %v4460_v49, 4  ;;  %v4463_v55 = vrot.slane %v8102_v15, 5  ;;  %v8198_v4 = vrot.slane %v3852_v50, 5  ;;  %v3858_v56 = vrot.slane %v3856_v9, 4 }
 0x118   : > { %9441 = vst [vmem:[#allocation20_spill] sm:$0xff] %v8159_v34  ;;  %6184 = vmatprep.mubr.msk.bf16.mxu1 %vm743_vm4, %v9442_v0  ;;  %v3867_v47 = vshrl.u32 %v5705_v35, 16  ;;  %v3870_v52 = vshll.u32 %v5705_v35, 16  ;;  %v3876_v33 = vshll.u32 %v8177_v10, 16  ;;  %v3880_v0 = vshrl.u32 %v8177_v10, 16  ;;  %v6395_v35 = vld [vmem:[%s6510_s27 + $0xcc] sm:$0xff]  }
 0x119   : > { %v8194_v41 = vpop.f32.mrf.mxu1  ;;  %v3841_v19 = vsel %vm6561_vm5, %v3836_v7, %v3840_v11  ;;  %v8213_v15 = vsel %vm6856_vm8, %v5784_v44, %v4460_v49  ;;  %v3849_v50 = vor.u32 %v3848_v38, %v3845_v2  ;;  %v8215_v9 = vpop.f32.mrf.mxu0  ;;  %v3891_v39 = vshrl.u32 %v5708_v21, 16 }
 0x11a   : > { %9443 = vst [vmem:[#allocation21_spill] sm:$0xff] %v8194_v41  ;;  %v3894_v14 = vshll.u32 %v5708_v21, 16  ;;  %v3900_v41 = vshll.u32 %v8201_v40, 16  ;;  %v3904_v34 = vshrl.u32 %v8201_v40, 16  ;;  %v8228_v49 = vsel %vm6856_vm8, %v4462_v16, %v4463_v55 }
 0x11b   : > { %6219 = vmatmul.mubr.msk.bf16.gmra.mxu0 %vm743_vm4, %v6393_v13  ;;  %v5769_v13 = vld [vmem:[%s6510_s27 + $0x6c] sm:$0xe]  ;;  %v8224_v11 = vpop.f32.mrf.mxu1  ;;  %v3859_v44 = vor.u32 %v3858_v56, %v8198_v4  ;;  %v9446_v2 = vcombine.low %v7803_v30, %v7822_v59  ;;  %v3872_v38 = vrot.slane %v3870_v52, 5  ;;  %v8237_v21 = vrot.slane %v3876_v33, 5  ;;  %v5770_v30 = vld [vmem:[%s6510_s27 + $0x78] sm:$0xe] }
 0x11c   : > { %6222 = vmatprep.mubr.msk.bf16.mxu0 %vm743_vm4, %v6394_v63  ;;  %v3831_v63 = vsel %vm6561_vm5, %v3826_v8, %v8104_v45  ;;  %v9444_v45 = vcombine.low %v7776_v12, %v7793_v57  ;;  %9445 = vst [vmem:[#allocation22_spill] sm:$0xff] %v8224_v11  ;;  %v3862_v8 = vshll.u32 %v8191_v18, 16  ;;  %v5785_v7 = vrot.slane %v5769_v13, 9  ;;  %v5707_v12 = vld [vmem:[%s6510_s27 + $0x80] sm:$0x1] }
 0x11d   : > { %v3869_v57 = vrot.slane %v3867_v47, 4  ;;  %v8239_v11 = vcombine.low %v3831_v63, %v3841_v19  ;;  %v8241_v16 = vrot.slane %v3849_v50, 4  ;;  %v4467_v55 = vrot.slane %v8133_v53, 5  ;;  %v8251_v19 = vpop.f32.mrf.mxu1  ;;  %v8261_v50 = vld [vmem:[%s6510_s27 + $0x8c] sm:$0x1] }
 0x11e   : > { %v4474_v56 = vrot.slane %v8177_v10, 5  ;;  %v3893_v59 = vrot.slane %v3891_v39, 4  ;;  %v3896_v47 = vrot.slane %v3894_v14, 5  ;;  %v8249_v52 = vrot.slane %v3900_v41, 5  ;;  %9448 = vst [vmem:[#allocation24_spill] sm:$0xff] %v8251_v19 }
 0x11f   : > { %6185 = vmatmul.mubr.msk.bf16.gmra.mxu1 %vm743_vm4, %v9444_v45  ;;  %v3882_v45 = vrot.slane %v3880_v0, 4  ;;  %v3906_v33 = vrot.slane %v3904_v34, 4  ;;  %v9449_v0 = vcombine.low %v7920_v6, %v7924_v24  ;;  %v3864_v10 = vrot.slane %v3862_v8, 5  ;;  %v9479_v58 = vld [vmem:[#allocation20_spill] sm:$0xff] }
 0x120   : > { %6188 = vmatprep.mubr.msk.bf16.mxu1 %vm743_vm4, %v9446_v2  ;;  %v4470_v63 = vrot.slane %v8191_v18, 5  ;;  %v3886_v39 = vshll.u32 %v5707_v12, 16  ;;  %v3860_v34 = vrot.slane %v3859_v44, 4  ;;  %v8267_v41 = vsel %vm6856_vm8, %v5785_v7, %v4467_v55  ;;  %v8272_v18 = vld [vmem:[%s6510_s27 + $0x94] sm:$0xf] }
 0x121   : > { %v3873_v6 = vor.u32 %v3872_v38, %v3869_v57  ;;  %v3883_v24 = vor.u32 %v3882_v45, %v8237_v21  ;;  %v4469_v2 = vrot.slane %v4467_v55, 4  ;;  %v4476_v8 = vrot.slane %v4474_v56, 4 }
 0x122   : > { %v4477_v53 = vrot.slane %v5707_v12, 5  ;;  %v3855_v44 = vsel %vm6561_vm5, %v8241_v16, %v8198_v4  ;;  %v3897_v7 = vor.u32 %v3896_v47, %v3893_v59  ;;  %v3907_v57 = vor.u32 %v3906_v33, %v8249_v52 }
 0x123   : > { %v8245_v13 = vpop.f32.mrf.mxu0  ;;  %6223 = vmatmul.mubr.msk.bf16.gmra.mxu0 %vm743_vm4, %v6395_v35  ;;  %v5711_v35 = vld [vmem:[%s6510_s27 + $0x90] sm:$0xf]  ;;  %v3910_v38 = vshll.u32 %v8261_v50, 16  ;;  %v9452_v55 = vcombine.low %v7830_v42, %v7839_v62  ;;  %v3888_v12 = vrot.slane %v3886_v39, 5  ;;  %v4481_v48 = vrot.slane %v8201_v40, 5 }
 0x124   : > { %9447 = vst [vmem:[#allocation23_spill] sm:$0xff] %v8245_v13  ;;  %6262 = vmatprep.mubr.msk.bf16.mxu0 %vm743_vm4, %v9449_v0  ;;  %v5786_v0 = vrot.slane %v5770_v30, 9  ;;  %v5771_v30 = vld [vmem:[%s6510_s27 + $0x84] sm:$0xe]  ;;  %v3874_v4 = vrot.slane %v3873_v6, 4  ;;  %v3884_v16 = vrot.slane %v3883_v24, 4  ;;  %v3865_v47 = vsel %vm6561_vm5, %v3860_v34, %v3864_v10 }
 0x125   : > { %v8263_v14 = vpop.f32.mrf.mxu0  ;;  %v3924_v59 = vshll.u32 %v8272_v18, 16  ;;  %v3928_v42 = vshrl.u32 %v8272_v18, 16  ;;  %v8302_v40 = vsel %vm6856_vm8, %v4469_v2, %v4470_v63  ;;  %v8310_v33 = vsel %vm6856_vm8, %v4476_v8, %v4477_v53  ;;  %v5714_v8 = vld [vmem:[%s6510_s27 + $0x9c] sm:$0xf]  ;;  %v9482_v27 = vld [vmem:[#allocation24_spill] sm:$0xff] }
 0x126   : > { %9450 = vst [vmem:[#allocation25_spill] sm:$0xff] %v8263_v14  ;;  %v3918_v14 = vshll.u32 %v5711_v35, 16  ;;  %v9453_v6 = vcombine.low %v7974_v3, %v7978_v23  ;;  %v3898_v10 = vrot.slane %v3897_v7, 4  ;;  %v3908_v34 = vrot.slane %v3907_v57, 4 }
 0x127   : > { %v8274_v19 = vpop.f32.mrf.mxu0  ;;  %v8282_v45 = vpop.f32.mrf.mxu1  ;;  %6189 = vmatmul.mubr.msk.bf16.gmra.mxu1 %vm743_vm4, %v9452_v55  ;;  %v3912_v24 = vrot.slane %v3910_v38, 5  ;;  %v5787_v63 = vrot.slane %v5771_v30, 9  ;;  %v4483_v53 = vrot.slane %v4481_v48, 4  ;;  %v3879_v57 = vsel %vm6561_vm5, %v3874_v4, %v8237_v21 }
 0x128   : > { %9451 = vst [vmem:[#allocation26_spill] sm:$0xff] %v8274_v19  ;;  %v3915_v19 = vshrl.u32 %v5711_v35, 16  ;;  %6228 = vmatprep.mubr.msk.bf16.mxu1 %vm743_vm4, %v7957_v54  ;;  %v8306_v54 = vsel %vm6856_vm8, %v5786_v0, %v4474_v56  ;;  %v8317_v35 = vld [vmem:[%s6510_s27 + $0x98] sm:$0x1]  ;;  %v9454_v56 = vcombine.low %v8011_v32, %v8015_v29  ;;  %v4484_v0 = vrot.slane %v8261_v50, 5 }
 0x129   : > { %v8290_v13 = vpop.f32.mrf.mxu0  ;;  %v8296_v62 = vpop.f32.mrf.mxu1  ;;  %v3920_v23 = vrot.slane %v3918_v14, 5  ;;  %v3889_v38 = vsel %vm6561_vm5, %v3884_v16, %v3888_v12  ;;  %v8332_v55 = vrot.slane %v3924_v59, 5  ;;  %v3930_v32 = vrot.slane %v3928_v42, 4 }
 0x12a   : > { %v3917_v3 = vrot.slane %v3915_v19, 4  ;;  %v8336_v30 = vcombine.low %v3855_v44, %v3865_v47  ;;  %v3934_v14 = vshll.u32 %v8317_v35, 16  ;;  %v3903_v12 = vsel %vm6561_vm5, %v3898_v10, %v8249_v52  ;;  %v8350_v44 = vld [vmem:[%s6510_s27 + $0xa0] sm:$0xf] }
 0x12b   : > { %v6060_v39 = vpop.f32.mrf.mxu0  ;;  %6263 = vmatmul.mubr.msk.bf16.vlgmr.msra.gmra.mxu0 %vm743_vm4, %v9453_v6  ;;  %v8319_v2 = vpop.f32.mrf.mxu1  ;;  %v5772_v6 = vld [vmem:[%s6510_s27 + $0x90] sm:$0xe]  ;;  %v3913_v4 = vsel %vm6561_vm5, %v3908_v34, %v3912_v24  ;;  %v3939_v16 = vshrl.u32 %v5714_v8, 16  ;;  %v3942_v59 = vshll.u32 %v5714_v8, 16  ;;  %v8354_v47 = vcombine.low %v3879_v57, %v3889_v38  ;;  %v5717_v38 = vld [vmem:[%s6510_s27 + $0xa8] sm:$0xf] }
 0x12c   : > { %6266 = vmatprep.mubr.msk.bf16.mxu0 %vm743_vm4, %v9454_v56  ;;  %v8358_v56 = vsel %vm6856_vm8, %v5787_v63, %v4481_v48  ;;  %v8362_v52 = vsel %vm6856_vm8, %v4483_v53, %v4484_v0  ;;  %v3921_v10 = vor.u32 %v3920_v23, %v3917_v3  ;;  %v5788_v8 = vrot.slane %v5772_v6, 9  ;;  %v8384_v6 = vld [vmem:[%s6510_s27 + $0xac] sm:$0xf] }
 0x12d   : > { %v1547_v7 = vpop.f32.mrf.mxu0  ;;  %v8334_v29 = vpop.f32.mrf.mxu1  ;;  %v4488_v57 = vrot.slane %v8272_v18, 5  ;;  %v8370_v63 = vcombine.low %v3903_v12, %v3913_v4  ;;  %v8372_v50 = vrot.slane %v3934_v14, 5  ;;  %v3948_v53 = vshll.u32 %v8350_v44, 16 }
 0x12e   : > { %v9455_v23 = vcombine.low %v8069_v17, %v8119_v31  ;;  %v3941_v18 = vrot.slane %v3939_v16, 4  ;;  %v9456_v12 = vcombine.low %v8129_v51, %v8142_v5  ;;  %v4491_v4 = vrot.slane %v8317_v35, 5  ;;  %v9457_v17 = vld [vmem:[#allocation12_spill] sm:$0xff] }
 0x12f   : > { %v6061_v21 = vpop.f32.mrf.mxu0  ;;  %v6026_v42 = vpop.f32.mrf.mxu1  ;;  %6229 = vmatmul.mubr.msk.bf16.vlgmr.msra.gmra.mxu1 %vm743_vm4, %v7993_v25  ;;  %v3931_v25 = vor.u32 %v3930_v32, %v8332_v55  ;;  %v3944_v32 = vrot.slane %v3942_v59, 5  ;;  %v8394_v19 = vrot.slane %v3948_v53, 5  ;;  %v3972_v5 = vshll.u32 %v8384_v6, 16 }
 0x130   : > { %v1131_v34 = vadd.f32 %v6026_v42, %v7886_v1  ;;  %6232 = vmatprep.mubr.msk.bf16.mxu1 %vm743_vm4, %v8042_v60  ;;  %v3952_v1 = vshrl.u32 %v8350_v44, 16  ;;  %v3966_v42 = vshll.u32 %v5717_v38, 16 }
 0x131   : > { %v1550_v24 = vpop.f32.mrf.mxu0  ;;  %v1122_v48 = vpop.f32.mrf.mxu1  ;;  %v3932_v59 = vrot.slane %v3931_v25, 4  ;;  %v5716_v25 = vld [vmem:[%s6510_s27 + $0xa4] sm:$0x1] }
 0x132   : > { %v8376_v0 = vadd.f32 %v6060_v39, %v1131_v34  ;;  %v1123_v60 = vadd.f32 %v1122_v48, %v7907_v20  ;;  %v3922_v39 = vrot.slane %v3921_v10, 4  ;;  %v3963_v20 = vshrl.u32 %v5717_v38, 16 }
 0x133   : > { %v6064_v3 = vpop.f32.mrf.mxu0  ;;  %6267 = vmatmul.mubr.msk.bf16.gmra.mxu0 %vm743_vm4, %v9455_v23  ;;  %v6027_v14 = vpop.f32.mrf.mxu1  ;;  %v4490_v48 = vrot.slane %v4488_v57, 4  ;;  %v3954_v51 = vrot.slane %v3952_v1, 4  ;;  %v3976_v10 = vshrl.u32 %v8384_v6, 16  ;;  %v5773_v1 = vld [vmem:[%s6510_s27 + $0x9c] sm:$0xe] }
 0x134   : > { %6270 = vmatprep.mubr.msk.bf16.mxu0 %vm743_vm4, %v9456_v12  ;;  %v8391_v34 = vadd.f32 %v1547_v7, %v1123_v60  ;;  %v1134_v31 = vadd.f32 %v6027_v14, %v9457_v17  ;;  %v9459_v12 = vld [vmem:[#allocation13_spill] sm:$0xff]  ;;  %v8403_v60 = vsel %vm6856_vm8, %v5788_v8, %v4488_v57  ;;  %v3945_v14 = vor.u32 %v3944_v32, %v3941_v18 }
 0x135   : > { %v1563_v16 = vpop.f32.mrf.mxu0  ;;  %v1125_v23 = vpop.f32.mrf.mxu1  ;;  %v3927_v53 = vsel %vm6561_vm5, %v3922_v39, %v8332_v55  ;;  %v8423_v55 = vsel %vm6856_vm8, %v4490_v48, %v4491_v4  ;;  %v3955_v18 = vor.u32 %v3954_v51, %v8394_v19  ;;  %v8426_v32 = vrot.slane %v3972_v5, 5 }
 0x136   : > { %v8398_v35 = vadd.f32 %v6061_v21, %v1134_v31  ;;  %v1126_v38 = vadd.f32 %v1125_v23, %v9459_v12  ;;  %v4495_v21 = vrot.slane %v8350_v44, 5  ;;  %v3965_v31 = vrot.slane %v3963_v20, 4 }
 0x137   : > { %v6065_v7 = vpop.f32.mrf.mxu0  ;;  %v6030_v17 = vpop.f32.mrf.mxu1  ;;  %6233 = vmatmul.mubr.msk.bf16.gmra.mxu1 %vm743_vm4, %v8171_v22  ;;  %v3968_v23 = vrot.slane %v3966_v42, 5  ;;  %v3937_v22 = vsel %vm6561_vm5, %v3932_v59, %v8372_v50  ;;  %v3978_v39 = vrot.slane %v3976_v10, 4  ;;  %v9461_v42 = vld [vmem:[#allocation8_spill] sm:$0xff]  ;;  %v8435_v50 = vrot.slane %v3945_v14, 4  ;;  %v8438_v59 = vld [vmem:[%s6510_s27 + $0xb0] sm:$0x1] }
 0x138   : > { %9458 = vst [vmem:[#allocation12_spill] sm:$0xff] %v8398_v35  ;;  %v8413_v12 = vadd.f32 %v1550_v24, %v1126_v38  ;;  %v9460_v35 = vld [vmem:[#allocation6_spill] sm:$0xff]  ;;  %6236 = vmatprep.mubr.msk.bf16.mxu1 %vm743_vm4, %v8182_v46  ;;  %v3958_v24 = vshll.u32 %v5716_v25, 16  ;;  %v9462_v38 = vcombine.low %v8149_v43, %v8153_v28  ;;  %v5789_v4 = vrot.slane %v5773_v1, 9  ;;  %v9464_v14 = vld [vmem:[#allocation16_spill] sm:$0xff] }
 0x139   : > { %v1147_v8 = vadd.f32 %v6030_v17, %v9460_v35  ;;  %v1566_v57 = vpop.f32.mrf.mxu0  ;;  %v1138_v44 = vpop.f32.mrf.mxu1  ;;  %v9463_v51 = vcombine.low %v8213_v15, %v8228_v49  ;;  %v4497_v5 = vrot.slane %v4495_v21, 4  ;;  %v4498_v43 = vrot.slane %v5716_v25, 5  ;;  %v5720_v15 = vld [vmem:[%s6510_s27 + $0xb4] sm:$0xf] }
 0x13a   : > { %v1139_v35 = vadd.f32 %v1138_v44, %v9461_v42  ;;  %v3969_v28 = vor.u32 %v3968_v23, %v3965_v31  ;;  %v5805_v44 = vcombine.low %v8403_v60, %v8423_v55  ;;  %v3956_v42 = vrot.slane %v3955_v18, 4  ;;  %v8457_v31 = vld [vmem:[%s6510_s27 + $0xb8] sm:$0xf]  ;;  %v9465_v23 = vld [vmem:[#allocation18_spill] sm:$0xff]  ;;  %v5726_v55 = vld [vmem:[%s6510_s27 + $0xcc] sm:$0xf] }
 0x13b   : > { %v8428_v20 = vadd.f32 %v6064_v3, %v1147_v8  ;;  %v6068_v46 = vpop.f32.mrf.mxu0  ;;  %6271 = vmatmul.mubr.msk.bf16.gmra.mxu0 %vm743_vm4, %v9462_v38  ;;  %v6031_v48 = vpop.f32.mrf.mxu1  ;;  %v5804_v3 = vcombine.low %v8358_v56, %v8362_v52  ;;  %v8449_v8 = vcombine.low %v3927_v53, %v3937_v22  ;;  %v3960_v38 = vrot.slane %v3958_v24, 5  ;;  %v5776_v52 = vld [vmem:[%s6510_s27 + $0xc0] sm:$0xe] }
 0x13c   : > { %6274 = vmatprep.mubr.msk.bf16.mxu0 %vm743_vm4, %v9463_v51  ;;  %v8446_v10 = vadd.f32 %v1563_v16, %v1139_v35  ;;  %v1150_v17 = vadd.f32 %v6031_v48, %v9464_v14  ;;  %v3979_v51 = vor.u32 %v3978_v39, %v8426_v32  ;;  %v3982_v25 = vshll.u32 %v8438_v59, 16  ;;  %v5774_v48 = vld [vmem:[%s6510_s27 + $0xa8] sm:$0xe] }
 0x13d   : > { %v1579_v1 = vpop.f32.mrf.mxu0  ;;  %v1141_v49 = vpop.f32.mrf.mxu1  ;;  %v3951_v22 = vsel %vm6561_vm5, %v8435_v50, %v8394_v19  ;;  %v8468_v18 = vsel %vm6856_vm8, %v5789_v4, %v4495_v21  ;;  %v3970_v39 = vrot.slane %v3969_v28, 4  ;;  %v4502_v14 = vrot.slane %v8384_v6, 5 }
 0x13e   : > { %v8459_v16 = vadd.f32 %v6065_v7, %v1150_v17  ;;  %v1142_v35 = vadd.f32 %v1141_v49, %v9465_v23  ;;  %v8474_v7 = vsel %vm6856_vm8, %v4497_v5, %v4498_v43  ;;  %v3987_v17 = vshrl.u32 %v5720_v15, 16 }
 0x13f   : > { %v6069_v53 = vpop.f32.mrf.mxu0  ;;  %v6034_v24 = vpop.f32.mrf.mxu1  ;;  %6237 = vmatmul.mubr.msk.bf16.gmra.mxu1 %vm743_vm4, %v8186_v61  ;;  %v3990_v50 = vshll.u32 %v5720_v15, 16  ;;  %v3996_v61 = vshll.u32 %v8457_v31, 16  ;;  %v3961_v5 = vsel %vm6561_vm5, %v3956_v42, %v3960_v38  ;;  %v3980_v43 = vrot.slane %v3979_v51, 4  ;;  %v5723_v38 = vld [vmem:[%s6510_s27 + $0xc0] sm:$0xf] }
 0x140   : > { %v8478_v49 = vadd.f32 %v1566_v57, %v1142_v35  ;;  %v1163_v19 = vadd.f32 %v6034_v24, %v8111_v37  ;;  %6240 = vmatprep.mubr.msk.bf16.mxu1 %vm743_vm4, %v8239_v11  ;;  %v3984_v6 = vrot.slane %v3982_v25, 5  ;;  %v4000_v57 = vshrl.u32 %v8457_v31, 16  ;;  %v8506_v35 = vld [vmem:[%s6510_s27 + $0xc4] sm:$0xf] }
 0x141   : > { %v1582_v21 = vpop.f32.mrf.mxu0  ;;  %v1154_v4 = vpop.f32.mrf.mxu1  ;;  %v9466_v11 = vcombine.low %v8267_v41, %v8302_v40  ;;  %v5806_v15 = vcombine.low %v8468_v18, %v8474_v7  ;;  %v5790_v42 = vrot.slane %v5774_v48, 9  ;;  %v9467_v25 = vcombine.low %v8306_v54, %v8310_v33  ;;  %v9473_v18 = vld [vmem:[#allocation10_spill] sm:$0xff] }
 0x142   : > { %v8487_v28 = vadd.f32 %v6068_v46, %v1163_v19  ;;  %v1155_v37 = vadd.f32 %v1154_v4, %v8138_v26  ;;  %v3975_v26 = vsel %vm6561_vm5, %v3970_v39, %v8426_v32  ;;  %v4504_v46 = vrot.slane %v4502_v14, 4  ;;  %v8512_v4 = vld [vmem:[%s6510_s27 + $0xbc] sm:$0x1] }
 0x143   : > { %v6072_v23 = vpop.f32.mrf.mxu0  ;;  %6275 = vmatmul.mubr.msk.bf16.gmra.mxu0 %vm743_vm4, %v9466_v11  ;;  %v6035_v51 = vpop.f32.mrf.mxu1  ;;  %v4505_v41 = vrot.slane %v8438_v59, 5  ;;  %v3989_v40 = vrot.slane %v3987_v17, 4  ;;  %v3992_v54 = vrot.slane %v3990_v50, 5  ;;  %v8514_v33 = vrot.slane %v3996_v61, 5 }
 0x144   : > { %6278 = vmatprep.mubr.msk.bf16.mxu0 %vm743_vm4, %v9467_v25  ;;  %v8508_v24 = vadd.f32 %v1579_v1, %v1155_v37  ;;  %v1166_v48 = vadd.f32 %v6035_v51, %v8180_v36  ;;  %v3985_v32 = vsel %vm6561_vm5, %v3980_v43, %v3984_v6  ;;  %v4002_v39 = vrot.slane %v4000_v57, 4  ;;  %v9468_v57 = vld [vmem:[#allocation23_spill] sm:$0xff] }
 0x145   : > { %v1595_v19 = vpop.f32.mrf.mxu0  ;;  %v1157_v11 = vpop.f32.mrf.mxu1  ;;  %v4011_v25 = vshrl.u32 %v5723_v38, 16  ;;  %v4014_v59 = vshll.u32 %v5723_v38, 16  ;;  %v4020_v36 = vshll.u32 %v8506_v35, 16  ;;  %v4024_v51 = vshrl.u32 %v8506_v35, 16 }
 0x146   : > { %v8518_v17 = vadd.f32 %v6069_v53, %v1166_v48  ;;  %v1158_v1 = vadd.f32 %v1157_v11, %v8215_v9  ;;  %v8525_v61 = vcombine.low %v3951_v22, %v3961_v5  ;;  %v8529_v43 = vsel %vm6856_vm8, %v5790_v42, %v4502_v14  ;;  %v5775_v14 = vld [vmem:[%s6510_s27 + $0xb4] sm:$0xe] }
 0x147   : > { %v6073_v37 = vpop.f32.mrf.mxu0  ;;  %v6038_v50 = vpop.f32.mrf.mxu1  ;;  %6241 = vmatmul.mubr.msk.bf16.gmra.mxu1 %vm743_vm4, %v8336_v30  ;;  %v8533_v53 = vsel %vm6856_vm8, %v4504_v46, %v4505_v41  ;;  %v4006_v9 = vshll.u32 %v8512_v4, 16  ;;  %v8541_v30 = vcombine.low %v3975_v26, %v3985_v32  ;;  %v3993_v22 = vor.u32 %v3992_v54, %v3989_v40 }
 0x148   : > { %v8536_v6 = vadd.f32 %v1582_v21, %v1158_v1  ;;  %v1179_v38 = vadd.f32 %v6038_v50, %v9468_v57  ;;  %6244 = vmatprep.mubr.msk.bf16.mxu1 %vm743_vm4, %v8354_v47  ;;  %v4003_v42 = vor.u32 %v4002_v39, %v8514_v33  ;;  %v4509_v46 = vrot.slane %v8457_v31, 5  ;;  %v9469_v1 = vld [vmem:[#allocation25_spill] sm:$0xff]  ;;  %v5725_v47 = vld [vmem:[%s6510_s27 + $0xc8] sm:$0x1] }
 0x149   : > { %v1598_v48 = vpop.f32.mrf.mxu0  ;;  %v1170_v5 = vpop.f32.mrf.mxu1  ;;  %v4013_v41 = vrot.slane %v4011_v25, 4  ;;  %v4016_v21 = vrot.slane %v4014_v59, 5  ;;  %v8554_v26 = vrot.slane %v4020_v36, 5  ;;  %v4026_v40 = vrot.slane %v4024_v51, 4  ;;  %v9470_v39 = vld [vmem:[#allocation26_spill] sm:$0xff] }
 0x14a   : > { %v8546_v11 = vadd.f32 %v6072_v23, %v1179_v38  ;;  %v1171_v50 = vadd.f32 %v1170_v5, %v9469_v1  ;;  %v5807_v31 = vcombine.low %v8529_v43, %v8533_v53  ;;  %v8562_v23 = vrot.slane %v4006_v9, 5  ;;  %v8576_v38 = vld [vmem:[%s6510_s27 + $0xd0] sm:$0xf] }
 0x14b   : > { %v6076_v57 = vpop.f32.mrf.mxu0  ;;  %6279 = vmatmul.mubr.msk.bf16.gmra.mxu0 %vm743_vm4, %v5804_v3  ;;  %v6039_v54 = vpop.f32.mrf.mxu1  ;;  %v5791_v56 = vrot.slane %v5775_v14, 9  ;;  %v4516_v3 = vrot.slane %v8506_v35, 5  ;;  %v8569_v36 = vrot.slane %v3993_v22, 4  ;;  %v4512_v60 = vrot.slane %v8512_v4, 5 }
 0x14c   : > { %6282 = vmatprep.mubr.msk.bf16.mxu0 %vm743_vm4, %v5805_v44  ;;  %v8566_v32 = vadd.f32 %v1595_v19, %v1171_v50  ;;  %v1182_v25 = vadd.f32 %v6039_v54, %v9470_v39  ;;  %v8573_v51 = vrot.slane %v4003_v42, 4  ;;  %v4511_v43 = vrot.slane %v4509_v46, 4 }
 0x14d   : > { %v1611_v59 = vpop.f32.mrf.mxu0  ;;  %v1173_v44 = vpop.f32.mrf.mxu1  ;;  %v4017_v53 = vor.u32 %v4016_v21, %v4013_v41  ;;  %v4030_v9 = vshll.u32 %v5725_v47, 16  ;;  %v4027_v5 = vor.u32 %v4026_v40, %v8554_v26  ;;  %v5792_v22 = vrot.slane %v5776_v52, 9  ;;  %v9471_v21 = vld [vmem:[#allocation9_spill] sm:$0xff] }
 0x14e   : > { %v8578_v14 = vadd.f32 %v6073_v37, %v1182_v25  ;;  %v1174_v35 = vadd.f32 %v1173_v44, %v8290_v13  ;;  %v4518_v4 = vrot.slane %v4516_v3, 4  ;;  %v4519_v42 = vrot.slane %v5725_v47, 5  ;;  %v9472_v44 = vld [vmem:[#allocation7_spill] sm:$0xff] }
 0x14f   : > { %v6077_v19 = vpop.f32.mrf.mxu0  ;;  %v6042_v1 = vpop.f32.mrf.mxu1  ;;  %6245 = vmatmul.mubr.msk.bf16.gmra.mxu1 %vm743_vm4, %v8370_v63  ;;  %v4035_v50 = vshrl.u32 %v5726_v55, 16  ;;  %v4038_v54 = vshll.u32 %v5726_v55, 16  ;;  %v4044_v13 = vshll.u32 %v8576_v38, 16  ;;  %v4048_v40 = vshrl.u32 %v8576_v38, 16 }
 0x150   : > { %v8584_v41 = vadd.f32 %v1598_v48, %v1174_v35  ;;  %v1195_v39 = vadd.f32 %v6042_v1, %v9471_v21  ;;  %6248 = vmatprep.mubr.msk.bf16.mxu1 %vm743_vm4, %v8449_v8  ;;  %v4510_v63 = vsel %vm6856_vm8, %v5791_v56, %v4509_v46  ;;  %v4513_v47 = vsel %vm6856_vm8, %v4511_v43, %v4512_v60 }
 0x151   : > { %v1614_v37 = vpop.f32.mrf.mxu0  ;;  %v1186_v52 = vpop.f32.mrf.mxu1  ;;  %v4018_v25 = vrot.slane %v4017_v53, 4  ;;  %v4032_v48 = vrot.slane %v4030_v9, 5  ;;  %v4028_v8 = vrot.slane %v4027_v5, 4  ;;  %v4517_v46 = vsel %vm6856_vm8, %v5792_v22, %v4516_v3 }
 0x152   : > { %v8595_v55 = vadd.f32 %v6076_v57, %v1195_v39  ;;  %v1187_v35 = vadd.f32 %v1186_v52, %v9472_v44  ;;  %v4520_v57 = vsel %vm6856_vm8, %v4518_v4, %v4519_v42  ;;  %v4037_v60 = vrot.slane %v4035_v50, 4  ;;  %v5777_v52 = vld [vmem:[%s6510_s27 + $0xcc] sm:$0xe]  ;;  %v9474_v42 = vld [vmem:[#allocation14_spill] sm:$0xff] }
 0x153   : > { %v6080_v1 = vpop.f32.mrf.mxu0  ;;  %6283 = vmatmul.mubr.msk.bf16.gmra.mxu0 %vm743_vm4, %v5806_v15  ;;  %v6043_v56 = vpop.f32.mrf.mxu1  ;;  %v4040_v43 = vrot.slane %v4038_v54, 5  ;;  %v4523_v53 = vrot.slane %v8576_v38, 5  ;;  %v5728_v15 = vld [vmem:[%s6510_s27 + $0xd4] sm:$0x1]  ;;  %v4046_v5 = vrot.slane %v4044_v13, 5  ;;  %v4050_v39 = vrot.slane %v4048_v40, 4 }
 0x154   : > { %6286 = vmatprep.mubr.msk.bf16.mxu0 %vm743_vm4, %v5807_v31  ;;  %v8608_v9 = vadd.f32 %v1611_v59, %v1187_v35  ;;  %v1198_v7 = vadd.f32 %v6043_v56, %v9473_v18  ;;  %v3999_v31 = vsel %vm6561_vm5, %v8569_v36, %v8514_v33  ;;  %v4009_v38 = vsel %vm6561_vm5, %v8573_v51, %v8562_v23 }
 0x155   : > { %v1627_v21 = vpop.f32.mrf.mxu0  ;;  %v1189_v3 = vpop.f32.mrf.mxu1  ;;  %v5808_v59 = vcombine.low %v4510_v63, %v4513_v47  ;;  %v4023_v22 = vsel %vm6561_vm5, %v4018_v25, %v8554_v26  ;;  %v4033_v13 = vsel %vm6561_vm5, %v4028_v8, %v4032_v48  ;;  %v5809_v40 = vcombine.low %v4517_v46, %v4520_v57  ;;  %v9475_v26 = vld [vmem:[#allocation15_spill] sm:$0xff] }
 0x156   : > { %v8624_v4 = vadd.f32 %v6077_v19, %v1198_v7  ;;  %v1190_v50 = vadd.f32 %v1189_v3, %v9474_v42  ;;  %v4054_v36 = vshll.u32 %v5728_v15, 16  ;;  %v5793_v23 = vrot.slane %v5777_v52, 9  ;;  %v9476_v46 = vld [vmem:[#allocation11_spill] sm:$0xff] }
 0x157   : > { %v6081_v54 = vpop.f32.mrf.mxu0  ;;  %v6046_v33 = vpop.f32.mrf.mxu1  ;;  %6249 = vmatmul.mubr.msk.bf16.gmra.mxu1 %vm743_vm4, %v8525_v61  ;;  %v4525_v51 = vrot.slane %v4523_v53, 4  ;;  %v4526_v63 = vrot.slane %v5728_v15, 5  ;;  %v4041_v44 = vor.u32 %v4040_v43, %v4037_v60  ;;  %v4051_v35 = vor.u32 %v4050_v39, %v4046_v5 }
 0x158   : > { %v8631_v47 = vadd.f32 %v1614_v37, %v1190_v50  ;;  %v1211_v19 = vadd.f32 %v6046_v33, %v9475_v26  ;;  %6252 = vmatprep.mubr.msk.bf16.mxu1 %vm743_vm4, %v8541_v30  ;;  %v5743_v57 = vcombine.low %v3999_v31, %v4009_v38  ;;  %v5744_v37 = vcombine.low %v4023_v22, %v4033_v13 }
 0x159   : > { %v1630_v25 = vpop.f32.mrf.mxu0  ;;  %v1202_v48 = vpop.f32.mrf.mxu1  ;;  %v4056_v7 = vrot.slane %v4054_v36, 5  ;;  %v4524_v15 = vsel %vm6856_vm8, %v5793_v23, %v4523_v53  ;;  %v4527_v30 = vsel %vm6856_vm8, %v4525_v51, %v4526_v63  ;;  %v4042_v52 = vrot.slane %v4041_v44, 4  ;;  %v9480_v51 = vld [vmem:[#allocation21_spill] sm:$0xff] }
 0x15a   : > { %v8636_v8 = vadd.f32 %v6080_v1, %v1211_v19  ;;  %v1203_v56 = vadd.f32 %v1202_v48, %v9476_v46  ;;  %v9477_v1 = vld [vmem:[#allocation17_spill] sm:$0xff]  ;;  %v4052_v3 = vrot.slane %v4051_v35, 4  ;;  %v5810_v50 = vcombine.low %v4524_v15, %v4527_v30  ;;  %v9481_v35 = vld [vmem:[#allocation22_spill] sm:$0xff] }
 0x15b   : > { %v6084_v61 = vpop.f32.mrf.mxu0  ;;  %6287 = vmatmul.mubr.msk.bf16.gmra.mxu0 %vm743_vm4, %v5808_v59  ;;  %v6047_v18 = vpop.f32.mrf.mxu1  ;;  %v9478_v59 = vld [vmem:[#allocation19_spill] sm:$0xff]  ;;  %v4047_v33 = vsel %vm6561_vm5, %v4042_v52, %v4046_v5 }
 0x15c   : > { %6290 = vmatprep.mubr.msk.bf16.mxu0 %vm743_vm4, %v5809_v40  ;;  %v8645_v60 = vadd.f32 %v1627_v21, %v1203_v56  ;;  %v1214_v43 = vadd.f32 %v6047_v18, %v9477_v1 }
 0x15d   : > { %v1643_v39 = vpop.f32.mrf.mxu0  ;;  %v1205_v31 = vpop.f32.mrf.mxu1 }
 0x15e   : > { %v8648_v38 = vadd.f32 %v6081_v54, %v1214_v43  ;;  %v1206_v22 = vadd.f32 %v1205_v31, %v9478_v59  ;;  %v4057_v54 = vsel %vm6561_vm5, %v4052_v3, %v4056_v7 }
 0x15f   : > { %v6085_v42 = vpop.f32.mrf.mxu0  ;;  %v6050_v13 = vpop.f32.mrf.mxu1  ;;  %6253 = vmatmul.mubr.msk.bf16.gmra.mxu1 %vm743_vm4, %v5743_v57 }
 0x160   : > { %v8652_v53 = vadd.f32 %v1630_v25, %v1206_v22  ;;  %v1227_v21 = vadd.f32 %v6050_v13, %v9479_v58  ;;  %6256 = vmatprep.mubr.msk.bf16.mxu1 %vm743_vm4, %v5744_v37  ;;  %v5745_v25 = vcombine.low %v4047_v33, %v4057_v54 }
 0x161   : > { %v1646_v40 = vpop.f32.mrf.mxu0  ;;  %v1218_v36 = vpop.f32.mrf.mxu1 }
 0x162   : > { %v8660_v23 = vadd.f32 %v6084_v61, %v1227_v21  ;;  %v1219_v63 = vadd.f32 %v1218_v36, %v9480_v51 }
 0x163   : > { %v6088_v26 = vpop.f32.mrf.mxu0  ;;  %6291 = vmatmul.mubr.msk.bf16.gmra.mxu0 %vm743_vm4, %v5810_v50  ;;  %v6051_v19 = vpop.f32.mrf.mxu1 }
 0x164   : > { %v8664_v44 = vadd.f32 %v1643_v39, %v1219_v63  ;;  %v1230_v48 = vadd.f32 %v6051_v19, %v9481_v35  ;;  %v9483_v63 = vld [vmem:[#allocation12_spill] sm:$0xff] }
 0x165   : > { %v1659_v46 = vpop.f32.mrf.mxu0  ;;  %v1221_v56 = vpop.f32.mrf.mxu1 }
 0x166   : > { %v8667_v5 = vadd.f32 %v6085_v42, %v1230_v48  ;;  %v1222_v57 = vadd.f32 %v1221_v56, %v9482_v27 }
 0x167   : > { %v6089_v18 = vpop.f32.mrf.mxu0  ;;  %v6054_v61 = vpop.f32.mrf.mxu1  ;;  %6257 = vmatmul.mubr.msk.bf16.gmra.mxu1 %vm743_vm4, %v5745_v25 }
 0x168   : > { %v8671_v37 = vadd.f32 %v1646_v40, %v1222_v57  ;;  %v1243_v7 = vadd.f32 %v6054_v61, %v8282_v45 }
 0x169   : > { %v1662_v15 = vpop.f32.mrf.mxu0  ;;  %v1234_v30 = vpop.f32.mrf.mxu1 }
 0x16a   : > { %v8674_v1 = vadd.f32 %v6088_v26, %v1243_v7  ;;  %v1235_v43 = vadd.f32 %v1234_v30, %v8296_v62 }
 0x16b   : > { %v6128_v39 = vpop.f32.mrf.mxu0  ;;  %v6055_v52 = vpop.f32.mrf.mxu1 }
 0x16c   : > { %v8677_v3 = vadd.f32 %v1659_v46, %v1235_v43  ;;  %v1246_v31 = vadd.f32 %v6055_v52, %v8319_v2 }
 0x16d   : > { %v2635_v59 = vpop.f32.mrf.mxu0  ;;  %v1237_v22 = vpop.f32.mrf.mxu1 }
 0x16e   : > { %v8680_v42 = vadd.f32 %v6089_v18, %v1246_v31  ;;  %v1238_v50 = vadd.f32 %v1237_v22, %v8334_v29 }
 0x16f   : > { %v6129_v13 = vpop.f32.mrf.mxu0  ;;  %v6094_v45 = vpop.f32.mrf.mxu1 }
 0x170   : > { %v8683_v58 = vadd.f32 %v1662_v15, %v1238_v50  ;;  %v2038_v21 = vadd.f32 %v6094_v45, %v8376_v0 }
 0x171   : > { %v2638_v40 = vpop.f32.mrf.mxu0  ;;  %v1909_v62 = vpop.f32.mrf.mxu1 }
 0x172   : > { %v8686_v33 = vadd.f32 %v6128_v39, %v2038_v21  ;;  %v2036_v54 = vadd.f32 %v1909_v62, %v8391_v34 }
 0x173   : > { %v6132_v36 = vpop.f32.mrf.mxu0  ;;  %v6095_v2 = vpop.f32.mrf.mxu1 }
 0x174   : > { %v8689_v51 = vadd.f32 %v2635_v59, %v2036_v54  ;;  %v2039_v26 = vadd.f32 %v6095_v2, %v9483_v63 }
 0x175   : > { %v2651_v19 = vpop.f32.mrf.mxu0  ;;  %v1912_v29 = vpop.f32.mrf.mxu1 }
 0x176   : > { %v8692_v25 = vadd.f32 %v6129_v13, %v2039_v26  ;;  %v2037_v35 = vadd.f32 %v1912_v29, %v8413_v12 }
 0x177   : > { %v6133_v48 = vpop.f32.mrf.mxu0  ;;  %v6098_v0 = vpop.f32.mrf.mxu1 }
 0x178   : > { %v8695_v46 = vadd.f32 %v2638_v40, %v2037_v35  ;;  %v2042_v56 = vadd.f32 %v6098_v0, %v8428_v20 }
 0x179   : > { %v2654_v27 = vpop.f32.mrf.mxu0  ;;  %v1925_v34 = vpop.f32.mrf.mxu1 }
 0x17a   : > { %v8698_v57 = vadd.f32 %v6132_v36, %v2042_v56  ;;  %v2040_v18 = vadd.f32 %v1925_v34, %v8446_v10 }
 0x17b   : > { %v6136_v61 = vpop.f32.mrf.mxu0  ;;  %v6099_v7 = vpop.f32.mrf.mxu1 }
 0x17c   : > { %v8701_v15 = vadd.f32 %v2651_v19, %v2040_v18  ;;  %v2043_v30 = vadd.f32 %v6099_v7, %v8459_v16 }
 0x17d   : > { %v2667_v43 = vpop.f32.mrf.mxu0  ;;  %v1928_v12 = vpop.f32.mrf.mxu1 }
 0x17e   : > { %v8704_v39 = vadd.f32 %v6133_v48, %v2043_v30  ;;  %v2041_v52 = vadd.f32 %v1928_v12, %v8478_v49 }
 0x17f   : > { %v6137_v31 = vpop.f32.mrf.mxu0  ;;  %v6102_v20 = vpop.f32.mrf.mxu1 }
 0x180   : > { %v8707_v59 = vadd.f32 %v2654_v27, %v2041_v52  ;;  %v2046_v22 = vadd.f32 %v6102_v20, %v8487_v28 }
 0x181   : > { %v2670_v50 = vpop.f32.mrf.mxu0  ;;  %v1941_v10 = vpop.f32.mrf.mxu1 }
 0x182   : > { %v8710_v13 = vadd.f32 %v6136_v61, %v2046_v22  ;;  %v2044_v45 = vadd.f32 %v1941_v10, %v8508_v24 }
 0x183   : > { %v6140_v21 = vpop.f32.mrf.mxu0  ;;  %v6103_v16 = vpop.f32.mrf.mxu1 }
 0x184   : > { %v8713_v40 = vadd.f32 %v2667_v43, %v2044_v45  ;;  %v2047_v62 = vadd.f32 %v6103_v16, %v8518_v17 }
 0x185   : > { %v2683_v54 = vpop.f32.mrf.mxu0  ;;  %v1944_v49 = vpop.f32.mrf.mxu1 }
 0x186   : > { %v8716_v36 = vadd.f32 %v6137_v31, %v2047_v62  ;;  %v2045_v2 = vadd.f32 %v1944_v49, %v8536_v6 }
 0x187   : > { %v6141_v63 = vpop.f32.mrf.mxu0  ;;  %v6106_v28 = vpop.f32.mrf.mxu1 }
 0x188   : > { %v8719_v26 = vadd.f32 %v2670_v50, %v2045_v2  ;;  %v2050_v19 = vadd.f32 %v6106_v28, %v8546_v11 }
 0x189   : > { %v2686_v29 = vpop.f32.mrf.mxu0  ;;  %v1957_v24 = vpop.f32.mrf.mxu1 }
 0x18a   : > { %v8722_v35 = vadd.f32 %v6140_v21, %v2050_v19  ;;  %v2048_v48 = vadd.f32 %v1957_v24, %v8566_v32 }
 0x18b   : > { %v6144_v0 = vpop.f32.mrf.mxu0  ;;  %v6107_v17 = vpop.f32.mrf.mxu1 }
 0x18c   : > { %v8725_v56 = vadd.f32 %v2683_v54, %v2048_v48  ;;  %v2051_v27 = vadd.f32 %v6107_v17, %v8578_v14 }
 0x18d   : > { %v2699_v34 = vpop.f32.mrf.mxu0  ;;  %v1960_v6 = vpop.f32.mrf.mxu1 }
 0x18e   : > { %v8728_v18 = vadd.f32 %v6141_v63, %v2051_v27  ;;  %v2049_v61 = vadd.f32 %v1960_v6, %v8584_v41 }
 0x18f   : > { %v6145_v7 = vpop.f32.mrf.mxu0  ;;  %v6110_v11 = vpop.f32.mrf.mxu1 }
 0x190   : > { %v8731_v30 = vadd.f32 %v2686_v29, %v2049_v61  ;;  %v2054_v43 = vadd.f32 %v6110_v11, %v8595_v55 }
 0x191   : > { %v2702_v12 = vpop.f32.mrf.mxu0  ;;  %v1973_v32 = vpop.f32.mrf.mxu1 }
 0x192   : > { %v8734_v52 = vadd.f32 %v6144_v0, %v2054_v43  ;;  %v2052_v31 = vadd.f32 %v1973_v32, %v8608_v9 }
 0x193   : > { %v6148_v20 = vpop.f32.mrf.mxu0  ;;  %v6111_v14 = vpop.f32.mrf.mxu1 }
 0x194   : > { %v8737_v22 = vadd.f32 %v2699_v34, %v2052_v31  ;;  %v2055_v50 = vadd.f32 %v6111_v14, %v8624_v4 }
 0x195   : > { %v2715_v10 = vpop.f32.mrf.mxu0  ;;  %v1976_v41 = vpop.f32.mrf.mxu1 }
 0x196   : > { %v8740_v45 = vadd.f32 %v6145_v7, %v2055_v50  ;;  %v2053_v21 = vadd.f32 %v1976_v41, %v8631_v47 }
 0x197   : > { %v6149_v16 = vpop.f32.mrf.mxu0  ;;  %v6114_v55 = vpop.f32.mrf.mxu1 }
 0x198   : > { %v8743_v62 = vadd.f32 %v2702_v12, %v2053_v21  ;;  %v2058_v54 = vadd.f32 %v6114_v55, %v8636_v8 }
 0x199   : > { %v2718_v49 = vpop.f32.mrf.mxu0  ;;  %v1989_v9 = vpop.f32.mrf.mxu1 }
 0x19a   : > { %v8746_v2 = vadd.f32 %v6148_v20, %v2058_v54  ;;  %v2056_v63 = vadd.f32 %v1989_v9, %v8645_v60 }
 0x19b   : > { %v6152_v28 = vpop.f32.mrf.mxu0  ;;  %v6115_v4 = vpop.f32.mrf.mxu1 }
 0x19c   : > { %v8749_v19 = vadd.f32 %v2715_v10, %v2056_v63  ;;  %v2059_v29 = vadd.f32 %v6115_v4, %v8648_v38 }
 0x19d   : > { %v2731_v24 = vpop.f32.mrf.mxu0  ;;  %v1992_v47 = vpop.f32.mrf.mxu1 }
 0x19e   : > { %v8752_v48 = vadd.f32 %v6149_v16, %v2059_v29  ;;  %v2057_v0 = vadd.f32 %v1992_v47, %v8652_v53 }
 0x19f   : > { %v6153_v17 = vpop.f32.mrf.mxu0  ;;  %v6118_v8 = vpop.f32.mrf.mxu1 }
 0x1a0   : > { %v8755_v27 = vadd.f32 %v2718_v49, %v2057_v0  ;;  %v2062_v34 = vadd.f32 %v6118_v8, %v8660_v23 }
 0x1a1   : > { %v2734_v6 = vpop.f32.mrf.mxu0  ;;  %v2005_v60 = vpop.f32.mrf.mxu1 }
 0x1a2   : > { %v8758_v61 = vadd.f32 %v6152_v28, %v2062_v34  ;;  %v2060_v7 = vadd.f32 %v2005_v60, %v8664_v44 }
 0x1a3   : > { %v6156_v11 = vpop.f32.mrf.mxu0  ;;  %v6119_v38 = vpop.f32.mrf.mxu1 }
 0x1a4   : > { %v8761_v43 = vadd.f32 %v2731_v24, %v2060_v7  ;;  %v2063_v12 = vadd.f32 %v6119_v38, %v8667_v5 }
 0x1a5   : > { %v2747_v32 = vpop.f32.mrf.mxu0  ;;  %v2008_v53 = vpop.f32.mrf.mxu1 }
 0x1a6   : > { %v8764_v31 = vadd.f32 %v6153_v17, %v2063_v12  ;;  %v2061_v20 = vadd.f32 %v2008_v53, %v8671_v37 }
 0x1a7   : > { %v6157_v14 = vpop.f32.mrf.mxu0  ;;  %v6122_v23 = vpop.f32.mrf.mxu1 }
 0x1a8   : > { %v8767_v50 = vadd.f32 %v2734_v6, %v2061_v20  ;;  %v2066_v10 = vadd.f32 %v6122_v23, %v8674_v1 }
 0x1a9   : > { %v2750_v41 = vpop.f32.mrf.mxu0  ;;  %v2021_v44 = vpop.f32.mrf.mxu1 }
 0x1aa   : > { %v8770_v21 = vadd.f32 %v6156_v11, %v2066_v10  ;;  %v2064_v16 = vadd.f32 %v2021_v44, %v8677_v3 }
 0x1ab   : > { %v6196_v55 = vpop.f32.mrf.mxu0  ;;  %v6123_v5 = vpop.f32.mrf.mxu1 }
 0x1ac   : > { %v8773_v54 = vadd.f32 %v2747_v32, %v2064_v16  ;;  %v2067_v49 = vadd.f32 %v6123_v5, %v8680_v42 }
 0x1ad   : > { %v3467_v9 = vpop.f32.mrf.mxu0  ;;  %v2024_v37 = vpop.f32.mrf.mxu1 }
 0x1ae   : > { %v8776_v63 = vadd.f32 %v6157_v14, %v2067_v49  ;;  %v2065_v28 = vadd.f32 %v2024_v37, %v8683_v58 }
 0x1af   : > { %v6197_v4 = vpop.f32.mrf.mxu0  ;;  %v6162_v1 = vpop.f32.mrf.mxu1 }
 0x1b0   : > { %v8779_v29 = vadd.f32 %v2750_v41, %v2065_v28  ;;  %v3234_v24 = vadd.f32 %v6162_v1, %v8686_v33 }
 0x1b1   : > { %v3470_v47 = vpop.f32.mrf.mxu0  ;;  %v3105_v3 = vpop.f32.mrf.mxu1 }
 0x1b2   : > { %v8782_v0 = vadd.f32 %v6196_v55, %v3234_v24  ;;  %v3232_v17 = vadd.f32 %v3105_v3, %v8689_v51 }
 0x1b3   : > { %v6200_v8 = vpop.f32.mrf.mxu0  ;;  %v6163_v42 = vpop.f32.mrf.mxu1 }
 0x1b4   : > { %v8785_v34 = vadd.f32 %v3467_v9, %v3232_v17  ;;  %v3235_v6 = vadd.f32 %v6163_v42, %v8692_v25 }
 0x1b5   : > { %v3483_v60 = vpop.f32.mrf.mxu0  ;;  %v3108_v58 = vpop.f32.mrf.mxu1 }
 0x1b6   : > { %v8788_v7 = vadd.f32 %v6197_v4, %v3235_v6  ;;  %v3233_v11 = vadd.f32 %v3108_v58, %v8695_v46 }
 0x1b7   : > { %v6201_v38 = vpop.f32.mrf.mxu0  ;;  %v6166_v33 = vpop.f32.mrf.mxu1 }
 0x1b8   : > { %v8791_v12 = vadd.f32 %v3470_v47, %v3233_v11  ;;  %v3238_v32 = vadd.f32 %v6166_v33, %v8698_v57 }
 0x1b9   : > { %v3486_v53 = vpop.f32.mrf.mxu0  ;;  %v3121_v51 = vpop.f32.mrf.mxu1 }
 0x1ba   : > { %v8794_v20 = vadd.f32 %v6200_v8, %v3238_v32  ;;  %v3236_v14 = vadd.f32 %v3121_v51, %v8701_v15 }
 0x1bb   : > { %v6204_v23 = vpop.f32.mrf.mxu0  ;;  %v6167_v25 = vpop.f32.mrf.mxu1 }
 0x1bc   : > { %v8797_v10 = vadd.f32 %v3483_v60, %v3236_v14  ;;  %v3239_v41 = vadd.f32 %v6167_v25, %v8704_v39 }
 0x1bd   : > { %v3499_v44 = vpop.f32.mrf.mxu0  ;;  %v3124_v46 = vpop.f32.mrf.mxu1 }
 0x1be   : > { %v8800_v16 = vadd.f32 %v6201_v38, %v3239_v41  ;;  %v3237_v55 = vadd.f32 %v3124_v46, %v8707_v59 }
 0x1bf   : > { %v6205_v5 = vpop.f32.mrf.mxu0  ;;  %v6170_v57 = vpop.f32.mrf.mxu1 }
 0x1c0   : > { %v8803_v49 = vadd.f32 %v3486_v53, %v3237_v55  ;;  %v3242_v9 = vadd.f32 %v6170_v57, %v8710_v13 }
 0x1c1   : > { %v3502_v37 = vpop.f32.mrf.mxu0  ;;  %v3137_v15 = vpop.f32.mrf.mxu1 }
 0x1c2   : > { %v8806_v28 = vadd.f32 %v6204_v23, %v3242_v9  ;;  %v3240_v4 = vadd.f32 %v3137_v15, %v8713_v40 }
 0x1c3   : > { %v6208_v1 = vpop.f32.mrf.mxu0  ;;  %v6171_v39 = vpop.f32.mrf.mxu1 }
 0x1c4   : > { %v8809_v24 = vadd.f32 %v3499_v44, %v3240_v4  ;;  %v3243_v47 = vadd.f32 %v6171_v39, %v8716_v36 }
 0x1c5   : > { %v3515_v3 = vpop.f32.mrf.mxu0  ;;  %v3140_v59 = vpop.f32.mrf.mxu1 }
 0x1c6   : > { %v8812_v17 = vadd.f32 %v6205_v5, %v3243_v47  ;;  %v3241_v8 = vadd.f32 %v3140_v59, %v8719_v26 }
 0x1c7   : > { %v6209_v42 = vpop.f32.mrf.mxu0  ;;  %v6174_v13 = vpop.f32.mrf.mxu1 }
 0x1c8   : > { %v8815_v6 = vadd.f32 %v3502_v37, %v3241_v8  ;;  %v3246_v60 = vadd.f32 %v6174_v13, %v8722_v35 }
 0x1c9   : > { %v3518_v58 = vpop.f32.mrf.mxu0  ;;  %v3153_v40 = vpop.f32.mrf.mxu1 }
 0x1ca   : > { %v8818_v11 = vadd.f32 %v6208_v1, %v3246_v60  ;;  %v3244_v38 = vadd.f32 %v3153_v40, %v8725_v56 }
 0x1cb   : > { %v6212_v33 = vpop.f32.mrf.mxu0  ;;  %v6175_v36 = vpop.f32.mrf.mxu1 }
 0x1cc   : > { %v8821_v32 = vadd.f32 %v3515_v3, %v3244_v38  ;;  %v3247_v53 = vadd.f32 %v6175_v36, %v8728_v18 }
 0x1cd   : > { %v3531_v51 = vpop.f32.mrf.mxu0  ;;  %v3156_v26 = vpop.f32.mrf.mxu1 }
 0x1ce   : > { %v8824_v14 = vadd.f32 %v6209_v42, %v3247_v53  ;;  %v3245_v23 = vadd.f32 %v3156_v26, %v8731_v30 }
 0x1cf   : > { %v6213_v25 = vpop.f32.mrf.mxu0  ;;  %v6178_v35 = vpop.f32.mrf.mxu1 }
 0x1d0   : > { %v8827_v41 = vadd.f32 %v3518_v58, %v3245_v23  ;;  %v3250_v44 = vadd.f32 %v6178_v35, %v8734_v52 }
 0x1d1   : > { %v3534_v46 = vpop.f32.mrf.mxu0  ;;  %v3169_v56 = vpop.f32.mrf.mxu1 }
 0x1d2   : > { %v8830_v55 = vadd.f32 %v6212_v33, %v3250_v44  ;;  %v3248_v5 = vadd.f32 %v3169_v56, %v8737_v22 }
 0x1d3   : > { %v6216_v57 = vpop.f32.mrf.mxu0  ;;  %v6179_v18 = vpop.f32.mrf.mxu1 }
 0x1d4   : > { %v8833_v9 = vadd.f32 %v3531_v51, %v3248_v5  ;;  %v3251_v37 = vadd.f32 %v6179_v18, %v8740_v45 }
 0x1d5   : > { %v3547_v15 = vpop.f32.mrf.mxu0  ;;  %v3172_v30 = vpop.f32.mrf.mxu1 }
 0x1d6   : > { %v8836_v4 = vadd.f32 %v6213_v25, %v3251_v37  ;;  %v3249_v1 = vadd.f32 %v3172_v30, %v8743_v62 }
 0x1d7   : > { %v6217_v39 = vpop.f32.mrf.mxu0  ;;  %v6182_v52 = vpop.f32.mrf.mxu1 }
 0x1d8   : > { %v8839_v47 = vadd.f32 %v3534_v46, %v3249_v1  ;;  %v3254_v3 = vadd.f32 %v6182_v52, %v8746_v2 }
 0x1d9   : > { %v3550_v59 = vpop.f32.mrf.mxu0  ;;  %v3185_v22 = vpop.f32.mrf.mxu1 }
 0x1da   : > { %v8842_v8 = vadd.f32 %v6216_v57, %v3254_v3  ;;  %v3252_v42 = vadd.f32 %v3185_v22, %v8749_v19 }
 0x1db   : > { %v6220_v13 = vpop.f32.mrf.mxu0  ;;  %v6183_v45 = vpop.f32.mrf.mxu1 }
 0x1dc   : > { %v8845_v60 = vadd.f32 %v3547_v15, %v3252_v42  ;;  %v3255_v58 = vadd.f32 %v6183_v45, %v8752_v48 }
 0x1dd   : > { %v3563_v40 = vpop.f32.mrf.mxu0  ;;  %v3188_v62 = vpop.f32.mrf.mxu1 }
 0x1de   : > { %v8848_v38 = vadd.f32 %v6217_v39, %v3255_v58  ;;  %v3253_v33 = vadd.f32 %v3188_v62, %v8755_v27 }
 0x1df   : > { %v6221_v36 = vpop.f32.mrf.mxu0  ;;  %v6186_v2 = vpop.f32.mrf.mxu1 }
 0x1e0   : > { %v8851_v53 = vadd.f32 %v3550_v59, %v3253_v33  ;;  %v3258_v51 = vadd.f32 %v6186_v2, %v8758_v61 }
 0x1e1   : > { %v3566_v26 = vpop.f32.mrf.mxu0  ;;  %v3201_v19 = vpop.f32.mrf.mxu1 }
 0x1e2   : > { %v8854_v23 = vadd.f32 %v6220_v13, %v3258_v51  ;;  %v3256_v25 = vadd.f32 %v3201_v19, %v8761_v43 }
 0x1e3   : > { %v6224_v35 = vpop.f32.mrf.mxu0  ;;  %v6187_v48 = vpop.f32.mrf.mxu1 }
 0x1e4   : > { %v8857_v44 = vadd.f32 %v3563_v40, %v3256_v25  ;;  %v3259_v46 = vadd.f32 %v6187_v48, %v8764_v31 }
 0x1e5   : > { %v3579_v56 = vpop.f32.mrf.mxu0  ;;  %v3204_v27 = vpop.f32.mrf.mxu1 }
 0x1e6   : > { %v8860_v5 = vadd.f32 %v6221_v36, %v3259_v46  ;;  %v3257_v57 = vadd.f32 %v3204_v27, %v8767_v50 }
 0x1e7   : > { %v8863_v18 = vpop.f32.mrf.mxu0  ;;  %v6190_v61 = vpop.f32.mrf.mxu1 }
 0x1e8   : > { %v8865_v37 = vadd.f32 %v3566_v26, %v3257_v57  ;;  %v3262_v15 = vadd.f32 %v6190_v61, %v8770_v21 }
 0x1e9   : > { %v8868_v43 = vpop.f32.mrf.mxu0  ;;  %v3217_v30 = vpop.f32.mrf.mxu1 }
 0x1ea   : > { %v8870_v1 = vadd.f32 %v6224_v35, %v3262_v15  ;;  %v3260_v31 = vadd.f32 %v3217_v30, %v8773_v54 }
 0x1eb   : > { %v6264_v39 = vpop.f32.mrf.mxu0  ;;  %v8873_v52 = vpop.f32.mrf.mxu1 }
 0x1ec   : > { %v8875_v3 = vadd.f32 %v3579_v56, %v3260_v31 }
 0x1ed   : > { %v4663_v50 = vpop.f32.mrf.mxu0  ;;  %v8877_v59 = vpop.f32.mrf.mxu1 }
 0x1ef   : > { %v6265_v22 = vpop.f32.mrf.mxu0  ;;  %v6230_v42 = vpop.f32.mrf.mxu1 }
 0x1f0   : > { %v4322_v13 = vadd.f32 %v6230_v42, %v8782_v0 }
 0x1f1   : > { %v4666_v21 = vpop.f32.mrf.mxu0  ;;  %v4193_v45 = vpop.f32.mrf.mxu1 }
 0x1f2   : > { %v8880_v58 = vadd.f32 %v6264_v39, %v4322_v13  ;;  %v4320_v40 = vadd.f32 %v4193_v45, %v8785_v34 }
 0x1f3   : > { %v6268_v62 = vpop.f32.mrf.mxu0  ;;  %v6231_v54 = vpop.f32.mrf.mxu1 }
 0x1f4   : > { %v8883_v33 = vadd.f32 %v4663_v50, %v4320_v40  ;;  %v4323_v36 = vadd.f32 %v6231_v54, %v8788_v7 }
 0x1f5   : > { %v4679_v2 = vpop.f32.mrf.mxu0  ;;  %v4196_v51 = vpop.f32.mrf.mxu1 }
 0x1f6   : > { %v8886_v26 = vadd.f32 %v6265_v22, %v4323_v36  ;;  %v4321_v19 = vadd.f32 %v4196_v51, %v8791_v12 }
 0x1f7   : > { %v6269_v25 = vpop.f32.mrf.mxu0  ;;  %v6234_v0 = vpop.f32.mrf.mxu1 }
 0x1f8   : > { %v8889_v35 = vadd.f32 %v4666_v21, %v4321_v19  ;;  %v4326_v48 = vadd.f32 %v6234_v0, %v8794_v20 }
 0x1f9   : > { %v4682_v46 = vpop.f32.mrf.mxu0  ;;  %v4209_v34 = vpop.f32.mrf.mxu1 }
 0x1fa   : > { %v8892_v56 = vadd.f32 %v6268_v62, %v4326_v48  ;;  %v4324_v27 = vadd.f32 %v4209_v34, %v8797_v10 }
 0x1fb   : > { %v6272_v57 = vpop.f32.mrf.mxu0  ;;  %v6235_v7 = vpop.f32.mrf.mxu1 }
 0x1fc   : > { %v8895_v61 = vadd.f32 %v4679_v2, %v4324_v27  ;;  %v4327_v15 = vadd.f32 %v6235_v7, %v8800_v16 }
 0x1fd   : > { %v4695_v30 = vpop.f32.mrf.mxu0  ;;  %v4212_v12 = vpop.f32.mrf.mxu1 }
 0x1fe   : > { %v8898_v31 = vadd.f32 %v6269_v25, %v4327_v15  ;;  %v4325_v39 = vadd.f32 %v4212_v12, %v8803_v49 }
 0x1ff   : > { %v6273_v50 = vpop.f32.mrf.mxu0  ;;  %v6238_v20 = vpop.f32.mrf.mxu1 }
 0x200   : > { %v8901_v22 = vadd.f32 %v4682_v46, %v4325_v39  ;;  %v4330_v42 = vadd.f32 %v6238_v20, %v8806_v28 }
 0x201   : > { %v4698_v13 = vpop.f32.mrf.mxu0  ;;  %v4225_v10 = vpop.f32.mrf.mxu1 }
 0x202   : > { %v8904_v21 = vadd.f32 %v6272_v57, %v4330_v42  ;;  %v4328_v45 = vadd.f32 %v4225_v10, %v8809_v24 }
 0x203   : > { %v6276_v40 = vpop.f32.mrf.mxu0  ;;  %v6239_v16 = vpop.f32.mrf.mxu1 }
 0x204   : > { %v8907_v62 = vadd.f32 %v4695_v30, %v4328_v45  ;;  %v4331_v54 = vadd.f32 %v6239_v16, %v8812_v17 }
 0x205   : > { %v4711_v36 = vpop.f32.mrf.mxu0  ;;  %v4228_v49 = vpop.f32.mrf.mxu1 }
 0x206   : > { %v8910_v2 = vadd.f32 %v6273_v50, %v4331_v54  ;;  %v4329_v51 = vadd.f32 %v4228_v49, %v8815_v6 }
 0x207   : > { %v6277_v19 = vpop.f32.mrf.mxu0  ;;  %v6242_v28 = vpop.f32.mrf.mxu1 }
 0x208   : > { %v8913_v25 = vadd.f32 %v4698_v13, %v4329_v51  ;;  %v4334_v0 = vadd.f32 %v6242_v28, %v8818_v11 }
 0x209   : > { %v4714_v48 = vpop.f32.mrf.mxu0  ;;  %v4241_v24 = vpop.f32.mrf.mxu1 }
 0x20a   : > { %v8916_v46 = vadd.f32 %v6276_v40, %v4334_v0  ;;  %v4332_v34 = vadd.f32 %v4241_v24, %v8821_v32 }
 0x20b   : > { %v6280_v27 = vpop.f32.mrf.mxu0  ;;  %v6243_v17 = vpop.f32.mrf.mxu1 }
 0x20c   : > { %v8919_v57 = vadd.f32 %v4711_v36, %v4332_v34  ;;  %v4335_v7 = vadd.f32 %v6243_v17, %v8824_v14 }
 0x20d   : > { %v4727_v15 = vpop.f32.mrf.mxu0  ;;  %v4244_v6 = vpop.f32.mrf.mxu1 }
 0x20e   : > { %v8922_v30 = vadd.f32 %v6277_v19, %v4335_v7  ;;  %v4333_v12 = vadd.f32 %v4244_v6, %v8827_v41 }
 0x20f   : > { %v6281_v39 = vpop.f32.mrf.mxu0  ;;  %v6246_v11 = vpop.f32.mrf.mxu1 }
 0x210   : > { %v8925_v50 = vadd.f32 %v4714_v48, %v4333_v12  ;;  %v4338_v20 = vadd.f32 %v6246_v11, %v8830_v55 }
 0x211   : > { %v4730_v42 = vpop.f32.mrf.mxu0  ;;  %v4257_v32 = vpop.f32.mrf.mxu1 }
 0x212   : > { %v8928_v13 = vadd.f32 %v6280_v27, %v4338_v20  ;;  %v4336_v10 = vadd.f32 %v4257_v32, %v8833_v9 }
 0x213   : > { %v6284_v45 = vpop.f32.mrf.mxu0  ;;  %v6247_v14 = vpop.f32.mrf.mxu1 }
 0x214   : > { %v8931_v40 = vadd.f32 %v4727_v15, %v4336_v10  ;;  %v4339_v16 = vadd.f32 %v6247_v14, %v8836_v4 }
 0x215   : > { %v4743_v54 = vpop.f32.mrf.mxu0  ;;  %v4260_v41 = vpop.f32.mrf.mxu1 }
 0x216   : > { %v8934_v36 = vadd.f32 %v6281_v39, %v4339_v16  ;;  %v4337_v49 = vadd.f32 %v4260_v41, %v8839_v47 }
 0x217   : > { %v6285_v51 = vpop.f32.mrf.mxu0  ;;  %v6250_v55 = vpop.f32.mrf.mxu1 }
 0x218   : > { %v8937_v19 = vadd.f32 %v4730_v42, %v4337_v49  ;;  %v4342_v28 = vadd.f32 %v6250_v55, %v8842_v8 }
 0x219   : > { %v4746_v0 = vpop.f32.mrf.mxu0  ;;  %v4273_v9 = vpop.f32.mrf.mxu1 }
 0x21a   : > { %v8940_v48 = vadd.f32 %v6284_v45, %v4342_v28  ;;  %v4340_v24 = vadd.f32 %v4273_v9, %v8845_v60 }
 0x21b   : > { %v6288_v34 = vpop.f32.mrf.mxu0  ;;  %v6251_v4 = vpop.f32.mrf.mxu1 }
 0x21c   : > { %v8943_v27 = vadd.f32 %v4743_v54, %v4340_v24  ;;  %v4343_v17 = vadd.f32 %v6251_v4, %v8848_v38 }
 0x21d   : > { %v4759_v7 = vpop.f32.mrf.mxu0  ;;  %v4276_v47 = vpop.f32.mrf.mxu1 }
 0x21e   : > { %v8946_v15 = vadd.f32 %v6285_v51, %v4343_v17  ;;  %v4341_v6 = vadd.f32 %v4276_v47, %v8851_v53  ;;  %v3263_v53 = vadd.f32 %v8873_v52, %v8776_v63  ;;  %v3261_v51 = vadd.f32 %v8877_v59, %v8779_v29 }
 0x21f   : > { %v6289_v12 = vpop.f32.mrf.mxu0  ;;  %v6254_v8 = vpop.f32.mrf.mxu1 }
 0x220   : > { %v8949_v39 = vadd.f32 %v4746_v0, %v4341_v6  ;;  %v4346_v11 = vadd.f32 %v6254_v8, %v8854_v23 }
 0x221   : > { %v4762_v20 = vpop.f32.mrf.mxu0  ;;  %v4289_v60 = vpop.f32.mrf.mxu1 }
 0x222   : > { %v8952_v42 = vadd.f32 %v6288_v34, %v4346_v11  ;;  %v4344_v32 = vadd.f32 %v4289_v60, %v8857_v44 }
 0x223   : > { %v6255_v10 = vpop.f32.mrf.mxu1  ;;  %v6292_v38 = vpop.f32.mrf.mxu0 }
 0x224   : > { %v8955_v45 = vadd.f32 %v4759_v7, %v4344_v32  ;;  %v4347_v14 = vadd.f32 %v6255_v10, %v8860_v5  ;;  %v3625_v5 = vadd.f32 %v8863_v18, %v3263_v53 }
 0x225   : > { %v4292_v16 = vpop.f32.mrf.mxu1  ;;  %v4775_v49 = vpop.f32.mrf.mxu0 }
 0x226   : > { %v8960_v54 = vadd.f32 %v6289_v12, %v4347_v14  ;;  %v4345_v23 = vadd.f32 %v4292_v16, %v8865_v37  ;;  %v3623_v37 = vadd.f32 %v8868_v43, %v3261_v51 }
 0x227   : > { %v6258_v41 = vpop.f32.mrf.mxu1  ;;  %v6293_v9 = vpop.f32.mrf.mxu0 }
 0x228   : > { %v8965_v44 = vadd.f32 %v4762_v20, %v4345_v23  ;;  %v4350_v55 = vadd.f32 %v6258_v41, %v8870_v1 }
 0x229   : > { %v4305_v28 = vpop.f32.mrf.mxu1  ;;  %v4778_v17 = vpop.f32.mrf.mxu0 }
 0x22a   : > { %v8969_v0 = vadd.f32 %v6292_v38, %v4350_v55  ;;  %v4348_v63 = vadd.f32 %v4305_v28, %v8875_v3 }
 0x22b   : > { %v6259_v52 = vpop.f32.mrf.mxu1 }
 0x22c   : > { %v8973_v24 = vadd.f32 %v4775_v49, %v4348_v63  ;;  %v4351_v34 = vadd.f32 %v6259_v52, %v3625_v5  ;;  %4824 = sbr.rel (%p5827_p10) target bundleno = 648 (0x288), region = 44 }
 0x22d   : > { %v4308_v4 = vpop.f32.mrf.mxu1 }
 0x22e   : > { %v8975_v29 = vadd.f32 %v6293_v9, %v4351_v34  ;;  %v4349_v59 = vadd.f32 %v4308_v4, %v3623_v37 }
 0x230   : > { %v8977_v1 = vadd.f32 %v4778_v17, %v4349_v59 }
 0x231   : > { %vm4825_vm9 = vcmask 64512   ;;  %v4895_v53 = vmul.f32 %v8883_v33, %v8883_v33  ;;  %v4896_v23 = vmul.f32 %v8889_v35, %v8889_v35  ;;  %v4897_v49 = vmul.f32 %v8880_v58, %v8880_v58 }
 0x232   : > { %v4826_v18 = vsel %vm4825_vm9, %v8883_v33, 0.0  ;;  %v4827_v43 = vsel %vm4825_vm9, %v8889_v35, 0.0  ;;  %v4829_v3 = vsel %vm4825_vm9, %v8880_v58, 0.0  ;;  %v4831_v47 = vsel %vm4825_vm9, %v8886_v26, 0.0 }
 0x233   : > { %v4828_v7 = vadd.f32 %v4827_v43, %v4826_v18  ;;  %v4833_v12 = vsel %vm4825_vm9, %v8895_v61, 0.0  ;;  %v4835_v11 = vsel %vm4825_vm9, %v8901_v22, 0.0  ;;  %v4837_v60 = vsel %vm4825_vm9, %v8892_v56, 0.0 }
 0x234   : > { %v4839_v10 = vsel %vm4825_vm9, %v8898_v31, 0.0  ;;  %v4841_v14 = vsel %vm4825_vm9, %v8907_v62, 0.0  ;;  %v4843_v41 = vsel %vm4825_vm9, %v8913_v25, 0.0  ;;  %v4898_v55 = vmul.f32 %v8886_v26, %v8886_v26 }
 0x235   : > { %v4830_v6 = vadd.f32 %v4829_v3, %v4828_v7  ;;  %v4845_v28 = vsel %vm4825_vm9, %v8904_v21, 0.0  ;;  %v4899_v63 = vmul.f32 %v8895_v61, %v8895_v61  ;;  %v4927_v52 = vsel %vm4825_vm9, %v4895_v53, 0.0 }
 0x236   : > { %v4928_v9 = vsel %vm4825_vm9, %v4896_v23, 0.0  ;;  %v4847_v37 = vsel %vm4825_vm9, %v8910_v2, 0.0  ;;  %v4930_v4 = vsel %vm4825_vm9, %v4897_v49, 0.0  ;;  %v4900_v17 = vmul.f32 %v8901_v22, %v8901_v22 }
 0x237   : > { %v4832_v8 = vadd.f32 %v4831_v47, %v4830_v6  ;;  %v4929_v34 = vadd.f32 %v4928_v9, %v4927_v52  ;;  %v4932_v18 = vsel %vm4825_vm9, %v4898_v55, 0.0  ;;  %v4849_v43 = vsel %vm4825_vm9, %v8919_v57, 0.0 }
 0x238   : > { %v4901_v47 = vmul.f32 %v8892_v56, %v8892_v56  ;;  %v4934_v6 = vsel %vm4825_vm9, %v4899_v63, 0.0  ;;  %v4855_v53 = vsel %vm4825_vm9, %v8922_v30, 0.0  ;;  %v4904_v49 = vmul.f32 %v8913_v25, %v8913_v25 }
 0x239   : > { %v4834_v20 = vadd.f32 %v4833_v12, %v4832_v8  ;;  %v4931_v3 = vadd.f32 %v4930_v4, %v4929_v34  ;;  %v4851_v12 = vsel %vm4825_vm9, %v8925_v50, 0.0  ;;  %v4857_v55 = vsel %vm4825_vm9, %v8931_v40, 0.0 }
 0x23a   : > { %v4905_v63 = vmul.f32 %v8904_v21, %v8904_v21  ;;  %v4859_v9 = vsel %vm4825_vm9, %v8937_v19, 0.0  ;;  %v4906_v4 = vmul.f32 %v8910_v2, %v8910_v2  ;;  %vm4998_vm10 = vcmask 57344  }
 0x23b   : > { %v4836_v32 = vadd.f32 %v4835_v11, %v4834_v20  ;;  %v4933_v8 = vadd.f32 %v4932_v18, %v4931_v3  ;;  %v4902_v20 = vmul.f32 %v8898_v31, %v8898_v31  ;;  %v4907_v3 = vmul.f32 %v8919_v57, %v8919_v57 }
 0x23d   : > { %v4838_v38 = vadd.f32 %v4837_v60, %v4836_v32  ;;  %v4936_v60 = vsel %vm4825_vm9, %v4900_v17, 0.0  ;;  %v4853_v32 = vsel %vm4825_vm9, %v8916_v46, 0.0  ;;  %v4861_v17 = vsel %vm4825_vm9, %v8928_v13, 0.0 }
 0x23f   : > { %v4840_v16 = vadd.f32 %v4839_v10, %v4838_v38  ;;  %v4935_v10 = vadd.f32 %v4934_v6, %v4933_v8  ;;  %v4908_v8 = vmul.f32 %v8925_v50, %v8925_v50 }
 0x241   : > { %v4842_v51 = vadd.f32 %v4841_v14, %v4840_v16  ;;  %v4903_v14 = vmul.f32 %v8907_v62, %v8907_v62  ;;  %v4938_v16 = vsel %vm4825_vm9, %v4901_v47, 0.0  ;;  %v4937_v23 = vadd.f32 %v4936_v60, %v4935_v10 }
 0x242   : > { %v4863_v47 = vsel %vm4825_vm9, %v8934_v36, 0.0  ;;  %v4909_v10 = vmul.f32 %v8916_v46, %v8916_v46 }
 0x243   : > { %v4844_v5 = vadd.f32 %v4843_v41, %v4842_v51  ;;  %v4940_v51 = vsel %vm4825_vm9, %v4902_v20, 0.0  ;;  %v4942_v52 = vsel %vm4825_vm9, %v4903_v14, 0.0  ;;  %v4865_v20 = vsel %vm4825_vm9, %v8943_v27, 0.0 }
 0x244   : > { %v4867_v14 = vsel %vm4825_vm9, %v8949_v39, 0.0 }
 0x245   : > { %v4846_v59 = vadd.f32 %v4845_v28, %v4844_v5  ;;  %v4939_v28 = vadd.f32 %v4938_v16, %v4937_v23  ;;  %v4910_v23 = vmul.f32 %v8922_v30, %v8922_v30 }
 0x247   : > { %v4848_v7 = vadd.f32 %v4847_v37, %v4846_v59  ;;  %v4941_v37 = vadd.f32 %v4940_v51, %v4939_v28  ;;  %v4944_v59 = vsel %vm4825_vm9, %v4904_v49, 0.0  ;;  %v4869_v49 = vsel %vm4825_vm9, %v8940_v48, 0.0 }
 0x248   : > { %v4911_v28 = vmul.f32 %v8931_v40, %v8931_v40 }
 0x249   : > { %v4850_v11 = vadd.f32 %v4849_v43, %v4848_v7  ;;  %v4943_v18 = vadd.f32 %v4942_v52, %v4941_v37  ;;  %v4946_v7 = vsel %vm4825_vm9, %v4905_v63, 0.0  ;;  %v4871_v63 = vsel %vm4825_vm9, %v8946_v15, 0.0 }
 0x24a   : > { %v4912_v37 = vmul.f32 %v8937_v19, %v8937_v19 }
 0x24b   : > { %v4852_v38 = vadd.f32 %v4851_v12, %v4850_v11  ;;  %v4945_v6 = vadd.f32 %v4944_v59, %v4943_v18  ;;  %v4948_v11 = vsel %vm4825_vm9, %v4906_v4, 0.0  ;;  %v4873_v4 = vsel %vm4825_vm9, %v8955_v45, 0.0 }
 0x24c   : > { %v4913_v18 = vmul.f32 %v8928_v13, %v8928_v13 }
 0x24d   : > { %v4854_v41 = vadd.f32 %v4853_v32, %v4852_v38  ;;  %v4947_v60 = vadd.f32 %v4946_v7, %v4945_v6  ;;  %v4950_v38 = vsel %vm4825_vm9, %v4907_v3, 0.0  ;;  %v4875_v3 = vsel %vm4825_vm9, %v8965_v44, 0.0 }
 0x24e   : > { %v4914_v6 = vmul.f32 %v8934_v36, %v8934_v36 }
 0x24f   : > { %v4856_v5 = vadd.f32 %v4855_v53, %v4854_v41  ;;  %v4949_v16 = vadd.f32 %v4948_v11, %v4947_v60  ;;  %v4952_v41 = vsel %vm4825_vm9, %v4908_v8, 0.0  ;;  %v4877_v8 = vsel %vm4825_vm9, %v8952_v42, 0.0 }
 0x250   : > { %v4915_v60 = vmul.f32 %v8943_v27, %v8943_v27 }
 0x251   : > { %v4858_v34 = vadd.f32 %v4857_v55, %v4856_v5  ;;  %v4951_v51 = vadd.f32 %v4950_v38, %v4949_v16  ;;  %v4954_v5 = vsel %vm4825_vm9, %v4909_v10, 0.0  ;;  %v4879_v10 = vsel %vm4825_vm9, %v8960_v54, 0.0 }
 0x252   : > { %v4916_v16 = vmul.f32 %v8949_v39, %v8949_v39 }
 0x253   : > { %v4860_v43 = vadd.f32 %v4859_v9, %v4858_v34  ;;  %v4953_v52 = vadd.f32 %v4952_v41, %v4951_v51  ;;  %v4956_v34 = vsel %vm4825_vm9, %v4910_v23, 0.0  ;;  %v4881_v23 = vsel %vm4825_vm9, %v8973_v24, 0.0 }
 0x254   : > { %v4917_v51 = vmul.f32 %v8940_v48, %v8940_v48 }
 0x255   : > { %v4862_v12 = vadd.f32 %v4861_v17, %v4860_v43  ;;  %v4955_v59 = vadd.f32 %v4954_v5, %v4953_v52  ;;  %v4958_v43 = vsel %vm4825_vm9, %v4911_v28, 0.0  ;;  %v4883_v28 = vsel %vm4825_vm9, %v8977_v1, 0.0 }
 0x256   : > { %v4918_v52 = vmul.f32 %v8946_v15, %v8946_v15 }
 0x257   : > { %v4864_v32 = vadd.f32 %v4863_v47, %v4862_v12  ;;  %v4957_v7 = vadd.f32 %v4956_v34, %v4955_v59  ;;  %v4960_v12 = vsel %vm4825_vm9, %v4912_v37, 0.0  ;;  %v4885_v37 = vsel %vm4825_vm9, %v8969_v0, 0.0 }
 0x258   : > { %v4919_v59 = vmul.f32 %v8955_v45, %v8955_v45 }
 0x259   : > { %v4866_v53 = vadd.f32 %v4865_v20, %v4864_v32  ;;  %v4959_v11 = vadd.f32 %v4958_v43, %v4957_v7  ;;  %v4962_v32 = vsel %vm4825_vm9, %v4913_v18, 0.0  ;;  %v4887_v18 = vsel %vm4825_vm9, %v8975_v29, 0.0 }
 0x25a   : > { %v4920_v7 = vmul.f32 %v8965_v44, %v8965_v44 }
 0x25b   : > { %v4868_v55 = vadd.f32 %v4867_v14, %v4866_v53  ;;  %v4961_v38 = vadd.f32 %v4960_v12, %v4959_v11  ;;  %v4964_v53 = vsel %vm4825_vm9, %v4914_v6, 0.0  ;;  %v4974_v11 = vsel %vm4825_vm9, %v4919_v59, 0.0  ;;  %v4996_v59 = vld [vmem:[#allocation2] sm:$0x1] }
 0x25d   : > { %v4870_v9 = vadd.f32 %v4869_v49, %v4868_v55  ;;  %v4963_v41 = vadd.f32 %v4962_v32, %v4961_v38  ;;  %v4966_v55 = vsel %vm4825_vm9, %v4915_v60, 0.0  ;;  %v4922_v32 = vmul.f32 %v8960_v54, %v8960_v54 }
 0x25f   : > { %v4872_v17 = vadd.f32 %v4871_v63, %v4870_v9  ;;  %v4965_v5 = vadd.f32 %v4964_v53, %v4963_v41  ;;  %v4968_v9 = vsel %vm4825_vm9, %v4916_v16, 0.0  ;;  %v4923_v16 = vmul.f32 %v8973_v24, %v8973_v24 }
 0x261   : > { %v4874_v47 = vadd.f32 %v4873_v4, %v4872_v17  ;;  %v4967_v34 = vadd.f32 %v4966_v55, %v4965_v5  ;;  %v4970_v17 = vsel %vm4825_vm9, %v4917_v51, 0.0  ;;  %v4980_v51 = vsel %vm4825_vm9, %v4922_v32, 0.0  ;;  %v5000_v32 = vld [vmem:[#allocation3] sm:$0x1] }
 0x262   : > { %v4925_v5 = vmul.f32 %v8969_v0, %v8969_v0 }
 0x263   : > { %v4876_v20 = vadd.f32 %v4875_v3, %v4874_v47  ;;  %v4969_v43 = vadd.f32 %v4968_v9, %v4967_v34  ;;  %v4972_v47 = vsel %vm4825_vm9, %v4918_v52, 0.0 }
 0x265   : > { %v4878_v14 = vadd.f32 %v4877_v8, %v4876_v20  ;;  %v4971_v6 = vadd.f32 %v4970_v17, %v4969_v43  ;;  %v4921_v8 = vmul.f32 %v8952_v42, %v8952_v42 }
 0x267   : > { %v4880_v49 = vadd.f32 %v4879_v10, %v4878_v14  ;;  %v4973_v20 = vadd.f32 %v4972_v47, %v4971_v6  ;;  %v4976_v10 = vsel %vm4825_vm9, %v4920_v7, 0.0  ;;  %v4978_v53 = vsel %vm4825_vm9, %v4921_v8, 0.0 }
 0x269   : > { %v4882_v63 = vadd.f32 %v4881_v23, %v4880_v49  ;;  %v4975_v38 = vadd.f32 %v4974_v11, %v4973_v20  ;;  %v4924_v49 = vmul.f32 %v8977_v1, %v8977_v1 }
 0x26b   : > { %v4884_v4 = vadd.f32 %v4883_v28, %v4882_v63  ;;  %v4977_v23 = vadd.f32 %v4976_v10, %v4975_v38  ;;  %v4982_v63 = vsel %vm4825_vm9, %v4923_v16, 0.0  ;;  %v4984_v34 = vsel %vm4825_vm9, %v4924_v49, 0.0 }
 0x26d   : > { %v4886_v3 = vadd.f32 %v4885_v37, %v4884_v4  ;;  %v4979_v55 = vadd.f32 %v4978_v53, %v4977_v23  ;;  %v4926_v37 = vmul.f32 %v8975_v29, %v8975_v29 }
 0x26f   : > { %v4888_v12 = vadd.f32 %v4887_v18, %v4886_v3  ;;  %v4981_v52 = vadd.f32 %v4980_v51, %v4979_v55  ;;  %v4986_v18 = vsel %vm4825_vm9, %v4925_v5, 0.0  ;;  %v4988_v3 = vsel %vm4825_vm9, %v4926_v37, 0.0 }
 0x271   : > { %v4889_v60 = vrot.slane %v4888_v12, 4  ;;  %v4983_v4 = vadd.f32 %v4982_v63, %v4981_v52 }
 0x273   : > { %v4890_v14 = vadd.f32 %v4889_v60, %v4888_v12  ;;  %v4985_v43 = vadd.f32 %v4984_v34, %v4983_v4 }
 0x275   : > { %v4891_v41 = vrot.slane %v4890_v14, 2  ;;  %v4987_v47 = vadd.f32 %v4986_v18, %v4985_v43 }
 0x277   : > { %v4892_v28 = vadd.f32 %v4891_v41, %v4890_v14  ;;  %v4989_v6 = vadd.f32 %v4988_v3, %v4987_v47 }
 0x279   : > { %v4893_v9 = vrot.slane %v4892_v28, 1  ;;  %v4990_v12 = vrot.slane %v4989_v6, 4 }
 0x27b   : > { %v4894_v17 = vadd.f32 %v4893_v9, %v4892_v28  ;;  %v4991_v8 = vadd.f32 %v4990_v12, %v4989_v6 }
 0x27d   : > { %v4997_v7 = vadd.f32 %v4996_v59, %v4894_v17  ;;  %v4992_v11 = vrot.slane %v4991_v8, 2 }
 0x27f   : > { %4999 = vst.msk [vmem:[#allocation2] sm:$0x1] %vm4998_vm10, %v4997_v7  ;;  %v4993_v20 = vadd.f32 %v4992_v11, %v4991_v8 }
 0x281   : > { %v4994_v60 = vrot.slane %v4993_v20, 1 }
 0x283   : > { %v4995_v10 = vadd.f32 %v4994_v60, %v4993_v20 }
 0x285   : > { %v5001_v38 = vadd.f32 %v5000_v32, %v4995_v10 }
 0x287   : > { %5002 = vst.msk [vmem:[#allocation3] sm:$0x1] %vm4998_vm10, %v5001_v38 }
 0x288 PF: > { %p5003_p11 = scmp.eq.s32.totalorder %s6425_s16, 1 }
 0x28a   : > { %p5004_p12 = pnand %p5003_p11, %p242_p7 }
 0x28c   : > { %5009 = sbr.rel (%p5004_p12) target bundleno = 689 (0x2b1), region = 48 }
 0x291   : > { %v5010_v14 = vld [vmem:[#allocation2] sm:$0x1]  ;;  %v5012_v16 = vld [vmem:[#allocation3] sm:$0x1]  ;;  %vm5021_vm11 = vcmask 57344  }
 0x292   : > { %v5011_v53 = vmul.f32 0.001953125, %v5010_v14  ;;  %v5013_v23 = vmul.f32 0.001953125, %v5012_v16  ;;  %v5017_v28 = vld [vmem:[%s9331_s2] sm:$0x1] }
 0x293   : > { %v5023_v52 = vld [vmem:[%s9332_s3] sm:$0x1] }
 0x294   : > { %v5014_v41 = vmul.f32 %v5011_v53, %v5011_v53 }
 0x296   : > { %v5015_v49 = vsub.f32 %v5013_v23, %v5014_v41 }
 0x298   : > { %v5016_v51 = vmax.f32 %v5015_v49, 0.0 }
 0x29a   : > { %v5018_v55 = vadd.f32 0.001, %v5016_v51 }
 0x29c   : > { %6397 = vrsqrt.f32 %v5018_v55 }
 0x2a9   : > { %v6398_v5 = vpop.eup %6397 }
 0x2aa   : > { %v5020_v63 = vmul.f32 %v6398_v5, %v5017_v28 }
 0x2ac   : > { %5022 = vst.msk [vmem:[#allocation4] sm:$0x1] %vm5021_vm11, %v5020_v63  ;;  %v5024_v9 = vmul.f32 %v5020_v63, %v5011_v53 }
 0x2ae   : > { %v5025_v37 = vsub.f32 %v5023_v52, %v5024_v9 }
 0x2b0   : > { %5026 = vst.msk [vmem:[#allocation5] sm:$0x1] %vm5021_vm11, %v5025_v37 }
 0x2b1 PF: > { %p5829_p13 = scmp.ne.s32.totalorder %s6425_s16, 1 }
 0x2b3   : > { %5029 = sbr.rel (%p5829_p13) target bundleno = 728 (0x2d8), region = 52 }
 0x2b8   : > { %v9150_v34 = vld [vmem:[#allocation4] ss:$0 sm:$0xff]  ;;  %v9152_v4 = vld [vmem:[#allocation5] ss:$0 sm:$0xff]  ;;  %vm5140_vm12 = vcmask 64512  }
 0x2b9   : > { %v5037_v59 = vmul.f32 %v9150_v34, %v8883_v33  ;;  %v5038_v17 = vmul.f32 %v9150_v34, %v8889_v35  ;;  %v5039_v18 = vmul.f32 %v9150_v34, %v8880_v58  ;;  %v5040_v43 = vmul.f32 %v9150_v34, %v8886_v26 }
 0x2ba   : > { %v5041_v3 = vmul.f32 %v9150_v34, %v8895_v61  ;;  %v5042_v7 = vmul.f32 %v9150_v34, %v8901_v22  ;;  %v5043_v47 = vmul.f32 %v9150_v34, %v8892_v56  ;;  %v5044_v33 = vmul.f32 %v9150_v34, %v8898_v31 }
 0x2bb   : > { %v5076_v35 = vadd.f32 %v9152_v4, %v5037_v59  ;;  %v5077_v58 = vadd.f32 %v9152_v4, %v5038_v17  ;;  %v5078_v26 = vadd.f32 %v9152_v4, %v5039_v18  ;;  %v5079_v61 = vadd.f32 %v9152_v4, %v5040_v43 }
 0x2bc   : > { %v5080_v22 = vadd.f32 %v9152_v4, %v5041_v3  ;;  %v5081_v6 = vadd.f32 %v9152_v4, %v5042_v7  ;;  %v5082_v56 = vadd.f32 %v9152_v4, %v5043_v47  ;;  %v5083_v31 = vadd.f32 %v9152_v4, %v5044_v33 }
 0x2bd   : > { %v5108_v12 = vmax.f32 %v5076_v35, 0.0  ;;  %v5109_v8 = vmax.f32 %v5077_v58, 0.0  ;;  %v5110_v11 = vmax.f32 %v5078_v26, 0.0  ;;  %v5111_v20 = vmax.f32 %v5079_v61, 0.0 }
 0x2be   : > { %v5112_v60 = vmax.f32 %v5080_v22, 0.0  ;;  %v5113_v32 = vmax.f32 %v5081_v6, 0.0  ;;  %v5114_v10 = vmax.f32 %v5082_v56, 0.0  ;;  %v5115_v38 = vmax.f32 %v5083_v31, 0.0 }
 0x2bf   : > { %5141 = vst.msk [vmem:[%s6515_s5] sm:$0xff] %vm5140_vm12, %v5108_v12  ;;  %5142 = vst.msk [vmem:[%s6515_s5 + $0x8] sm:$0xff] %vm5140_vm12, %v5109_v8  ;;  %v5045_v14 = vmul.f32 %v9150_v34, %v8907_v62  ;;  %v5046_v16 = vmul.f32 %v9150_v34, %v8913_v25  ;;  %v5047_v53 = vmul.f32 %v9150_v34, %v8904_v21 }
 0x2c0   : > { %5143 = vst.msk [vmem:[%s6515_s5 + $0x10] sm:$0xff] %vm5140_vm12, %v5110_v11  ;;  %5144 = vst.msk [vmem:[%s6515_s5 + $0x18] sm:$0xff] %vm5140_vm12, %v5111_v20  ;;  %v5048_v23 = vmul.f32 %v9150_v34, %v8910_v2  ;;  %v5049_v62 = vmul.f32 %v9150_v34, %v8919_v57  ;;  %v5050_v25 = vmul.f32 %v9150_v34, %v8925_v50 }
 0x2c1   : > { %5145 = vst.msk [vmem:[%s6515_s5 + $0x20] sm:$0xff] %vm5140_vm12, %v5112_v60  ;;  %5146 = vst.msk [vmem:[%s6515_s5 + $0x28] sm:$0xff] %vm5140_vm12, %v5113_v32  ;;  %v5051_v21 = vmul.f32 %v9150_v34, %v8916_v46  ;;  %v5052_v2 = vmul.f32 %v9150_v34, %v8922_v30  ;;  %v5084_v41 = vadd.f32 %v9152_v4, %v5045_v14 }
 0x2c2   : > { %5147 = vst.msk [vmem:[%s6515_s5 + $0x30] sm:$0xff] %vm5140_vm12, %v5114_v10  ;;  %5148 = vst.msk [vmem:[%s6515_s5 + $0x38] sm:$0xff] %vm5140_vm12, %v5115_v38  ;;  %v5085_v49 = vadd.f32 %v9152_v4, %v5046_v16  ;;  %v5086_v51 = vadd.f32 %v9152_v4, %v5047_v53  ;;  %v5087_v57 = vadd.f32 %v9152_v4, %v5048_v23 }
 0x2c3   : > { %v5088_v50 = vadd.f32 %v9152_v4, %v5049_v62  ;;  %v5089_v55 = vadd.f32 %v9152_v4, %v5050_v25  ;;  %v5090_v46 = vadd.f32 %v9152_v4, %v5051_v21  ;;  %v5091_v30 = vadd.f32 %v9152_v4, %v5052_v2 }
 0x2c4   : > { %v5116_v28 = vmax.f32 %v5084_v41, 0.0  ;;  %v5117_v5 = vmax.f32 %v5085_v49, 0.0  ;;  %v5118_v63 = vmax.f32 %v5086_v51, 0.0  ;;  %v5119_v52 = vmax.f32 %v5087_v57, 0.0 }
 0x2c5   : > { %v5120_v9 = vmax.f32 %v5088_v50, 0.0  ;;  %v5121_v37 = vmax.f32 %v5089_v55, 0.0  ;;  %v5122_v59 = vmax.f32 %v5090_v46, 0.0  ;;  %v5123_v17 = vmax.f32 %v5091_v30, 0.0 }
 0x2c6   : > { %5149 = vst.msk [vmem:[%s6515_s5 + $0x40] sm:$0xff] %vm5140_vm12, %v5116_v28  ;;  %5150 = vst.msk [vmem:[%s6515_s5 + $0x48] sm:$0xff] %vm5140_vm12, %v5117_v5  ;;  %v5053_v18 = vmul.f32 %v9150_v34, %v8931_v40  ;;  %v5054_v43 = vmul.f32 %v9150_v34, %v8937_v19  ;;  %v5055_v3 = vmul.f32 %v9150_v34, %v8928_v13 }
 0x2c7   : > { %5151 = vst.msk [vmem:[%s6515_s5 + $0x50] sm:$0xff] %vm5140_vm12, %v5118_v63  ;;  %5152 = vst.msk [vmem:[%s6515_s5 + $0x58] sm:$0xff] %vm5140_vm12, %v5119_v52  ;;  %v5056_v7 = vmul.f32 %v9150_v34, %v8934_v36  ;;  %v5057_v40 = vmul.f32 %v9150_v34, %v8943_v27  ;;  %v5058_v19 = vmul.f32 %v9150_v34, %v8949_v39 }
 0x2c8   : > { %5153 = vst.msk [vmem:[%s6515_s5 + $0x60] sm:$0xff] %vm5140_vm12, %v5120_v9  ;;  %5154 = vst.msk [vmem:[%s6515_s5 + $0x68] sm:$0xff] %vm5140_vm12, %v5121_v37  ;;  %v5059_v13 = vmul.f32 %v9150_v34, %v8940_v48  ;;  %v5060_v36 = vmul.f32 %v9150_v34, %v8946_v15  ;;  %v5092_v47 = vadd.f32 %v9152_v4, %v5053_v18 }
 0x2c9   : > { %5155 = vst.msk [vmem:[%s6515_s5 + $0x70] sm:$0xff] %vm5140_vm12, %v5122_v59  ;;  %5156 = vst.msk [vmem:[%s6515_s5 + $0x78] sm:$0xff] %vm5140_vm12, %v5123_v17  ;;  %v5093_v33 = vadd.f32 %v9152_v4, %v5054_v43  ;;  %v5094_v35 = vadd.f32 %v9152_v4, %v5055_v3  ;;  %v5095_v27 = vadd.f32 %v9152_v4, %v5056_v7 }
 0x2ca   : > { %v5096_v39 = vadd.f32 %v9152_v4, %v5057_v40  ;;  %v5097_v58 = vadd.f32 %v9152_v4, %v5058_v19  ;;  %v5098_v48 = vadd.f32 %v9152_v4, %v5059_v13  ;;  %v5099_v15 = vadd.f32 %v9152_v4, %v5060_v36 }
 0x2cb   : > { %v5124_v26 = vmax.f32 %v5092_v47, 0.0  ;;  %v5125_v61 = vmax.f32 %v5093_v33, 0.0  ;;  %v5126_v22 = vmax.f32 %v5094_v35, 0.0  ;;  %v5127_v6 = vmax.f32 %v5095_v27, 0.0 }
 0x2cc   : > { %v5128_v56 = vmax.f32 %v5096_v39, 0.0  ;;  %v5129_v31 = vmax.f32 %v5097_v58, 0.0  ;;  %v5130_v12 = vmax.f32 %v5098_v48, 0.0  ;;  %v5131_v8 = vmax.f32 %v5099_v15, 0.0 }
 0x2cd   : > { %5157 = vst.msk [vmem:[%s6515_s5 + $0x80] sm:$0xff] %vm5140_vm12, %v5124_v26  ;;  %5158 = vst.msk [vmem:[%s6515_s5 + $0x88] sm:$0xff] %vm5140_vm12, %v5125_v61  ;;  %v5061_v11 = vmul.f32 %v9150_v34, %v8955_v45  ;;  %v5062_v20 = vmul.f32 %v9150_v34, %v8965_v44  ;;  %v5063_v60 = vmul.f32 %v9150_v34, %v8952_v42 }
 0x2ce   : > { %5159 = vst.msk [vmem:[%s6515_s5 + $0x90] sm:$0xff] %vm5140_vm12, %v5126_v22  ;;  %5160 = vst.msk [vmem:[%s6515_s5 + $0x98] sm:$0xff] %vm5140_vm12, %v5127_v6  ;;  %v5064_v32 = vmul.f32 %v9150_v34, %v8960_v54  ;;  %v5065_v45 = vmul.f32 %v9150_v34, %v8973_v24  ;;  %v5066_v44 = vmul.f32 %v9150_v34, %v8977_v1 }
 0x2cf   : > { %5161 = vst.msk [vmem:[%s6515_s5 + $0xa0] sm:$0xff] %vm5140_vm12, %v5128_v56  ;;  %5162 = vst.msk [vmem:[%s6515_s5 + $0xa8] sm:$0xff] %vm5140_vm12, %v5129_v31  ;;  %v5067_v42 = vmul.f32 %v9150_v34, %v8969_v0  ;;  %v5068_v54 = vmul.f32 %v9150_v34, %v8975_v29  ;;  %v5100_v10 = vadd.f32 %v9152_v4, %v5061_v11 }
 0x2d0   : > { %5163 = vst.msk [vmem:[%s6515_s5 + $0xb0] sm:$0xff] %vm5140_vm12, %v5130_v12  ;;  %5164 = vst.msk [vmem:[%s6515_s5 + $0xb8] sm:$0xff] %vm5140_vm12, %v5131_v8  ;;  %v5101_v38 = vadd.f32 %v9152_v4, %v5062_v20  ;;  %v5102_v14 = vadd.f32 %v9152_v4, %v5063_v60  ;;  %v5103_v24 = vadd.f32 %v9152_v4, %v5064_v32 }
 0x2d1   : > { %v5104_v1 = vadd.f32 %v9152_v4, %v5065_v45  ;;  %v5105_v0 = vadd.f32 %v9152_v4, %v5066_v44  ;;  %v5106_v29 = vadd.f32 %v9152_v4, %v5067_v42  ;;  %v5107_v34 = vadd.f32 %v9152_v4, %v5068_v54 }
 0x2d2   : > { %v5132_v16 = vmax.f32 %v5100_v10, 0.0  ;;  %v5133_v53 = vmax.f32 %v5101_v38, 0.0  ;;  %v5134_v23 = vmax.f32 %v5102_v14, 0.0  ;;  %v5135_v62 = vmax.f32 %v5103_v24, 0.0 }
 0x2d3   : > { %v5136_v25 = vmax.f32 %v5104_v1, 0.0  ;;  %v5137_v21 = vmax.f32 %v5105_v0, 0.0  ;;  %v5138_v2 = vmax.f32 %v5106_v29, 0.0  ;;  %v5139_v41 = vmax.f32 %v5107_v34, 0.0 }
 0x2d4   : > { %5165 = vst.msk [vmem:[%s6515_s5 + $0xc0] sm:$0xff] %vm5140_vm12, %v5132_v16  ;;  %5166 = vst.msk [vmem:[%s6515_s5 + $0xc8] sm:$0xff] %vm5140_vm12, %v5133_v53 }
 0x2d5   : > { %5167 = vst.msk [vmem:[%s6515_s5 + $0xd0] sm:$0xff] %vm5140_vm12, %v5134_v23  ;;  %5168 = vst.msk [vmem:[%s6515_s5 + $0xd8] sm:$0xff] %vm5140_vm12, %v5135_v62 }
 0x2d6   : > { %5169 = vst.msk [vmem:[%s6515_s5 + $0xe0] sm:$0xff] %vm5140_vm12, %v5136_v25  ;;  %5170 = vst.msk [vmem:[%s6515_s5 + $0xe8] sm:$0xff] %vm5140_vm12, %v5137_v21 }
 0x2d7   : > { %5171 = vst.msk [vmem:[%s6515_s5 + $0xf0] sm:$0xff] %vm5140_vm12, %v5138_v2  ;;  %5172 = vst.msk [vmem:[%s6515_s5 + $0xf8] sm:$0xff] %vm5140_vm12, %v5139_v41 }
 0x2d8 PF: > { %s14_s19 = sadd.s32 1, %s6437_s19   ;;  %s9484_s15 = smov %s6429_s17 }
 0x2d9   : > { %p11_p0 = scmp.ge.s32.totalorder %s14_s19, 6   ;;  %s9485_s16 = smov %s6433_s18 }
 0x2da   : > { %s9486_s17 = smov %s9489_s20  ;;  %s9487_s18 = smov %s9493_s21 }
 0x2db   :  { %13 = sbr.rel (!%p11_p0) target bundleno = 3 (0x3), region = 93 }

</bundles_post_ra>
